<compile_context>
chip_gen: v7x
topology: tpu7x:2x2x1
jax: 0.10.0
libtpu: 0.0.40
codegen_flags: <defaults>
</compile_context>

<pallas_src>
import functools

import numpy as np
import jax
import jax.numpy as jnp
from jax import lax
from jax.experimental import pallas as pl
from jax.experimental.pallas import tpu as pltpu


def _round_up(x, m):
    return (x + m - 1) // m * m


def _ceil_pool_len(L, k=3, s=2):
    # MaxPool1d(kernel_size=3, stride=2, ceil_mode=True) output length.
    return -(-(L - k) // s) + 1


# SqueezeNet v1_0 Fire configs: (inplanes, squeeze, expand1x1, expand3x3)
_FIRE_CFG = [(96, 16, 64, 64), (128, 16, 64, 64), (128, 32, 128, 128),
             (256, 32, 128, 128), (256, 48, 192, 192), (384, 48, 192, 192),
             (384, 64, 256, 256), (512, 64, 256, 256)]

# features: conv7/s2, relu, pool, F0, F1, F2, pool, F3, F4, F5, F6, pool, F7
_POOL_AFTER_FIRE = frozenset({2, 6})


# ---------------- the fused whole-network kernel ----------------

def _make_squeezenet_kernel(N, L_stem, fire_dims):
    """fire_dims: list of (cin_pad, sq, cout) per Fire module."""
    n_fires = len(fire_dims)

    def _shift_rows(y, delta, L):
        # z[n*L + l] = y[n*L + l + delta] if 0 <= l+delta < L else 0.
        # Per-batch static slices + concat (no cross-batch leakage); all in f32.
        C = y.shape[1]
        d = abs(delta)
        zero = jnp.zeros((d, C), y.dtype)
        pieces = []
        for n in range(N):
            yb = y[n * L:(n + 1) * L, :]
            if delta > 0:
                pieces.append(jnp.concatenate([yb[d:, :], zero], axis=0))
            else:
                pieces.append(jnp.concatenate([zero, yb[:L - d, :]], axis=0))
        return jnp.concatenate(pieces, axis=0)

    def _maxpool(y, L, sel_r):
        # MaxPool1d(k=3, s=2, ceil_mode=True) on post-ReLU data (y >= 0, so zero fill at
        # window / batch edges is equivalent to -inf). Stride-2 decimation is a tiny
        # block-diagonal 0/1 selection matmul.
        m3 = jnp.maximum(jnp.maximum(y, _shift_rows(y, 1, L)), _shift_rows(y, 2, L))
        return jnp.dot(sel_r[...], m3.astype(jnp.bfloat16),
                       preferred_element_type=jnp.float32)

    def _fire(y, L, wsq_r, bsq_r, wexp_r, bexp_r, sq):
        # squeeze 1x1 + ReLU (s never leaves registers/VMEM)
        s = jnp.dot(y.astype(jnp.bfloat16), wsq_r[...],
                    preferred_element_type=jnp.float32)
        s = jnp.maximum(s + bsq_r[...], 0.0)                       # (M, sq) f32
        # expand: [1x1 | 3x3 center] merged full-width matmul + two shifted-tap matmuls
        s_dn = _shift_rows(s, -1, L)                               # s[l-1]  (3x3 tap k=0)
        s_up = _shift_rows(s, +1, L)                               # s[l+1]  (3x3 tap k=2)
        acc = jnp.dot(s.astype(jnp.bfloat16), wexp_r[pl.ds(0, sq), :],
                      preferred_element_type=jnp.float32)
        acc += jnp.dot(s_dn.astype(jnp.bfloat16), wexp_r[pl.ds(sq, sq), :],
                       preferred_element_type=jnp.float32)
        acc += jnp.dot(s_up.astype(jnp.bfloat16), wexp_r[pl.ds(2 * sq, sq), :],
                       preferred_element_type=jnp.float32)
        return jnp.maximum(acc + bexp_r[...], 0.0)                 # (M, cout) f32

    def kernel(*refs):
        it = iter(refs)
        xu_ref, stem_w_ref, stem_b_ref = next(it), next(it), next(it)
        sel_refs = [next(it), next(it), next(it)]
        fire_refs = [(next(it), next(it), next(it), next(it)) for _ in range(n_fires)]
        final_w_ref, final_b_ref = next(it), next(it)
        o_ref = next(it)
        assert next(it, None) is None

        # ---- stem: Conv1d(Cin, 96, k=7, s=2) as im2col matmul + ReLU ----
        y = jnp.dot(xu_ref[...], stem_w_ref[...], preferred_element_type=jnp.float32)
        y = jnp.maximum(y + stem_b_ref[...], 0.0)                  # (N*L_stem, 128) f32

        L = L_stem
        sel_i = 0
        # ---- maxpool after stem ----
        y = _maxpool(y, L, sel_refs[sel_i]); sel_i += 1
        L = _ceil_pool_len(L)

        # ---- Fire modules (pools after fire 2 and fire 6) ----
        for fi, (_cin_pad, sq, _cout) in enumerate(fire_dims):
            wsq_r, bsq_r, wexp_r, bexp_r = fire_refs[fi]
            y = _fire(y, L, wsq_r, bsq_r, wexp_r, bexp_r, sq)
            if fi in _POOL_AFTER_FIRE:
                y = _maxpool(y, L, sel_refs[sel_i]); sel_i += 1
                L = _ceil_pool_len(L)

        # ---- classifier: Dropout (inference identity) -> 1x1 conv + ReLU -> avg pool ----
        # TODO(synk): Dropout(p=0.5) is an identity at inference; train-mode masking not
        # implemented.
        z = jnp.dot(y.astype(jnp.bfloat16), final_w_ref[...],
                    preferred_element_type=jnp.float32)
        z = jnp.maximum(z + final_b_ref[...], 0.0)                 # (N*L, Ncls_pad) f32
        rows = [jnp.mean(z[n * L:(n + 1) * L, :], axis=0, keepdims=True)
                for n in range(N)]
        o_ref[...] = jnp.concatenate(rows, axis=0)                 # (N, Ncls_pad)

    return kernel


# ---------------- host-side helpers (run once per forward, plain XLA) ----------------

def _im2col_stem(x_cl, kernel, stride, k_pad):
    """(N, L, Cin) channels-last -> (N*L_out, k_pad) bf16 im2col rows (k-major, c-minor)."""
    N, L, Cin = x_cl.shape
    L_out = (L - kernel) // stride + 1
    lim = stride * (L_out - 1) + 1
    cols = [lax.slice_in_dim(x_cl, k, k + lim, stride=stride, axis=1)
            for k in range(kernel)]                                 # each (N, L_out, Cin)
    xu = jnp.stack(cols, axis=2).reshape(N * L_out, kernel * Cin)
    xu = jnp.pad(xu, ((0, 0), (0, k_pad - kernel * Cin)))
    return xu.astype(jnp.bfloat16), L_out


def _pool_select_matrix(N, L_in):
    """Block-diagonal 0/1 matrix selecting row n*L_in + 2*j -> output row n*L_out + j."""
    L_out = _ceil_pool_len(L_in)
    sel = np.zeros((N * L_out, N * L_in), np.float32)
    for n in range(N):
        for j in range(L_out):
            sel[n * L_out + j, n * L_in + 2 * j] = 1.0
    return jnp.asarray(sel, dtype=jnp.bfloat16), L_out


# ---------------- parameters (deterministic; SqueezeNet '1_0' shapes) ----------------

def _kaiming_uniform(key, shape):
    # PyTorch kaiming_uniform_ on Conv1d weight (Cout, Cin, K): fan_in = Cin * K.
    fan_in = shape[1] * shape[2]
    bound = (6.0 / fan_in) ** 0.5
    return jax.random.uniform(key, shape, jnp.float32, -bound, bound)


def init_params(key, init_channels=3, num_classes=10):
    """Weights stored in matmul layout, channel-padded to lane multiples where they touch
    activations, Fire expand weights pre-stacked as [center(1x1|3x3 k=1); k=0; k=2]
    (side taps zero over the 1x1 columns), and pre-cast to bf16. Biases stay f32."""
    keys = jax.random.split(key, 2 + 3 * len(_FIRE_CFG))
    ki = iter(keys)

    stem_k = 7
    k_real = stem_k * init_channels
    k_pad = _round_up(k_real, 32)                    # bf16-friendly contraction dim
    stem_cout_pad = _round_up(96, 128)

    w0 = _kaiming_uniform(next(ki), (96, init_channels, stem_k))       # (Cout, Cin, K)
    w0f = jnp.transpose(w0, (2, 1, 0)).reshape(k_real, 96)             # k-major, c-minor
    params = {
        "stem_w": jnp.pad(w0f, ((0, k_pad - k_real),
                                (0, stem_cout_pad - 96))).astype(jnp.bfloat16),
        "stem_b": jnp.zeros((1, stem_cout_pad), jnp.float32),
        "fires": [],
    }

    for inp, sq, e1c, e3c in _FIRE_CFG:
        cout = e1c + e3c
        inp_pad = _round_up(inp, 128)                # fire0 consumes 128-padded stem output
        wsq = _kaiming_uniform(next(ki), (sq, inp, 1))
        we1 = _kaiming_uniform(next(ki), (e1c, sq, 1))
        we3 = _kaiming_uniform(next(ki), (e3c, sq, 3))
        zeros_e1 = jnp.zeros((sq, e1c), jnp.float32)
        w_center = jnp.concatenate([we1[:, :, 0].T, we3[:, :, 1].T], axis=1)   # (sq, cout)
        w_k0 = jnp.concatenate([zeros_e1, we3[:, :, 0].T], axis=1)             # (sq, cout)
        w_k2 = jnp.concatenate([zeros_e1, we3[:, :, 2].T], axis=1)             # (sq, cout)
        wexp = jnp.concatenate([w_center, w_k0, w_k2], axis=0)                 # (3*sq, cout)
        params["fires"].append({
            "wsq": jnp.pad(wsq[:, :, 0].T,
                           ((0, inp_pad - inp), (0, 0))).astype(jnp.bfloat16),  # (Cin_pad, sq)
            "bsq": jnp.zeros((1, sq), jnp.float32),
            "wexp": wexp.astype(jnp.bfloat16),
            "bexp": jnp.zeros((1, cout), jnp.float32),
        })

    ncls_pad = _round_up(num_classes, 128)
    wf = 0.01 * jax.random.normal(next(ki), (num_classes, 512, 1), jnp.float32)
    params["final_w"] = jnp.pad(
        wf[:, :, 0].T, ((0, 0), (0, ncls_pad - num_classes))).astype(jnp.bfloat16)
    params["final_b"] = jnp.zeros((1, ncls_pad), jnp.float32)
    return params


# ---------------- forward ----------------

def squeezenet_forward(params, x, num_classes=10):
    """x: (N, Cin, L) PyTorch NCL layout -> logits (N, num_classes).
    Whole network = one pallas_call. For large N / L this kernel would be tiled over
    batch; at these sizes everything fits VMEM with huge headroom."""
    N, _Cin, _L0 = x.shape
    x_cl = jnp.transpose(x, (0, 2, 1))                               # channels-last once
    xu, L1 = _im2col_stem(x_cl, 7, 2, params["stem_w"].shape[0])     # (N*L1, Kpad) bf16

    sel1, L2 = _pool_select_matrix(N, L1)                            # pool after stem
    sel2, L3 = _pool_select_matrix(N, L2)                            # pool after fire 2
    sel3, _L4 = _pool_select_matrix(N, L3)                           # pool after fire 6

    fire_dims = [(fp["wsq"].shape[0], fp["wsq"].shape[1], fp["wexp"].shape[1])
                 for fp in params["fires"]]
    kernel = _make_squeezenet_kernel(N, L1, fire_dims)

    inputs = [xu, params["stem_w"], params["stem_b"], sel1, sel2, sel3]
    for fp in params["fires"]:
        inputs += [fp["wsq"], fp["bsq"], fp["wexp"], fp["bexp"]]
    inputs += [params["final_w"], params["final_b"]]

    ncls_pad = params["final_w"].shape[1]
    out = pl.pallas_call(
        kernel,
        out_shape=jax.ShapeDtypeStruct((N, ncls_pad), jnp.float32),
        in_specs=[pl.BlockSpec(memory_space=pltpu.MemorySpace.VMEM)] * len(inputs),
        out_specs=pl.BlockSpec(memory_space=pltpu.MemorySpace.VMEM),
    )(*inputs)
    return out[:, :num_classes]                                      # drop lane padding


if __name__ == "__main__":
    key = jax.random.PRNGKey(0)
    pkey, xkey = jax.random.split(key)
    num_classes = 10
    params = init_params(pkey, init_channels=3, num_classes=num_classes)
    x = jax.random.normal(xkey, (2, 3, 64), jnp.float32)             # (batch, channels, length)
    fwd = jax.jit(functools.partial(squeezenet_forward, num_classes=num_classes))
    out = fwd(params, x)
    jax.block_until_ready(out)
    assert out.shape == (2, num_classes), out.shape
    assert bool(jnp.all(jnp.isfinite(out)))
    print("KERNEL_OK")
</pallas_src>

<mosaic_0001>
module attributes {stable_mosaic.version = 11 : i64} {
  func.func @kernel(%arg0: memref<58x32xbf16, #tpu.memory_space<vmem>>, %arg1: memref<32x128xbf16, #tpu.memory_space<vmem>>, %arg2: memref<1x128xf32, #tpu.memory_space<vmem>>, %arg3: memref<28x58xbf16, #tpu.memory_space<vmem>>, %arg4: memref<14x28xbf16, #tpu.memory_space<vmem>>, %arg5: memref<6x14xbf16, #tpu.memory_space<vmem>>, %arg6: memref<128x16xbf16, #tpu.memory_space<vmem>>, %arg7: memref<1x16xf32, #tpu.memory_space<vmem>>, %arg8: memref<48x128xbf16, #tpu.memory_space<vmem>>, %arg9: memref<1x128xf32, #tpu.memory_space<vmem>>, %arg10: memref<128x16xbf16, #tpu.memory_space<vmem>>, %arg11: memref<1x16xf32, #tpu.memory_space<vmem>>, %arg12: memref<48x128xbf16, #tpu.memory_space<vmem>>, %arg13: memref<1x128xf32, #tpu.memory_space<vmem>>, %arg14: memref<128x32xbf16, #tpu.memory_space<vmem>>, %arg15: memref<1x32xf32, #tpu.memory_space<vmem>>, %arg16: memref<96x256xbf16, #tpu.memory_space<vmem>>, %arg17: memref<1x256xf32, #tpu.memory_space<vmem>>, %arg18: memref<256x32xbf16, #tpu.memory_space<vmem>>, %arg19: memref<1x32xf32, #tpu.memory_space<vmem>>, %arg20: memref<96x256xbf16, #tpu.memory_space<vmem>>, %arg21: memref<1x256xf32, #tpu.memory_space<vmem>>, %arg22: memref<256x48xbf16, #tpu.memory_space<vmem>>, %arg23: memref<1x48xf32, #tpu.memory_space<vmem>>, %arg24: memref<144x384xbf16, #tpu.memory_space<vmem>>, %arg25: memref<1x384xf32, #tpu.memory_space<vmem>>, %arg26: memref<384x48xbf16, #tpu.memory_space<vmem>>, %arg27: memref<1x48xf32, #tpu.memory_space<vmem>>, %arg28: memref<144x384xbf16, #tpu.memory_space<vmem>>, %arg29: memref<1x384xf32, #tpu.memory_space<vmem>>, %arg30: memref<384x64xbf16, #tpu.memory_space<vmem>>, %arg31: memref<1x64xf32, #tpu.memory_space<vmem>>, %arg32: memref<192x512xbf16, #tpu.memory_space<vmem>>, %arg33: memref<1x512xf32, #tpu.memory_space<vmem>>, %arg34: memref<512x64xbf16, #tpu.memory_space<vmem>>, %arg35: memref<1x64xf32, #tpu.memory_space<vmem>>, %arg36: memref<192x512xbf16, #tpu.memory_space<vmem>>, %arg37: memref<1x512xf32, #tpu.memory_space<vmem>>, %arg38: memref<512x128xbf16, #tpu.memory_space<vmem>>, %arg39: memref<1x128xf32, #tpu.memory_space<vmem>>, %arg40: memref<2x128xf32, #tpu.memory_space<vmem>>) attributes {dimension_semantics = [], scalar_prefetch = 0 : i64, scratch_operands = 0 : i64, tpu.core_type = #tpu.core_type<tc>} {
    %c0 = arith.constant 0 : index
    %c0_0 = arith.constant 0 : index
    %0 = vector.load %arg0[%c0, %c0_0] : memref<58x32xbf16, #tpu.memory_space<vmem>>, vector<58x32xbf16>
    %c0_1 = arith.constant 0 : index
    %c0_2 = arith.constant 0 : index
    %1 = vector.load %arg1[%c0_1, %c0_2] : memref<32x128xbf16, #tpu.memory_space<vmem>>, vector<32x128xbf16>
    %cst = arith.constant dense<0.000000e+00> : vector<58x128xf32>
    %2 = tpu.matmul %0, %1, %cst {dimension_numbers = #tpu.dot_dimension_numbers<[1], [0], [0], [1], [0, 0, 1, 1], [], []>} : vector<58x32xbf16>, vector<32x128xbf16>, vector<58x128xf32> -> vector<58x128xf32>
    %c0_3 = arith.constant 0 : index
    %c0_4 = arith.constant 0 : index
    %3 = vector.load %arg2[%c0_3, %c0_4] : memref<1x128xf32, #tpu.memory_space<vmem>>, vector<1x128xf32>
    %4 = vector.broadcast %3 : vector<1x128xf32> to vector<58x128xf32>
    %5 = arith.addf %2, %4 : vector<58x128xf32>
    %cst_5 = arith.constant 0.000000e+00 : f32
    %6 = vector.broadcast %cst_5 : f32 to vector<58x128xf32>
    %7 = arith.maximumf %5, %6 : vector<58x128xf32>
    %cst_6 = arith.constant 0.000000e+00 : f32
    %8 = vector.broadcast %cst_6 : f32 to vector<1x128xf32>
    %9 = vector.extract_strided_slice %7 {offsets = [0, 0], sizes = [29, 128], strides = [1, 1]} : vector<58x128xf32> to vector<29x128xf32>
    %10 = vector.extract_strided_slice %9 {offsets = [1, 0], sizes = [28, 128], strides = [1, 1]} : vector<29x128xf32> to vector<28x128xf32>
    %11 = tpu.concatenate %10, %8 in 0 : vector<28x128xf32>, vector<1x128xf32> -> vector<29x128xf32>
    %12 = vector.extract_strided_slice %7 {offsets = [29, 0], sizes = [29, 128], strides = [1, 1]} : vector<58x128xf32> to vector<29x128xf32>
    %13 = vector.extract_strided_slice %12 {offsets = [1, 0], sizes = [28, 128], strides = [1, 1]} : vector<29x128xf32> to vector<28x128xf32>
    %14 = tpu.concatenate %13, %8 in 0 : vector<28x128xf32>, vector<1x128xf32> -> vector<29x128xf32>
    %15 = tpu.concatenate %11, %14 in 0 : vector<29x128xf32>, vector<29x128xf32> -> vector<58x128xf32>
    %16 = arith.maximumf %7, %15 : vector<58x128xf32>
    %cst_7 = arith.constant 0.000000e+00 : f32
    %17 = vector.broadcast %cst_7 : f32 to vector<2x128xf32>
    %18 = vector.extract_strided_slice %7 {offsets = [0, 0], sizes = [29, 128], strides = [1, 1]} : vector<58x128xf32> to vector<29x128xf32>
    %19 = vector.extract_strided_slice %18 {offsets = [2, 0], sizes = [27, 128], strides = [1, 1]} : vector<29x128xf32> to vector<27x128xf32>
    %20 = tpu.concatenate %19, %17 in 0 : vector<27x128xf32>, vector<2x128xf32> -> vector<29x128xf32>
    %21 = vector.extract_strided_slice %7 {offsets = [29, 0], sizes = [29, 128], strides = [1, 1]} : vector<58x128xf32> to vector<29x128xf32>
    %22 = vector.extract_strided_slice %21 {offsets = [2, 0], sizes = [27, 128], strides = [1, 1]} : vector<29x128xf32> to vector<27x128xf32>
    %23 = tpu.concatenate %22, %17 in 0 : vector<27x128xf32>, vector<2x128xf32> -> vector<29x128xf32>
    %24 = tpu.concatenate %20, %23 in 0 : vector<29x128xf32>, vector<29x128xf32> -> vector<58x128xf32>
    %25 = arith.maximumf %16, %24 : vector<58x128xf32>
    %c0_8 = arith.constant 0 : index
    %c0_9 = arith.constant 0 : index
    %26 = vector.load %arg3[%c0_8, %c0_9] : memref<28x58xbf16, #tpu.memory_space<vmem>>, vector<28x58xbf16>
    %27 = arith.truncf %25 : vector<58x128xf32> to vector<58x128xbf16>
    %cst_10 = arith.constant dense<0.000000e+00> : vector<28x128xf32>
    %28 = tpu.matmul %26, %27, %cst_10 {dimension_numbers = #tpu.dot_dimension_numbers<[1], [0], [0], [1], [0, 0, 1, 1], [], []>} : vector<28x58xbf16>, vector<58x128xbf16>, vector<28x128xf32> -> vector<28x128xf32>
    %29 = arith.truncf %28 : vector<28x128xf32> to vector<28x128xbf16>
    %c0_11 = arith.constant 0 : index
    %c0_12 = arith.constant 0 : index
    %30 = vector.load %arg6[%c0_11, %c0_12] : memref<128x16xbf16, #tpu.memory_space<vmem>>, vector<128x16xbf16>
    %cst_13 = arith.constant dense<0.000000e+00> : vector<28x16xf32>
    %31 = tpu.matmul %29, %30, %cst_13 {dimension_numbers = #tpu.dot_dimension_numbers<[1], [0], [0], [1], [0, 0, 1, 1], [], []>} : vector<28x128xbf16>, vector<128x16xbf16>, vector<28x16xf32> -> vector<28x16xf32>
    %c0_14 = arith.constant 0 : index
    %c0_15 = arith.constant 0 : index
    %32 = vector.load %arg7[%c0_14, %c0_15] : memref<1x16xf32, #tpu.memory_space<vmem>>, vector<1x16xf32>
    %33 = vector.broadcast %32 : vector<1x16xf32> to vector<28x16xf32>
    %34 = arith.addf %31, %33 : vector<28x16xf32>
    %cst_16 = arith.constant 0.000000e+00 : f32
    %35 = vector.broadcast %cst_16 : f32 to vector<28x16xf32>
    %36 = arith.maximumf %34, %35 : vector<28x16xf32>
    %cst_17 = arith.constant 0.000000e+00 : f32
    %37 = vector.broadcast %cst_17 : f32 to vector<1x16xf32>
    %38 = vector.extract_strided_slice %36 {offsets = [0, 0], sizes = [14, 16], strides = [1, 1]} : vector<28x16xf32> to vector<14x16xf32>
    %39 = vector.extract_strided_slice %38 {offsets = [0, 0], sizes = [13, 16], strides = [1, 1]} : vector<14x16xf32> to vector<13x16xf32>
    %40 = tpu.concatenate %37, %39 in 0 : vector<1x16xf32>, vector<13x16xf32> -> vector<14x16xf32>
    %41 = vector.extract_strided_slice %36 {offsets = [14, 0], sizes = [14, 16], strides = [1, 1]} : vector<28x16xf32> to vector<14x16xf32>
    %42 = vector.extract_strided_slice %41 {offsets = [0, 0], sizes = [13, 16], strides = [1, 1]} : vector<14x16xf32> to vector<13x16xf32>
    %43 = tpu.concatenate %37, %42 in 0 : vector<1x16xf32>, vector<13x16xf32> -> vector<14x16xf32>
    %44 = tpu.concatenate %40, %43 in 0 : vector<14x16xf32>, vector<14x16xf32> -> vector<28x16xf32>
    %cst_18 = arith.constant 0.000000e+00 : f32
    %45 = vector.broadcast %cst_18 : f32 to vector<1x16xf32>
    %46 = vector.extract_strided_slice %36 {offsets = [0, 0], sizes = [14, 16], strides = [1, 1]} : vector<28x16xf32> to vector<14x16xf32>
    %47 = vector.extract_strided_slice %46 {offsets = [1, 0], sizes = [13, 16], strides = [1, 1]} : vector<14x16xf32> to vector<13x16xf32>
    %48 = tpu.concatenate %47, %45 in 0 : vector<13x16xf32>, vector<1x16xf32> -> vector<14x16xf32>
    %49 = vector.extract_strided_slice %36 {offsets = [14, 0], sizes = [14, 16], strides = [1, 1]} : vector<28x16xf32> to vector<14x16xf32>
    %50 = vector.extract_strided_slice %49 {offsets = [1, 0], sizes = [13, 16], strides = [1, 1]} : vector<14x16xf32> to vector<13x16xf32>
    %51 = tpu.concatenate %50, %45 in 0 : vector<13x16xf32>, vector<1x16xf32> -> vector<14x16xf32>
    %52 = tpu.concatenate %48, %51 in 0 : vector<14x16xf32>, vector<14x16xf32> -> vector<28x16xf32>
    %53 = arith.truncf %36 : vector<28x16xf32> to vector<28x16xbf16>
    %c0_19 = arith.constant 0 : index
    %c0_20 = arith.constant 0 : index
    %54 = vector.load %arg8[%c0_19, %c0_20] : memref<48x128xbf16, #tpu.memory_space<vmem>>, vector<16x128xbf16>
    %cst_21 = arith.constant dense<0.000000e+00> : vector<28x128xf32>
    %55 = tpu.matmul %53, %54, %cst_21 {dimension_numbers = #tpu.dot_dimension_numbers<[1], [0], [0], [1], [0, 0, 1, 1], [], []>} : vector<28x16xbf16>, vector<16x128xbf16>, vector<28x128xf32> -> vector<28x128xf32>
    %56 = arith.truncf %44 : vector<28x16xf32> to vector<28x16xbf16>
    %c16 = arith.constant 16 : index
    %c0_22 = arith.constant 0 : index
    %57 = vector.load %arg8[%c16, %c0_22] : memref<48x128xbf16, #tpu.memory_space<vmem>>, vector<16x128xbf16>
    %cst_23 = arith.constant dense<0.000000e+00> : vector<28x128xf32>
    %58 = tpu.matmul %56, %57, %cst_23 {dimension_numbers = #tpu.dot_dimension_numbers<[1], [0], [0], [1], [0, 0, 1, 1], [], []>} : vector<28x16xbf16>, vector<16x128xbf16>, vector<28x128xf32> -> vector<28x128xf32>
    %59 = arith.addf %55, %58 : vector<28x128xf32>
    %60 = arith.truncf %52 : vector<28x16xf32> to vector<28x16xbf16>
    %c32 = arith.constant 32 : index
    %c0_24 = arith.constant 0 : index
    %61 = vector.load %arg8[%c32, %c0_24] : memref<48x128xbf16, #tpu.memory_space<vmem>>, vector<16x128xbf16>
    %cst_25 = arith.constant dense<0.000000e+00> : vector<28x128xf32>
    %62 = tpu.matmul %60, %61, %cst_25 {dimension_numbers = #tpu.dot_dimension_numbers<[1], [0], [0], [1], [0, 0, 1, 1], [], []>} : vector<28x16xbf16>, vector<16x128xbf16>, vector<28x128xf32> -> vector<28x128xf32>
    %63 = arith.addf %59, %62 : vector<28x128xf32>
    %c0_26 = arith.constant 0 : index
    %c0_27 = arith.constant 0 : index
    %64 = vector.load %arg9[%c0_26, %c0_27] : memref<1x128xf32, #tpu.memory_space<vmem>>, vector<1x128xf32>
    %65 = vector.broadcast %64 : vector<1x128xf32> to vector<28x128xf32>
    %66 = arith.addf %63, %65 : vector<28x128xf32>
    %cst_28 = arith.constant 0.000000e+00 : f32
    %67 = vector.broadcast %cst_28 : f32 to vector<28x128xf32>
    %68 = arith.maximumf %66, %67 : vector<28x128xf32>
    %69 = arith.truncf %68 : vector<28x128xf32> to vector<28x128xbf16>
    %c0_29 = arith.constant 0 : index
    %c0_30 = arith.constant 0 : index
    %70 = vector.load %arg10[%c0_29, %c0_30] : memref<128x16xbf16, #tpu.memory_space<vmem>>, vector<128x16xbf16>
    %cst_31 = arith.constant dense<0.000000e+00> : vector<28x16xf32>
    %71 = tpu.matmul %69, %70, %cst_31 {dimension_numbers = #tpu.dot_dimension_numbers<[1], [0], [0], [1], [0, 0, 1, 1], [], []>} : vector<28x128xbf16>, vector<128x16xbf16>, vector<28x16xf32> -> vector<28x16xf32>
    %c0_32 = arith.constant 0 : index
    %c0_33 = arith.constant 0 : index
    %72 = vector.load %arg11[%c0_32, %c0_33] : memref<1x16xf32, #tpu.memory_space<vmem>>, vector<1x16xf32>
    %73 = vector.broadcast %72 : vector<1x16xf32> to vector<28x16xf32>
    %74 = arith.addf %71, %73 : vector<28x16xf32>
    %cst_34 = arith.constant 0.000000e+00 : f32
    %75 = vector.broadcast %cst_34 : f32 to vector<28x16xf32>
    %76 = arith.maximumf %74, %75 : vector<28x16xf32>
    %cst_35 = arith.constant 0.000000e+00 : f32
    %77 = vector.broadcast %cst_35 : f32 to vector<1x16xf32>
    %78 = vector.extract_strided_slice %76 {offsets = [0, 0], sizes = [14, 16], strides = [1, 1]} : vector<28x16xf32> to vector<14x16xf32>
    %79 = vector.extract_strided_slice %78 {offsets = [0, 0], sizes = [13, 16], strides = [1, 1]} : vector<14x16xf32> to vector<13x16xf32>
    %80 = tpu.concatenate %77, %79 in 0 : vector<1x16xf32>, vector<13x16xf32> -> vector<14x16xf32>
    %81 = vector.extract_strided_slice %76 {offsets = [14, 0], sizes = [14, 16], strides = [1, 1]} : vector<28x16xf32> to vector<14x16xf32>
    %82 = vector.extract_strided_slice %81 {offsets = [0, 0], sizes = [13, 16], strides = [1, 1]} : vector<14x16xf32> to vector<13x16xf32>
    %83 = tpu.concatenate %77, %82 in 0 : vector<1x16xf32>, vector<13x16xf32> -> vector<14x16xf32>
    %84 = tpu.concatenate %80, %83 in 0 : vector<14x16xf32>, vector<14x16xf32> -> vector<28x16xf32>
    %cst_36 = arith.constant 0.000000e+00 : f32
    %85 = vector.broadcast %cst_36 : f32 to vector<1x16xf32>
    %86 = vector.extract_strided_slice %76 {offsets = [0, 0], sizes = [14, 16], strides = [1, 1]} : vector<28x16xf32> to vector<14x16xf32>
    %87 = vector.extract_strided_slice %86 {offsets = [1, 0], sizes = [13, 16], strides = [1, 1]} : vector<14x16xf32> to vector<13x16xf32>
    %88 = tpu.concatenate %87, %85 in 0 : vector<13x16xf32>, vector<1x16xf32> -> vector<14x16xf32>
    %89 = vector.extract_strided_slice %76 {offsets = [14, 0], sizes = [14, 16], strides = [1, 1]} : vector<28x16xf32> to vector<14x16xf32>
    %90 = vector.extract_strided_slice %89 {offsets = [1, 0], sizes = [13, 16], strides = [1, 1]} : vector<14x16xf32> to vector<13x16xf32>
    %91 = tpu.concatenate %90, %85 in 0 : vector<13x16xf32>, vector<1x16xf32> -> vector<14x16xf32>
    %92 = tpu.concatenate %88, %91 in 0 : vector<14x16xf32>, vector<14x16xf32> -> vector<28x16xf32>
    %93 = arith.truncf %76 : vector<28x16xf32> to vector<28x16xbf16>
    %c0_37 = arith.constant 0 : index
    %c0_38 = arith.constant 0 : index
    %94 = vector.load %arg12[%c0_37, %c0_38] : memref<48x128xbf16, #tpu.memory_space<vmem>>, vector<16x128xbf16>
    %cst_39 = arith.constant dense<0.000000e+00> : vector<28x128xf32>
    %95 = tpu.matmul %93, %94, %cst_39 {dimension_numbers = #tpu.dot_dimension_numbers<[1], [0], [0], [1], [0, 0, 1, 1], [], []>} : vector<28x16xbf16>, vector<16x128xbf16>, vector<28x128xf32> -> vector<28x128xf32>
    %96 = arith.truncf %84 : vector<28x16xf32> to vector<28x16xbf16>
    %c16_40 = arith.constant 16 : index
    %c0_41 = arith.constant 0 : index
    %97 = vector.load %arg12[%c16_40, %c0_41] : memref<48x128xbf16, #tpu.memory_space<vmem>>, vector<16x128xbf16>
    %cst_42 = arith.constant dense<0.000000e+00> : vector<28x128xf32>
    %98 = tpu.matmul %96, %97, %cst_42 {dimension_numbers = #tpu.dot_dimension_numbers<[1], [0], [0], [1], [0, 0, 1, 1], [], []>} : vector<28x16xbf16>, vector<16x128xbf16>, vector<28x128xf32> -> vector<28x128xf32>
    %99 = arith.addf %95, %98 : vector<28x128xf32>
    %100 = arith.truncf %92 : vector<28x16xf32> to vector<28x16xbf16>
    %c32_43 = arith.constant 32 : index
    %c0_44 = arith.constant 0 : index
    %101 = vector.load %arg12[%c32_43, %c0_44] : memref<48x128xbf16, #tpu.memory_space<vmem>>, vector<16x128xbf16>
    %cst_45 = arith.constant dense<0.000000e+00> : vector<28x128xf32>
    %102 = tpu.matmul %100, %101, %cst_45 {dimension_numbers = #tpu.dot_dimension_numbers<[1], [0], [0], [1], [0, 0, 1, 1], [], []>} : vector<28x16xbf16>, vector<16x128xbf16>, vector<28x128xf32> -> vector<28x128xf32>
    %103 = arith.addf %99, %102 : vector<28x128xf32>
    %c0_46 = arith.constant 0 : index
    %c0_47 = arith.constant 0 : index
    %104 = vector.load %arg13[%c0_46, %c0_47] : memref<1x128xf32, #tpu.memory_space<vmem>>, vector<1x128xf32>
    %105 = vector.broadcast %104 : vector<1x128xf32> to vector<28x128xf32>
    %106 = arith.addf %103, %105 : vector<28x128xf32>
    %cst_48 = arith.constant 0.000000e+00 : f32
    %107 = vector.broadcast %cst_48 : f32 to vector<28x128xf32>
    %108 = arith.maximumf %106, %107 : vector<28x128xf32>
    %109 = arith.truncf %108 : vector<28x128xf32> to vector<28x128xbf16>
    %c0_49 = arith.constant 0 : index
    %c0_50 = arith.constant 0 : index
    %110 = vector.load %arg14[%c0_49, %c0_50] : memref<128x32xbf16, #tpu.memory_space<vmem>>, vector<128x32xbf16>
    %cst_51 = arith.constant dense<0.000000e+00> : vector<28x32xf32>
    %111 = tpu.matmul %109, %110, %cst_51 {dimension_numbers = #tpu.dot_dimension_numbers<[1], [0], [0], [1], [0, 0, 1, 1], [], []>} : vector<28x128xbf16>, vector<128x32xbf16>, vector<28x32xf32> -> vector<28x32xf32>
    %c0_52 = arith.constant 0 : index
    %c0_53 = arith.constant 0 : index
    %112 = vector.load %arg15[%c0_52, %c0_53] : memref<1x32xf32, #tpu.memory_space<vmem>>, vector<1x32xf32>
    %113 = vector.broadcast %112 : vector<1x32xf32> to vector<28x32xf32>
    %114 = arith.addf %111, %113 : vector<28x32xf32>
    %cst_54 = arith.constant 0.000000e+00 : f32
    %115 = vector.broadcast %cst_54 : f32 to vector<28x32xf32>
    %116 = arith.maximumf %114, %115 : vector<28x32xf32>
    %cst_55 = arith.constant 0.000000e+00 : f32
    %117 = vector.broadcast %cst_55 : f32 to vector<1x32xf32>
    %118 = vector.extract_strided_slice %116 {offsets = [0, 0], sizes = [14, 32], strides = [1, 1]} : vector<28x32xf32> to vector<14x32xf32>
    %119 = vector.extract_strided_slice %118 {offsets = [0, 0], sizes = [13, 32], strides = [1, 1]} : vector<14x32xf32> to vector<13x32xf32>
    %120 = tpu.concatenate %117, %119 in 0 : vector<1x32xf32>, vector<13x32xf32> -> vector<14x32xf32>
    %121 = vector.extract_strided_slice %116 {offsets = [14, 0], sizes = [14, 32], strides = [1, 1]} : vector<28x32xf32> to vector<14x32xf32>
    %122 = vector.extract_strided_slice %121 {offsets = [0, 0], sizes = [13, 32], strides = [1, 1]} : vector<14x32xf32> to vector<13x32xf32>
    %123 = tpu.concatenate %117, %122 in 0 : vector<1x32xf32>, vector<13x32xf32> -> vector<14x32xf32>
    %124 = tpu.concatenate %120, %123 in 0 : vector<14x32xf32>, vector<14x32xf32> -> vector<28x32xf32>
    %cst_56 = arith.constant 0.000000e+00 : f32
    %125 = vector.broadcast %cst_56 : f32 to vector<1x32xf32>
    %126 = vector.extract_strided_slice %116 {offsets = [0, 0], sizes = [14, 32], strides = [1, 1]} : vector<28x32xf32> to vector<14x32xf32>
    %127 = vector.extract_strided_slice %126 {offsets = [1, 0], sizes = [13, 32], strides = [1, 1]} : vector<14x32xf32> to vector<13x32xf32>
    %128 = tpu.concatenate %127, %125 in 0 : vector<13x32xf32>, vector<1x32xf32> -> vector<14x32xf32>
    %129 = vector.extract_strided_slice %116 {offsets = [14, 0], sizes = [14, 32], strides = [1, 1]} : vector<28x32xf32> to vector<14x32xf32>
    %130 = vector.extract_strided_slice %129 {offsets = [1, 0], sizes = [13, 32], strides = [1, 1]} : vector<14x32xf32> to vector<13x32xf32>
    %131 = tpu.concatenate %130, %125 in 0 : vector<13x32xf32>, vector<1x32xf32> -> vector<14x32xf32>
    %132 = tpu.concatenate %128, %131 in 0 : vector<14x32xf32>, vector<14x32xf32> -> vector<28x32xf32>
    %133 = arith.truncf %116 : vector<28x32xf32> to vector<28x32xbf16>
    %c0_57 = arith.constant 0 : index
    %c0_58 = arith.constant 0 : index
    %134 = vector.load %arg16[%c0_57, %c0_58] : memref<96x256xbf16, #tpu.memory_space<vmem>>, vector<32x256xbf16>
    %cst_59 = arith.constant dense<0.000000e+00> : vector<28x256xf32>
    %135 = tpu.matmul %133, %134, %cst_59 {dimension_numbers = #tpu.dot_dimension_numbers<[1], [0], [0], [1], [0, 0, 1, 1], [], []>} : vector<28x32xbf16>, vector<32x256xbf16>, vector<28x256xf32> -> vector<28x256xf32>
    %136 = arith.truncf %124 : vector<28x32xf32> to vector<28x32xbf16>
    %c32_60 = arith.constant 32 : index
    %c0_61 = arith.constant 0 : index
    %137 = vector.load %arg16[%c32_60, %c0_61] : memref<96x256xbf16, #tpu.memory_space<vmem>>, vector<32x256xbf16>
    %cst_62 = arith.constant dense<0.000000e+00> : vector<28x256xf32>
    %138 = tpu.matmul %136, %137, %cst_62 {dimension_numbers = #tpu.dot_dimension_numbers<[1], [0], [0], [1], [0, 0, 1, 1], [], []>} : vector<28x32xbf16>, vector<32x256xbf16>, vector<28x256xf32> -> vector<28x256xf32>
    %139 = arith.addf %135, %138 : vector<28x256xf32>
    %140 = arith.truncf %132 : vector<28x32xf32> to vector<28x32xbf16>
    %c64 = arith.constant 64 : index
    %c0_63 = arith.constant 0 : index
    %141 = vector.load %arg16[%c64, %c0_63] : memref<96x256xbf16, #tpu.memory_space<vmem>>, vector<32x256xbf16>
    %cst_64 = arith.constant dense<0.000000e+00> : vector<28x256xf32>
    %142 = tpu.matmul %140, %141, %cst_64 {dimension_numbers = #tpu.dot_dimension_numbers<[1], [0], [0], [1], [0, 0, 1, 1], [], []>} : vector<28x32xbf16>, vector<32x256xbf16>, vector<28x256xf32> -> vector<28x256xf32>
    %143 = arith.addf %139, %142 : vector<28x256xf32>
    %c0_65 = arith.constant 0 : index
    %c0_66 = arith.constant 0 : index
    %144 = vector.load %arg17[%c0_65, %c0_66] : memref<1x256xf32, #tpu.memory_space<vmem>>, vector<1x256xf32>
    %145 = vector.broadcast %144 : vector<1x256xf32> to vector<28x256xf32>
    %146 = arith.addf %143, %145 : vector<28x256xf32>
    %cst_67 = arith.constant 0.000000e+00 : f32
    %147 = vector.broadcast %cst_67 : f32 to vector<28x256xf32>
    %148 = arith.maximumf %146, %147 : vector<28x256xf32>
    %cst_68 = arith.constant 0.000000e+00 : f32
    %149 = vector.broadcast %cst_68 : f32 to vector<1x256xf32>
    %150 = vector.extract_strided_slice %148 {offsets = [0, 0], sizes = [14, 256], strides = [1, 1]} : vector<28x256xf32> to vector<14x256xf32>
    %151 = vector.extract_strided_slice %150 {offsets = [1, 0], sizes = [13, 256], strides = [1, 1]} : vector<14x256xf32> to vector<13x256xf32>
    %152 = tpu.concatenate %151, %149 in 0 : vector<13x256xf32>, vector<1x256xf32> -> vector<14x256xf32>
    %153 = vector.extract_strided_slice %148 {offsets = [14, 0], sizes = [14, 256], strides = [1, 1]} : vector<28x256xf32> to vector<14x256xf32>
    %154 = vector.extract_strided_slice %153 {offsets = [1, 0], sizes = [13, 256], strides = [1, 1]} : vector<14x256xf32> to vector<13x256xf32>
    %155 = tpu.concatenate %154, %149 in 0 : vector<13x256xf32>, vector<1x256xf32> -> vector<14x256xf32>
    %156 = tpu.concatenate %152, %155 in 0 : vector<14x256xf32>, vector<14x256xf32> -> vector<28x256xf32>
    %157 = arith.maximumf %148, %156 : vector<28x256xf32>
    %cst_69 = arith.constant 0.000000e+00 : f32
    %158 = vector.broadcast %cst_69 : f32 to vector<2x256xf32>
    %159 = vector.extract_strided_slice %148 {offsets = [0, 0], sizes = [14, 256], strides = [1, 1]} : vector<28x256xf32> to vector<14x256xf32>
    %160 = vector.extract_strided_slice %159 {offsets = [2, 0], sizes = [12, 256], strides = [1, 1]} : vector<14x256xf32> to vector<12x256xf32>
    %161 = tpu.concatenate %160, %158 in 0 : vector<12x256xf32>, vector<2x256xf32> -> vector<14x256xf32>
    %162 = vector.extract_strided_slice %148 {offsets = [14, 0], sizes = [14, 256], strides = [1, 1]} : vector<28x256xf32> to vector<14x256xf32>
    %163 = vector.extract_strided_slice %162 {offsets = [2, 0], sizes = [12, 256], strides = [1, 1]} : vector<14x256xf32> to vector<12x256xf32>
    %164 = tpu.concatenate %163, %158 in 0 : vector<12x256xf32>, vector<2x256xf32> -> vector<14x256xf32>
    %165 = tpu.concatenate %161, %164 in 0 : vector<14x256xf32>, vector<14x256xf32> -> vector<28x256xf32>
    %166 = arith.maximumf %157, %165 : vector<28x256xf32>
    %c0_70 = arith.constant 0 : index
    %c0_71 = arith.constant 0 : index
    %167 = vector.load %arg4[%c0_70, %c0_71] : memref<14x28xbf16, #tpu.memory_space<vmem>>, vector<14x28xbf16>
    %168 = arith.truncf %166 : vector<28x256xf32> to vector<28x256xbf16>
    %cst_72 = arith.constant dense<0.000000e+00> : vector<14x256xf32>
    %169 = tpu.matmul %167, %168, %cst_72 {dimension_numbers = #tpu.dot_dimension_numbers<[1], [0], [0], [1], [0, 0, 1, 1], [], []>} : vector<14x28xbf16>, vector<28x256xbf16>, vector<14x256xf32> -> vector<14x256xf32>
    %170 = arith.truncf %169 : vector<14x256xf32> to vector<14x256xbf16>
    %c0_73 = arith.constant 0 : index
    %c0_74 = arith.constant 0 : index
    %171 = vector.load %arg18[%c0_73, %c0_74] : memref<256x32xbf16, #tpu.memory_space<vmem>>, vector<256x32xbf16>
    %cst_75 = arith.constant dense<0.000000e+00> : vector<14x32xf32>
    %172 = tpu.matmul %170, %171, %cst_75 {dimension_numbers = #tpu.dot_dimension_numbers<[1], [0], [0], [1], [0, 0, 1, 1], [], []>} : vector<14x256xbf16>, vector<256x32xbf16>, vector<14x32xf32> -> vector<14x32xf32>
    %c0_76 = arith.constant 0 : index
    %c0_77 = arith.constant 0 : index
    %173 = vector.load %arg19[%c0_76, %c0_77] : memref<1x32xf32, #tpu.memory_space<vmem>>, vector<1x32xf32>
    %174 = vector.broadcast %173 : vector<1x32xf32> to vector<14x32xf32>
    %175 = arith.addf %172, %174 : vector<14x32xf32>
    %cst_78 = arith.constant 0.000000e+00 : f32
    %176 = vector.broadcast %cst_78 : f32 to vector<14x32xf32>
    %177 = arith.maximumf %175, %176 : vector<14x32xf32>
    %cst_79 = arith.constant 0.000000e+00 : f32
    %178 = vector.broadcast %cst_79 : f32 to vector<1x32xf32>
    %179 = vector.extract_strided_slice %177 {offsets = [0, 0], sizes = [7, 32], strides = [1, 1]} : vector<14x32xf32> to vector<7x32xf32>
    %180 = vector.extract_strided_slice %179 {offsets = [0, 0], sizes = [6, 32], strides = [1, 1]} : vector<7x32xf32> to vector<6x32xf32>
    %181 = tpu.concatenate %178, %180 in 0 : vector<1x32xf32>, vector<6x32xf32> -> vector<7x32xf32>
    %182 = vector.extract_strided_slice %177 {offsets = [7, 0], sizes = [7, 32], strides = [1, 1]} : vector<14x32xf32> to vector<7x32xf32>
    %183 = vector.extract_strided_slice %182 {offsets = [0, 0], sizes = [6, 32], strides = [1, 1]} : vector<7x32xf32> to vector<6x32xf32>
    %184 = tpu.concatenate %178, %183 in 0 : vector<1x32xf32>, vector<6x32xf32> -> vector<7x32xf32>
    %185 = tpu.concatenate %181, %184 in 0 : vector<7x32xf32>, vector<7x32xf32> -> vector<14x32xf32>
    %cst_80 = arith.constant 0.000000e+00 : f32
    %186 = vector.broadcast %cst_80 : f32 to vector<1x32xf32>
    %187 = vector.extract_strided_slice %177 {offsets = [0, 0], sizes = [7, 32], strides = [1, 1]} : vector<14x32xf32> to vector<7x32xf32>
    %188 = vector.extract_strided_slice %187 {offsets = [1, 0], sizes = [6, 32], strides = [1, 1]} : vector<7x32xf32> to vector<6x32xf32>
    %189 = tpu.concatenate %188, %186 in 0 : vector<6x32xf32>, vector<1x32xf32> -> vector<7x32xf32>
    %190 = vector.extract_strided_slice %177 {offsets = [7, 0], sizes = [7, 32], strides = [1, 1]} : vector<14x32xf32> to vector<7x32xf32>
    %191 = vector.extract_strided_slice %190 {offsets = [1, 0], sizes = [6, 32], strides = [1, 1]} : vector<7x32xf32> to vector<6x32xf32>
    %192 = tpu.concatenate %191, %186 in 0 : vector<6x32xf32>, vector<1x32xf32> -> vector<7x32xf32>
    %193 = tpu.concatenate %189, %192 in 0 : vector<7x32xf32>, vector<7x32xf32> -> vector<14x32xf32>
    %194 = arith.truncf %177 : vector<14x32xf32> to vector<14x32xbf16>
    %c0_81 = arith.constant 0 : index
    %c0_82 = arith.constant 0 : index
    %195 = vector.load %arg20[%c0_81, %c0_82] : memref<96x256xbf16, #tpu.memory_space<vmem>>, vector<32x256xbf16>
    %cst_83 = arith.constant dense<0.000000e+00> : vector<14x256xf32>
    %196 = tpu.matmul %194, %195, %cst_83 {dimension_numbers = #tpu.dot_dimension_numbers<[1], [0], [0], [1], [0, 0, 1, 1], [], []>} : vector<14x32xbf16>, vector<32x256xbf16>, vector<14x256xf32> -> vector<14x256xf32>
    %197 = arith.truncf %185 : vector<14x32xf32> to vector<14x32xbf16>
    %c32_84 = arith.constant 32 : index
    %c0_85 = arith.constant 0 : index
    %198 = vector.load %arg20[%c32_84, %c0_85] : memref<96x256xbf16, #tpu.memory_space<vmem>>, vector<32x256xbf16>
    %cst_86 = arith.constant dense<0.000000e+00> : vector<14x256xf32>
    %199 = tpu.matmul %197, %198, %cst_86 {dimension_numbers = #tpu.dot_dimension_numbers<[1], [0], [0], [1], [0, 0, 1, 1], [], []>} : vector<14x32xbf16>, vector<32x256xbf16>, vector<14x256xf32> -> vector<14x256xf32>
    %200 = arith.addf %196, %199 : vector<14x256xf32>
    %201 = arith.truncf %193 : vector<14x32xf32> to vector<14x32xbf16>
    %c64_87 = arith.constant 64 : index
    %c0_88 = arith.constant 0 : index
    %202 = vector.load %arg20[%c64_87, %c0_88] : memref<96x256xbf16, #tpu.memory_space<vmem>>, vector<32x256xbf16>
    %cst_89 = arith.constant dense<0.000000e+00> : vector<14x256xf32>
    %203 = tpu.matmul %201, %202, %cst_89 {dimension_numbers = #tpu.dot_dimension_numbers<[1], [0], [0], [1], [0, 0, 1, 1], [], []>} : vector<14x32xbf16>, vector<32x256xbf16>, vector<14x256xf32> -> vector<14x256xf32>
    %204 = arith.addf %200, %203 : vector<14x256xf32>
    %c0_90 = arith.constant 0 : index
    %c0_91 = arith.constant 0 : index
    %205 = vector.load %arg21[%c0_90, %c0_91] : memref<1x256xf32, #tpu.memory_space<vmem>>, vector<1x256xf32>
    %206 = vector.broadcast %205 : vector<1x256xf32> to vector<14x256xf32>
    %207 = arith.addf %204, %206 : vector<14x256xf32>
    %cst_92 = arith.constant 0.000000e+00 : f32
    %208 = vector.broadcast %cst_92 : f32 to vector<14x256xf32>
    %209 = arith.maximumf %207, %208 : vector<14x256xf32>
    %210 = arith.truncf %209 : vector<14x256xf32> to vector<14x256xbf16>
    %c0_93 = arith.constant 0 : index
    %c0_94 = arith.constant 0 : index
    %211 = vector.load %arg22[%c0_93, %c0_94] : memref<256x48xbf16, #tpu.memory_space<vmem>>, vector<256x48xbf16>
    %cst_95 = arith.constant dense<0.000000e+00> : vector<14x48xf32>
    %212 = tpu.matmul %210, %211, %cst_95 {dimension_numbers = #tpu.dot_dimension_numbers<[1], [0], [0], [1], [0, 0, 1, 1], [], []>} : vector<14x256xbf16>, vector<256x48xbf16>, vector<14x48xf32> -> vector<14x48xf32>
    %c0_96 = arith.constant 0 : index
    %c0_97 = arith.constant 0 : index
    %213 = vector.load %arg23[%c0_96, %c0_97] : memref<1x48xf32, #tpu.memory_space<vmem>>, vector<1x48xf32>
    %214 = vector.broadcast %213 : vector<1x48xf32> to vector<14x48xf32>
    %215 = arith.addf %212, %214 : vector<14x48xf32>
    %cst_98 = arith.constant 0.000000e+00 : f32
    %216 = vector.broadcast %cst_98 : f32 to vector<14x48xf32>
    %217 = arith.maximumf %215, %216 : vector<14x48xf32>
    %cst_99 = arith.constant 0.000000e+00 : f32
    %218 = vector.broadcast %cst_99 : f32 to vector<1x48xf32>
    %219 = vector.extract_strided_slice %217 {offsets = [0, 0], sizes = [7, 48], strides = [1, 1]} : vector<14x48xf32> to vector<7x48xf32>
    %220 = vector.extract_strided_slice %219 {offsets = [0, 0], sizes = [6, 48], strides = [1, 1]} : vector<7x48xf32> to vector<6x48xf32>
    %221 = tpu.concatenate %218, %220 in 0 : vector<1x48xf32>, vector<6x48xf32> -> vector<7x48xf32>
    %222 = vector.extract_strided_slice %217 {offsets = [7, 0], sizes = [7, 48], strides = [1, 1]} : vector<14x48xf32> to vector<7x48xf32>
    %223 = vector.extract_strided_slice %222 {offsets = [0, 0], sizes = [6, 48], strides = [1, 1]} : vector<7x48xf32> to vector<6x48xf32>
    %224 = tpu.concatenate %218, %223 in 0 : vector<1x48xf32>, vector<6x48xf32> -> vector<7x48xf32>
    %225 = tpu.concatenate %221, %224 in 0 : vector<7x48xf32>, vector<7x48xf32> -> vector<14x48xf32>
    %cst_100 = arith.constant 0.000000e+00 : f32
    %226 = vector.broadcast %cst_100 : f32 to vector<1x48xf32>
    %227 = vector.extract_strided_slice %217 {offsets = [0, 0], sizes = [7, 48], strides = [1, 1]} : vector<14x48xf32> to vector<7x48xf32>
    %228 = vector.extract_strided_slice %227 {offsets = [1, 0], sizes = [6, 48], strides = [1, 1]} : vector<7x48xf32> to vector<6x48xf32>
    %229 = tpu.concatenate %228, %226 in 0 : vector<6x48xf32>, vector<1x48xf32> -> vector<7x48xf32>
    %230 = vector.extract_strided_slice %217 {offsets = [7, 0], sizes = [7, 48], strides = [1, 1]} : vector<14x48xf32> to vector<7x48xf32>
    %231 = vector.extract_strided_slice %230 {offsets = [1, 0], sizes = [6, 48], strides = [1, 1]} : vector<7x48xf32> to vector<6x48xf32>
    %232 = tpu.concatenate %231, %226 in 0 : vector<6x48xf32>, vector<1x48xf32> -> vector<7x48xf32>
    %233 = tpu.concatenate %229, %232 in 0 : vector<7x48xf32>, vector<7x48xf32> -> vector<14x48xf32>
    %234 = arith.truncf %217 : vector<14x48xf32> to vector<14x48xbf16>
    %c0_101 = arith.constant 0 : index
    %c0_102 = arith.constant 0 : index
    %235 = vector.load %arg24[%c0_101, %c0_102] : memref<144x384xbf16, #tpu.memory_space<vmem>>, vector<48x384xbf16>
    %cst_103 = arith.constant dense<0.000000e+00> : vector<14x384xf32>
    %236 = tpu.matmul %234, %235, %cst_103 {dimension_numbers = #tpu.dot_dimension_numbers<[1], [0], [0], [1], [0, 0, 1, 1], [], []>} : vector<14x48xbf16>, vector<48x384xbf16>, vector<14x384xf32> -> vector<14x384xf32>
    %237 = arith.truncf %225 : vector<14x48xf32> to vector<14x48xbf16>
    %c48 = arith.constant 48 : index
    %c0_104 = arith.constant 0 : index
    %238 = vector.load %arg24[%c48, %c0_104] : memref<144x384xbf16, #tpu.memory_space<vmem>>, vector<48x384xbf16>
    %cst_105 = arith.constant dense<0.000000e+00> : vector<14x384xf32>
    %239 = tpu.matmul %237, %238, %cst_105 {dimension_numbers = #tpu.dot_dimension_numbers<[1], [0], [0], [1], [0, 0, 1, 1], [], []>} : vector<14x48xbf16>, vector<48x384xbf16>, vector<14x384xf32> -> vector<14x384xf32>
    %240 = arith.addf %236, %239 : vector<14x384xf32>
    %241 = arith.truncf %233 : vector<14x48xf32> to vector<14x48xbf16>
    %c96 = arith.constant 96 : index
    %c0_106 = arith.constant 0 : index
    %242 = vector.load %arg24[%c96, %c0_106] : memref<144x384xbf16, #tpu.memory_space<vmem>>, vector<48x384xbf16>
    %cst_107 = arith.constant dense<0.000000e+00> : vector<14x384xf32>
    %243 = tpu.matmul %241, %242, %cst_107 {dimension_numbers = #tpu.dot_dimension_numbers<[1], [0], [0], [1], [0, 0, 1, 1], [], []>} : vector<14x48xbf16>, vector<48x384xbf16>, vector<14x384xf32> -> vector<14x384xf32>
    %244 = arith.addf %240, %243 : vector<14x384xf32>
    %c0_108 = arith.constant 0 : index
    %c0_109 = arith.constant 0 : index
    %245 = vector.load %arg25[%c0_108, %c0_109] : memref<1x384xf32, #tpu.memory_space<vmem>>, vector<1x384xf32>
    %246 = vector.broadcast %245 : vector<1x384xf32> to vector<14x384xf32>
    %247 = arith.addf %244, %246 : vector<14x384xf32>
    %cst_110 = arith.constant 0.000000e+00 : f32
    %248 = vector.broadcast %cst_110 : f32 to vector<14x384xf32>
    %249 = arith.maximumf %247, %248 : vector<14x384xf32>
    %250 = arith.truncf %249 : vector<14x384xf32> to vector<14x384xbf16>
    %c0_111 = arith.constant 0 : index
    %c0_112 = arith.constant 0 : index
    %251 = vector.load %arg26[%c0_111, %c0_112] : memref<384x48xbf16, #tpu.memory_space<vmem>>, vector<384x48xbf16>
    %cst_113 = arith.constant dense<0.000000e+00> : vector<14x48xf32>
    %252 = tpu.matmul %250, %251, %cst_113 {dimension_numbers = #tpu.dot_dimension_numbers<[1], [0], [0], [1], [0, 0, 1, 1], [], []>} : vector<14x384xbf16>, vector<384x48xbf16>, vector<14x48xf32> -> vector<14x48xf32>
    %c0_114 = arith.constant 0 : index
    %c0_115 = arith.constant 0 : index
    %253 = vector.load %arg27[%c0_114, %c0_115] : memref<1x48xf32, #tpu.memory_space<vmem>>, vector<1x48xf32>
    %254 = vector.broadcast %253 : vector<1x48xf32> to vector<14x48xf32>
    %255 = arith.addf %252, %254 : vector<14x48xf32>
    %cst_116 = arith.constant 0.000000e+00 : f32
    %256 = vector.broadcast %cst_116 : f32 to vector<14x48xf32>
    %257 = arith.maximumf %255, %256 : vector<14x48xf32>
    %cst_117 = arith.constant 0.000000e+00 : f32
    %258 = vector.broadcast %cst_117 : f32 to vector<1x48xf32>
    %259 = vector.extract_strided_slice %257 {offsets = [0, 0], sizes = [7, 48], strides = [1, 1]} : vector<14x48xf32> to vector<7x48xf32>
    %260 = vector.extract_strided_slice %259 {offsets = [0, 0], sizes = [6, 48], strides = [1, 1]} : vector<7x48xf32> to vector<6x48xf32>
    %261 = tpu.concatenate %258, %260 in 0 : vector<1x48xf32>, vector<6x48xf32> -> vector<7x48xf32>
    %262 = vector.extract_strided_slice %257 {offsets = [7, 0], sizes = [7, 48], strides = [1, 1]} : vector<14x48xf32> to vector<7x48xf32>
    %263 = vector.extract_strided_slice %262 {offsets = [0, 0], sizes = [6, 48], strides = [1, 1]} : vector<7x48xf32> to vector<6x48xf32>
    %264 = tpu.concatenate %258, %263 in 0 : vector<1x48xf32>, vector<6x48xf32> -> vector<7x48xf32>
    %265 = tpu.concatenate %261, %264 in 0 : vector<7x48xf32>, vector<7x48xf32> -> vector<14x48xf32>
    %cst_118 = arith.constant 0.000000e+00 : f32
    %266 = vector.broadcast %cst_118 : f32 to vector<1x48xf32>
    %267 = vector.extract_strided_slice %257 {offsets = [0, 0], sizes = [7, 48], strides = [1, 1]} : vector<14x48xf32> to vector<7x48xf32>
    %268 = vector.extract_strided_slice %267 {offsets = [1, 0], sizes = [6, 48], strides = [1, 1]} : vector<7x48xf32> to vector<6x48xf32>
    %269 = tpu.concatenate %268, %266 in 0 : vector<6x48xf32>, vector<1x48xf32> -> vector<7x48xf32>
    %270 = vector.extract_strided_slice %257 {offsets = [7, 0], sizes = [7, 48], strides = [1, 1]} : vector<14x48xf32> to vector<7x48xf32>
    %271 = vector.extract_strided_slice %270 {offsets = [1, 0], sizes = [6, 48], strides = [1, 1]} : vector<7x48xf32> to vector<6x48xf32>
    %272 = tpu.concatenate %271, %266 in 0 : vector<6x48xf32>, vector<1x48xf32> -> vector<7x48xf32>
    %273 = tpu.concatenate %269, %272 in 0 : vector<7x48xf32>, vector<7x48xf32> -> vector<14x48xf32>
    %274 = arith.truncf %257 : vector<14x48xf32> to vector<14x48xbf16>
    %c0_119 = arith.constant 0 : index
    %c0_120 = arith.constant 0 : index
    %275 = vector.load %arg28[%c0_119, %c0_120] : memref<144x384xbf16, #tpu.memory_space<vmem>>, vector<48x384xbf16>
    %cst_121 = arith.constant dense<0.000000e+00> : vector<14x384xf32>
    %276 = tpu.matmul %274, %275, %cst_121 {dimension_numbers = #tpu.dot_dimension_numbers<[1], [0], [0], [1], [0, 0, 1, 1], [], []>} : vector<14x48xbf16>, vector<48x384xbf16>, vector<14x384xf32> -> vector<14x384xf32>
    %277 = arith.truncf %265 : vector<14x48xf32> to vector<14x48xbf16>
    %c48_122 = arith.constant 48 : index
    %c0_123 = arith.constant 0 : index
    %278 = vector.load %arg28[%c48_122, %c0_123] : memref<144x384xbf16, #tpu.memory_space<vmem>>, vector<48x384xbf16>
    %cst_124 = arith.constant dense<0.000000e+00> : vector<14x384xf32>
    %279 = tpu.matmul %277, %278, %cst_124 {dimension_numbers = #tpu.dot_dimension_numbers<[1], [0], [0], [1], [0, 0, 1, 1], [], []>} : vector<14x48xbf16>, vector<48x384xbf16>, vector<14x384xf32> -> vector<14x384xf32>
    %280 = arith.addf %276, %279 : vector<14x384xf32>
    %281 = arith.truncf %273 : vector<14x48xf32> to vector<14x48xbf16>
    %c96_125 = arith.constant 96 : index
    %c0_126 = arith.constant 0 : index
    %282 = vector.load %arg28[%c96_125, %c0_126] : memref<144x384xbf16, #tpu.memory_space<vmem>>, vector<48x384xbf16>
    %cst_127 = arith.constant dense<0.000000e+00> : vector<14x384xf32>
    %283 = tpu.matmul %281, %282, %cst_127 {dimension_numbers = #tpu.dot_dimension_numbers<[1], [0], [0], [1], [0, 0, 1, 1], [], []>} : vector<14x48xbf16>, vector<48x384xbf16>, vector<14x384xf32> -> vector<14x384xf32>
    %284 = arith.addf %280, %283 : vector<14x384xf32>
    %c0_128 = arith.constant 0 : index
    %c0_129 = arith.constant 0 : index
    %285 = vector.load %arg29[%c0_128, %c0_129] : memref<1x384xf32, #tpu.memory_space<vmem>>, vector<1x384xf32>
    %286 = vector.broadcast %285 : vector<1x384xf32> to vector<14x384xf32>
    %287 = arith.addf %284, %286 : vector<14x384xf32>
    %cst_130 = arith.constant 0.000000e+00 : f32
    %288 = vector.broadcast %cst_130 : f32 to vector<14x384xf32>
    %289 = arith.maximumf %287, %288 : vector<14x384xf32>
    %290 = arith.truncf %289 : vector<14x384xf32> to vector<14x384xbf16>
    %c0_131 = arith.constant 0 : index
    %c0_132 = arith.constant 0 : index
    %291 = vector.load %arg30[%c0_131, %c0_132] : memref<384x64xbf16, #tpu.memory_space<vmem>>, vector<384x64xbf16>
    %cst_133 = arith.constant dense<0.000000e+00> : vector<14x64xf32>
    %292 = tpu.matmul %290, %291, %cst_133 {dimension_numbers = #tpu.dot_dimension_numbers<[1], [0], [0], [1], [0, 0, 1, 1], [], []>} : vector<14x384xbf16>, vector<384x64xbf16>, vector<14x64xf32> -> vector<14x64xf32>
    %c0_134 = arith.constant 0 : index
    %c0_135 = arith.constant 0 : index
    %293 = vector.load %arg31[%c0_134, %c0_135] : memref<1x64xf32, #tpu.memory_space<vmem>>, vector<1x64xf32>
    %294 = vector.broadcast %293 : vector<1x64xf32> to vector<14x64xf32>
    %295 = arith.addf %292, %294 : vector<14x64xf32>
    %cst_136 = arith.constant 0.000000e+00 : f32
    %296 = vector.broadcast %cst_136 : f32 to vector<14x64xf32>
    %297 = arith.maximumf %295, %296 : vector<14x64xf32>
    %cst_137 = arith.constant 0.000000e+00 : f32
    %298 = vector.broadcast %cst_137 : f32 to vector<1x64xf32>
    %299 = vector.extract_strided_slice %297 {offsets = [0, 0], sizes = [7, 64], strides = [1, 1]} : vector<14x64xf32> to vector<7x64xf32>
    %300 = vector.extract_strided_slice %299 {offsets = [0, 0], sizes = [6, 64], strides = [1, 1]} : vector<7x64xf32> to vector<6x64xf32>
    %301 = tpu.concatenate %298, %300 in 0 : vector<1x64xf32>, vector<6x64xf32> -> vector<7x64xf32>
    %302 = vector.extract_strided_slice %297 {offsets = [7, 0], sizes = [7, 64], strides = [1, 1]} : vector<14x64xf32> to vector<7x64xf32>
    %303 = vector.extract_strided_slice %302 {offsets = [0, 0], sizes = [6, 64], strides = [1, 1]} : vector<7x64xf32> to vector<6x64xf32>
    %304 = tpu.concatenate %298, %303 in 0 : vector<1x64xf32>, vector<6x64xf32> -> vector<7x64xf32>
    %305 = tpu.concatenate %301, %304 in 0 : vector<7x64xf32>, vector<7x64xf32> -> vector<14x64xf32>
    %cst_138 = arith.constant 0.000000e+00 : f32
    %306 = vector.broadcast %cst_138 : f32 to vector<1x64xf32>
    %307 = vector.extract_strided_slice %297 {offsets = [0, 0], sizes = [7, 64], strides = [1, 1]} : vector<14x64xf32> to vector<7x64xf32>
    %308 = vector.extract_strided_slice %307 {offsets = [1, 0], sizes = [6, 64], strides = [1, 1]} : vector<7x64xf32> to vector<6x64xf32>
    %309 = tpu.concatenate %308, %306 in 0 : vector<6x64xf32>, vector<1x64xf32> -> vector<7x64xf32>
    %310 = vector.extract_strided_slice %297 {offsets = [7, 0], sizes = [7, 64], strides = [1, 1]} : vector<14x64xf32> to vector<7x64xf32>
    %311 = vector.extract_strided_slice %310 {offsets = [1, 0], sizes = [6, 64], strides = [1, 1]} : vector<7x64xf32> to vector<6x64xf32>
    %312 = tpu.concatenate %311, %306 in 0 : vector<6x64xf32>, vector<1x64xf32> -> vector<7x64xf32>
    %313 = tpu.concatenate %309, %312 in 0 : vector<7x64xf32>, vector<7x64xf32> -> vector<14x64xf32>
    %314 = arith.truncf %297 : vector<14x64xf32> to vector<14x64xbf16>
    %c0_139 = arith.constant 0 : index
    %c0_140 = arith.constant 0 : index
    %315 = vector.load %arg32[%c0_139, %c0_140] : memref<192x512xbf16, #tpu.memory_space<vmem>>, vector<64x512xbf16>
    %cst_141 = arith.constant dense<0.000000e+00> : vector<14x512xf32>
    %316 = tpu.matmul %314, %315, %cst_141 {dimension_numbers = #tpu.dot_dimension_numbers<[1], [0], [0], [1], [0, 0, 1, 1], [], []>} : vector<14x64xbf16>, vector<64x512xbf16>, vector<14x512xf32> -> vector<14x512xf32>
    %317 = arith.truncf %305 : vector<14x64xf32> to vector<14x64xbf16>
    %c64_142 = arith.constant 64 : index
    %c0_143 = arith.constant 0 : index
    %318 = vector.load %arg32[%c64_142, %c0_143] : memref<192x512xbf16, #tpu.memory_space<vmem>>, vector<64x512xbf16>
    %cst_144 = arith.constant dense<0.000000e+00> : vector<14x512xf32>
    %319 = tpu.matmul %317, %318, %cst_144 {dimension_numbers = #tpu.dot_dimension_numbers<[1], [0], [0], [1], [0, 0, 1, 1], [], []>} : vector<14x64xbf16>, vector<64x512xbf16>, vector<14x512xf32> -> vector<14x512xf32>
    %320 = arith.addf %316, %319 : vector<14x512xf32>
    %321 = arith.truncf %313 : vector<14x64xf32> to vector<14x64xbf16>
    %c128 = arith.constant 128 : index
    %c0_145 = arith.constant 0 : index
    %322 = vector.load %arg32[%c128, %c0_145] : memref<192x512xbf16, #tpu.memory_space<vmem>>, vector<64x512xbf16>
    %cst_146 = arith.constant dense<0.000000e+00> : vector<14x512xf32>
    %323 = tpu.matmul %321, %322, %cst_146 {dimension_numbers = #tpu.dot_dimension_numbers<[1], [0], [0], [1], [0, 0, 1, 1], [], []>} : vector<14x64xbf16>, vector<64x512xbf16>, vector<14x512xf32> -> vector<14x512xf32>
    %324 = arith.addf %320, %323 : vector<14x512xf32>
    %c0_147 = arith.constant 0 : index
    %c0_148 = arith.constant 0 : index
    %325 = vector.load %arg33[%c0_147, %c0_148] : memref<1x512xf32, #tpu.memory_space<vmem>>, vector<1x512xf32>
    %326 = vector.broadcast %325 : vector<1x512xf32> to vector<14x512xf32>
    %327 = arith.addf %324, %326 : vector<14x512xf32>
    %cst_149 = arith.constant 0.000000e+00 : f32
    %328 = vector.broadcast %cst_149 : f32 to vector<14x512xf32>
    %329 = arith.maximumf %327, %328 : vector<14x512xf32>
    %cst_150 = arith.constant 0.000000e+00 : f32
    %330 = vector.broadcast %cst_150 : f32 to vector<1x512xf32>
    %331 = vector.extract_strided_slice %329 {offsets = [0, 0], sizes = [7, 512], strides = [1, 1]} : vector<14x512xf32> to vector<7x512xf32>
    %332 = vector.extract_strided_slice %331 {offsets = [1, 0], sizes = [6, 512], strides = [1, 1]} : vector<7x512xf32> to vector<6x512xf32>
    %333 = tpu.concatenate %332, %330 in 0 : vector<6x512xf32>, vector<1x512xf32> -> vector<7x512xf32>
    %334 = vector.extract_strided_slice %329 {offsets = [7, 0], sizes = [7, 512], strides = [1, 1]} : vector<14x512xf32> to vector<7x512xf32>
    %335 = vector.extract_strided_slice %334 {offsets = [1, 0], sizes = [6, 512], strides = [1, 1]} : vector<7x512xf32> to vector<6x512xf32>
    %336 = tpu.concatenate %335, %330 in 0 : vector<6x512xf32>, vector<1x512xf32> -> vector<7x512xf32>
    %337 = tpu.concatenate %333, %336 in 0 : vector<7x512xf32>, vector<7x512xf32> -> vector<14x512xf32>
    %338 = arith.maximumf %329, %337 : vector<14x512xf32>
    %cst_151 = arith.constant 0.000000e+00 : f32
    %339 = vector.broadcast %cst_151 : f32 to vector<2x512xf32>
    %340 = vector.extract_strided_slice %329 {offsets = [0, 0], sizes = [7, 512], strides = [1, 1]} : vector<14x512xf32> to vector<7x512xf32>
    %341 = vector.extract_strided_slice %340 {offsets = [2, 0], sizes = [5, 512], strides = [1, 1]} : vector<7x512xf32> to vector<5x512xf32>
    %342 = tpu.concatenate %341, %339 in 0 : vector<5x512xf32>, vector<2x512xf32> -> vector<7x512xf32>
    %343 = vector.extract_strided_slice %329 {offsets = [7, 0], sizes = [7, 512], strides = [1, 1]} : vector<14x512xf32> to vector<7x512xf32>
    %344 = vector.extract_strided_slice %343 {offsets = [2, 0], sizes = [5, 512], strides = [1, 1]} : vector<7x512xf32> to vector<5x512xf32>
    %345 = tpu.concatenate %344, %339 in 0 : vector<5x512xf32>, vector<2x512xf32> -> vector<7x512xf32>
    %346 = tpu.concatenate %342, %345 in 0 : vector<7x512xf32>, vector<7x512xf32> -> vector<14x512xf32>
    %347 = arith.maximumf %338, %346 : vector<14x512xf32>
    %c0_152 = arith.constant 0 : index
    %c0_153 = arith.constant 0 : index
    %348 = vector.load %arg5[%c0_152, %c0_153] : memref<6x14xbf16, #tpu.memory_space<vmem>>, vector<6x14xbf16>
    %349 = arith.truncf %347 : vector<14x512xf32> to vector<14x512xbf16>
    %cst_154 = arith.constant dense<0.000000e+00> : vector<6x512xf32>
    %350 = tpu.matmul %348, %349, %cst_154 {dimension_numbers = #tpu.dot_dimension_numbers<[1], [0], [0], [1], [0, 0, 1, 1], [], []>} : vector<6x14xbf16>, vector<14x512xbf16>, vector<6x512xf32> -> vector<6x512xf32>
    %351 = arith.truncf %350 : vector<6x512xf32> to vector<6x512xbf16>
    %c0_155 = arith.constant 0 : index
    %c0_156 = arith.constant 0 : index
    %352 = vector.load %arg34[%c0_155, %c0_156] : memref<512x64xbf16, #tpu.memory_space<vmem>>, vector<512x64xbf16>
    %cst_157 = arith.constant dense<0.000000e+00> : vector<6x64xf32>
    %353 = tpu.matmul %351, %352, %cst_157 {dimension_numbers = #tpu.dot_dimension_numbers<[1], [0], [0], [1], [0, 0, 1, 1], [], []>} : vector<6x512xbf16>, vector<512x64xbf16>, vector<6x64xf32> -> vector<6x64xf32>
    %c0_158 = arith.constant 0 : index
    %c0_159 = arith.constant 0 : index
    %354 = vector.load %arg35[%c0_158, %c0_159] : memref<1x64xf32, #tpu.memory_space<vmem>>, vector<1x64xf32>
    %355 = vector.broadcast %354 : vector<1x64xf32> to vector<6x64xf32>
    %356 = arith.addf %353, %355 : vector<6x64xf32>
    %cst_160 = arith.constant 0.000000e+00 : f32
    %357 = vector.broadcast %cst_160 : f32 to vector<6x64xf32>
    %358 = arith.maximumf %356, %357 : vector<6x64xf32>
    %cst_161 = arith.constant 0.000000e+00 : f32
    %359 = vector.broadcast %cst_161 : f32 to vector<1x64xf32>
    %360 = vector.extract_strided_slice %358 {offsets = [0, 0], sizes = [3, 64], strides = [1, 1]} : vector<6x64xf32> to vector<3x64xf32>
    %361 = vector.extract_strided_slice %360 {offsets = [0, 0], sizes = [2, 64], strides = [1, 1]} : vector<3x64xf32> to vector<2x64xf32>
    %362 = tpu.concatenate %359, %361 in 0 : vector<1x64xf32>, vector<2x64xf32> -> vector<3x64xf32>
    %363 = vector.extract_strided_slice %358 {offsets = [3, 0], sizes = [3, 64], strides = [1, 1]} : vector<6x64xf32> to vector<3x64xf32>
    %364 = vector.extract_strided_slice %363 {offsets = [0, 0], sizes = [2, 64], strides = [1, 1]} : vector<3x64xf32> to vector<2x64xf32>
    %365 = tpu.concatenate %359, %364 in 0 : vector<1x64xf32>, vector<2x64xf32> -> vector<3x64xf32>
    %366 = tpu.concatenate %362, %365 in 0 : vector<3x64xf32>, vector<3x64xf32> -> vector<6x64xf32>
    %cst_162 = arith.constant 0.000000e+00 : f32
    %367 = vector.broadcast %cst_162 : f32 to vector<1x64xf32>
    %368 = vector.extract_strided_slice %358 {offsets = [0, 0], sizes = [3, 64], strides = [1, 1]} : vector<6x64xf32> to vector<3x64xf32>
    %369 = vector.extract_strided_slice %368 {offsets = [1, 0], sizes = [2, 64], strides = [1, 1]} : vector<3x64xf32> to vector<2x64xf32>
    %370 = tpu.concatenate %369, %367 in 0 : vector<2x64xf32>, vector<1x64xf32> -> vector<3x64xf32>
    %371 = vector.extract_strided_slice %358 {offsets = [3, 0], sizes = [3, 64], strides = [1, 1]} : vector<6x64xf32> to vector<3x64xf32>
    %372 = vector.extract_strided_slice %371 {offsets = [1, 0], sizes = [2, 64], strides = [1, 1]} : vector<3x64xf32> to vector<2x64xf32>
    %373 = tpu.concatenate %372, %367 in 0 : vector<2x64xf32>, vector<1x64xf32> -> vector<3x64xf32>
    %374 = tpu.concatenate %370, %373 in 0 : vector<3x64xf32>, vector<3x64xf32> -> vector<6x64xf32>
    %375 = arith.truncf %358 : vector<6x64xf32> to vector<6x64xbf16>
    %c0_163 = arith.constant 0 : index
    %c0_164 = arith.constant 0 : index
    %376 = vector.load %arg36[%c0_163, %c0_164] : memref<192x512xbf16, #tpu.memory_space<vmem>>, vector<64x512xbf16>
    %cst_165 = arith.constant dense<0.000000e+00> : vector<6x512xf32>
    %377 = tpu.matmul %375, %376, %cst_165 {dimension_numbers = #tpu.dot_dimension_numbers<[1], [0], [0], [1], [0, 0, 1, 1], [], []>} : vector<6x64xbf16>, vector<64x512xbf16>, vector<6x512xf32> -> vector<6x512xf32>
    %378 = arith.truncf %366 : vector<6x64xf32> to vector<6x64xbf16>
    %c64_166 = arith.constant 64 : index
    %c0_167 = arith.constant 0 : index
    %379 = vector.load %arg36[%c64_166, %c0_167] : memref<192x512xbf16, #tpu.memory_space<vmem>>, vector<64x512xbf16>
    %cst_168 = arith.constant dense<0.000000e+00> : vector<6x512xf32>
    %380 = tpu.matmul %378, %379, %cst_168 {dimension_numbers = #tpu.dot_dimension_numbers<[1], [0], [0], [1], [0, 0, 1, 1], [], []>} : vector<6x64xbf16>, vector<64x512xbf16>, vector<6x512xf32> -> vector<6x512xf32>
    %381 = arith.addf %377, %380 : vector<6x512xf32>
    %382 = arith.truncf %374 : vector<6x64xf32> to vector<6x64xbf16>
    %c128_169 = arith.constant 128 : index
    %c0_170 = arith.constant 0 : index
    %383 = vector.load %arg36[%c128_169, %c0_170] : memref<192x512xbf16, #tpu.memory_space<vmem>>, vector<64x512xbf16>
    %cst_171 = arith.constant dense<0.000000e+00> : vector<6x512xf32>
    %384 = tpu.matmul %382, %383, %cst_171 {dimension_numbers = #tpu.dot_dimension_numbers<[1], [0], [0], [1], [0, 0, 1, 1], [], []>} : vector<6x64xbf16>, vector<64x512xbf16>, vector<6x512xf32> -> vector<6x512xf32>
    %385 = arith.addf %381, %384 : vector<6x512xf32>
    %c0_172 = arith.constant 0 : index
    %c0_173 = arith.constant 0 : index
    %386 = vector.load %arg37[%c0_172, %c0_173] : memref<1x512xf32, #tpu.memory_space<vmem>>, vector<1x512xf32>
    %387 = vector.broadcast %386 : vector<1x512xf32> to vector<6x512xf32>
    %388 = arith.addf %385, %387 : vector<6x512xf32>
    %cst_174 = arith.constant 0.000000e+00 : f32
    %389 = vector.broadcast %cst_174 : f32 to vector<6x512xf32>
    %390 = arith.maximumf %388, %389 : vector<6x512xf32>
    %391 = arith.truncf %390 : vector<6x512xf32> to vector<6x512xbf16>
    %c0_175 = arith.constant 0 : index
    %c0_176 = arith.constant 0 : index
    %392 = vector.load %arg38[%c0_175, %c0_176] : memref<512x128xbf16, #tpu.memory_space<vmem>>, vector<512x128xbf16>
    %cst_177 = arith.constant dense<0.000000e+00> : vector<6x128xf32>
    %393 = tpu.matmul %391, %392, %cst_177 {dimension_numbers = #tpu.dot_dimension_numbers<[1], [0], [0], [1], [0, 0, 1, 1], [], []>} : vector<6x512xbf16>, vector<512x128xbf16>, vector<6x128xf32> -> vector<6x128xf32>
    %c0_178 = arith.constant 0 : index
    %c0_179 = arith.constant 0 : index
    %394 = vector.load %arg39[%c0_178, %c0_179] : memref<1x128xf32, #tpu.memory_space<vmem>>, vector<1x128xf32>
    %395 = vector.broadcast %394 : vector<1x128xf32> to vector<6x128xf32>
    %396 = arith.addf %393, %395 : vector<6x128xf32>
    %cst_180 = arith.constant 0.000000e+00 : f32
    %397 = vector.broadcast %cst_180 : f32 to vector<6x128xf32>
    %398 = arith.maximumf %396, %397 : vector<6x128xf32>
    %399 = vector.extract_strided_slice %398 {offsets = [0, 0], sizes = [3, 128], strides = [1, 1]} : vector<6x128xf32> to vector<3x128xf32>
    %cst_181 = arith.constant dense<0.000000e+00> : vector<128xf32>
    %400 = vector.multi_reduction <add>, %399, %cst_181 [0] : vector<3x128xf32> to vector<128xf32>
    %401 = vector.shape_cast %400 : vector<128xf32> to vector<1x128xf32>
    %cst_182 = arith.constant 3.000000e+00 : f32
    %402 = vector.broadcast %cst_182 : f32 to vector<1x128xf32>
    %403 = arith.divf %401, %402 : vector<1x128xf32>
    %404 = vector.extract_strided_slice %398 {offsets = [3, 0], sizes = [3, 128], strides = [1, 1]} : vector<6x128xf32> to vector<3x128xf32>
    %cst_183 = arith.constant dense<0.000000e+00> : vector<128xf32>
    %405 = vector.multi_reduction <add>, %404, %cst_183 [0] : vector<3x128xf32> to vector<128xf32>
    %406 = vector.shape_cast %405 : vector<128xf32> to vector<1x128xf32>
    %cst_184 = arith.constant 3.000000e+00 : f32
    %407 = vector.broadcast %cst_184 : f32 to vector<1x128xf32>
    %408 = arith.divf %406, %407 : vector<1x128xf32>
    %409 = tpu.concatenate %403, %408 in 0 : vector<1x128xf32>, vector<1x128xf32> -> vector<2x128xf32>
    %c0_185 = arith.constant 0 : index
    %c0_186 = arith.constant 0 : index
    %410 = vector.load %arg40[%c0_185, %c0_186] : memref<2x128xf32, #tpu.memory_space<vmem>>, vector<2x128xf32>
    tpu.vector_store %arg40[%c0_185, %c0_186], %409 {strides = array<i32>} : memref<2x128xf32, #tpu.memory_space<vmem>>, vector<2x128xf32>,
    return
  }
}

</mosaic_0001>

<bundles_post_ra>
// kernel: squeezenet_forward.1
= control target key start
LH: loop header
LB: loop body
LE: loop exit
PB: predicated region body
PF: predicated region fallthrough
CT: control target
= control target key end

     0   :  { %s8359_s6 = smov 1   ;;  %s8360_s10 = smov 2   ;;  %s9440_s0 = inlined_call_operand.smem [shape: u32[41], index: -1, kind: input, shape index: {}] }
   0x1   :  { %s8429_s5 = sld [smem:[%s9440_s0]]   ;;  %s8361_s14 = smov 3  }
   0x2   :  { %s8434_s9 = sld [smem:[%s9440_s0 + %s8359_s6]]   ;;  %s8362_s18 = smov 4  }
   0x3   :  { %s8439_s13 = sld [smem:[%s9440_s0 + %s8360_s10]]   ;;  %s8363_s22 = smov 5  }
   0x4   :  { %s8444_s17 = sld [smem:[%s9440_s0 + %s8361_s14]]   ;;  %s8364_s26 = smov 6  }
   0x5   :  { %s8449_s21 = sld [smem:[%s9440_s0 + %s8362_s18]]   ;;  %s8365_s30 = smov 7  }
   0x6   :  { %s8454_s25 = sld [smem:[%s9440_s0 + %s8363_s22]]   ;;  %s8366_s4 = smov 8  }
   0x7   :  { %9459 = sst [smem:[#allocation39_spill]] %s8429_s5  ;;  %s8367_s10 = smov 9  }
   0x8   :  { %9460 = sst [smem:[#allocation40_spill]] %s8434_s9  ;;  %s8368_s15 = smov 10  }
   0x9   :  { %9461 = sst [smem:[#allocation41_spill]] %s8439_s13  ;;  %s8369_s20 = smov 11  }
   0xa   :  { %9462 = sst [smem:[#allocation42_spill]] %s8444_s17  ;;  %s8371_s1 = smov 13  }
   0xb   :  { %9463 = sst [smem:[#allocation43_spill]] %s8449_s21  ;;  %s8372_s7 = smov 14  }
   0xc   :  { %9464 = sst [smem:[#allocation44_spill]] %s8454_s25  ;;  %s8374_s22 = smov 16  }
   0xd   :  { %s8459_s29 = sld [smem:[%s9440_s0 + %s8364_s26]]   ;;  %s8370_s26 = smov 12  }
   0xe   :  { %s8464_s3 = sld [smem:[%s9440_s0 + %s8365_s30]]   ;;  %s8375_s28 = smov 17  }
   0xf   :  { %s8469_s8 = sld [smem:[%s9440_s0 + %s8366_s4]]  }
  0x10   :  { %s8474_s14 = sld [smem:[%s9440_s0 + %s8367_s10]]  }
  0x11   :  { %s8479_s19 = sld [smem:[%s9440_s0 + %s8368_s15]]   ;;  %s8373_s15 = smov 15  }
  0x12   :  { %s8484_s24 = sld [smem:[%s9440_s0 + %s8369_s20]]  }
  0x13   :  { %9465 = sst [smem:[#allocation45_spill]] %s8459_s29 }
  0x14   :  { %s8489_s30 = sld [smem:[%s9440_s0 + %s8370_s26]]  }
  0x15   :  { %s8494_s6 = sld [smem:[%s9440_s0 + %s8371_s1]]  }
  0x16   :  { %s8499_s12 = sld [smem:[%s9440_s0 + %s8372_s7]]   ;;  %s8376_s7 = smov 18  }
  0x17   :  { %9466 = sst [smem:[#allocation46_spill]] %s8479_s19 }
  0x18   :  { %s8504_s20 = sld [smem:[%s9440_s0 + %s8373_s15]]   ;;  %s8377_s15 = smov 19  }
  0x19   :  { %s8509_s27 = sld [smem:[%s9440_s0 + %s8374_s22]]   ;;  %s8378_s22 = smov 20  }
  0x1a   :  { %s8514_s4 = sld [smem:[%s9440_s0 + %s8375_s28]]   ;;  %s8379_s28 = smov 21  }
  0x1b   :  { %s8519_s25 = sld [smem:[%s9440_s0 + %s8376_s7]]   ;;  %s8380_s7 = smov 22  }
  0x1c   :  { %9467 = sst [smem:[#allocation47_spill]] %s8499_s12 }
  0x1d   :  { %s8524_s21 = sld [smem:[%s9440_s0 + %s8377_s15]]   ;;  %s8381_s15 = smov 23  }
  0x1e   :  { %s8534_s12 = sld [smem:[%s9440_s0 + %s8379_s28]]   ;;  %s8383_s28 = smov 25  }
  0x1f   :  { %9468 = sst [smem:[#allocation48_spill]] %s8509_s27 }
  0x20   :  { %s8529_s27 = sld [smem:[%s9440_s0 + %s8378_s22]]   ;;  %s8382_s22 = smov 24  }
  0x21   :  { %9469 = sst [smem:[#allocation49_spill]] %s8519_s25 }
  0x22   :  { %s8539_s25 = sld [smem:[%s9440_s0 + %s8380_s7]]   ;;  %s8384_s7 = smov 26  }
  0x23   :  { %s8544_s19 = sld [smem:[%s9440_s0 + %s8381_s15]]   ;;  %s8385_s15 = smov 27  }
  0x24   :  { %s8554_s13 = sld [smem:[%s9440_s0 + %s8383_s28]]   ;;  %s8387_s28 = smov 29  }
  0x25   :  { %s8564_s29 = sld [smem:[%s9440_s0 + %s8385_s15]]   ;;  %s8389_s15 = smov 31  }
  0x26   :  { %9470 = sst [smem:[#allocation50_spill]] %s8529_s27 }
  0x27   :  { %s8549_s27 = sld [smem:[%s9440_s0 + %s8382_s22]]   ;;  %s8386_s22 = smov 28  }
  0x28   :  { %9471 = sst [smem:[#allocation51_spill]] %s8539_s25 }
  0x29   :  { %s8559_s25 = sld [smem:[%s9440_s0 + %s8384_s7]]   ;;  %s8388_s7 = smov 30  }
  0x2a   :  { %s8574_s17 = sld [smem:[%s9440_s0 + %s8387_s28]]   ;;  %s8391_s28 = smov 33  }
  0x2b   :  { %s8584_s5 = sld [smem:[%s9440_s0 + %s8389_s15]]   ;;  %s8393_s15 = smov 35  }
  0x2c   :  { %s8594_s9 = sld [smem:[%s9440_s0 + %s8391_s28]]   ;;  %s8395_s28 = smov 37  }
  0x2d   :  { %9472 = sst [smem:[#allocation52_spill]] %s8549_s27 }
  0x2e   :  { %s8569_s27 = sld [smem:[%s9440_s0 + %s8386_s22]]   ;;  %s8390_s22 = smov 32  }
  0x2f   :  { %9473 = sst [smem:[#allocation53_spill]] %s8559_s25 }
  0x30   :  { %s8579_s25 = sld [smem:[%s9440_s0 + %s8388_s7]]   ;;  %s8392_s7 = smov 34  }
  0x31   :  { %9476 = sst [smem:[#allocation56_spill]] %s8584_s5 }
  0x32   :  { %9478 = sst [smem:[#allocation58_spill]] %s8594_s9 }
  0x33   :  { %s8604_s5 = sld [smem:[%s9440_s0 + %s8393_s15]]   ;;  %s8397_s15 = smov 39  }
  0x34   :  { %9474 = sst [smem:[#allocation54_spill]] %s8569_s27 }
  0x35   :  { %s8589_s27 = sld [smem:[%s9440_s0 + %s8390_s22]]   ;;  %s8394_s22 = smov 36  }
  0x36   :  { %9475 = sst [smem:[#allocation55_spill]] %s8579_s25 }
  0x37   :  { %s8599_s25 = sld [smem:[%s9440_s0 + %s8392_s7]]   ;;  %s8396_s7 = smov 38  }
  0x38   :  { %s8614_s9 = sld [smem:[%s9440_s0 + %s8395_s28]]  }
  0x39   :  { %9480 = sst [smem:[#allocation60_spill]] %s8604_s5 }
  0x3a   :  { %s8624_s5 = sld [smem:[%s9440_s0 + %s8397_s15]]  }
  0x3b   :  { %9477 = sst [smem:[#allocation57_spill]] %s8589_s27 }
  0x3c   :  { %s8609_s27 = sld [smem:[%s9440_s0 + %s8394_s22]]   ;;  %s8398_s22 = smov 40  }
  0x3d   :  { %9479 = sst [smem:[#allocation59_spill]] %s8599_s25 }
  0x3e   :  { %s8619_s25 = sld [smem:[%s9440_s0 + %s8396_s7]]  }
  0x42   :  { %9481 = sst [smem:[#allocation61_spill]] %s8609_s27 }
  0x43   :  { %s8629_s27 = sld [smem:[%s9440_s0 + %s8398_s22]]  }
  0x44   :  { %86 = vsyncpa [#allocation3], 0 }
  0x45   :  { %87 = vsyncpa [#allocation6], 0 }
  0x46   :  { %88 = vsyncpa [#allocation9], 0 }
  0x47   :  { %89 = vsyncpa [#allocation12], 0 }
  0x48   :  { %90 = vsyncpa [#allocation15], 0 }
  0x49   :  { %91 = vsyncpa [#allocation18], 0 }
  0x4a   :  { %92 = vsyncpa [#allocation21], 0 }
  0x4b   :  { %93 = vsyncpa [#allocation24], 0 }
  0x4c   :  { %94 = vsyncpa [#allocation27], 0 }
  0x4d   :  { %95 = vsyncpa [#allocation4], 0  ;;  %s8399_s28 = smov [#allocation5]   ;;  %s7965_s2 = scalar_lea.hbm %s8469_s8, 384 }
  0x4e   :  { %s125_s1 = sshll.u32 %s8399_s28, 4  ;;  %p7966_p0 = scmp.ne.s32.totalorder %s8469_s8, %s7965_s2  ;;  %s126_s1 = int_to_ptr.vmem [resolvable:$true] %s125_s1 }
  0x4f   :  { %p7969_p1 = scmp.lt.u32.totalorder %s7965_s2, %s8469_s8 }
  0x51   :  { %p7971_p2 = pnand %p7969_p1, %p7966_p0 }
  0x53   :  { %7974 = shalt.err (!%p7971_p2)
}
  0x54   :  { %s7975_s0 = scalar_lea.vmem %s126_s1, 384  ;;  %p7980_p4 = scmp.lt.s32.totalorder %s126_s1, %s126_s1 }
  0x55   :  { %p7976_p3 = scmp.ne.s32.totalorder %s126_s1, %s7975_s0  ;;  %p7981_p5 = scmp.lt.s32.totalorder %s7975_s0, %s7975_s0 }
  0x57   :  { %p7982_p6 = por %p7981_p5, %p7980_p4 }
  0x59   :  { %p7983_p7 = pnand %p7982_p6, %p7976_p3 }
  0x5b   :  { %7986 = shalt.err (!%p7983_p7)
}
  0x5c   :  { %s8400_s7 = smov 64   ;;  %s8401_s10 = smov 4  }
  0x5d   :  { %131 = dma.hbm_to_vmem [thread:$0]  %s8469_s8, 384, %s126_s1, [#allocation6], %s8400_s7, %s8400_s7, %s8401_s10  }
  0x5e   :  { %s8402_s11 = smov [#allocation8]   ;;  %s8403_s16 = smov [#allocation11]  }
  0x5f   :  { %s150_s15 = sshll.u32 %s8402_s11, 4  ;;  %s172_s18 = sshll.u32 %s8403_s16, 4  ;;  %s151_s15 = int_to_ptr.vmem [resolvable:$true] %s150_s15  ;;  %s173_s18 = int_to_ptr.vmem [resolvable:$true] %s172_s18 }
  0x60   :  { %s7987_s22 = scalar_lea.hbm %s8484_s24, 16 }
  0x61   :  { %p7988_p8 = scmp.ne.s32.totalorder %s8484_s24, %s7987_s22  ;;  %p7991_p9 = scmp.lt.u32.totalorder %s7987_s22, %s8484_s24 }
  0x63   :  { %p7993_p10 = pnand %p7991_p9, %p7988_p8 }
  0x65   :  { %7996 = shalt.err (!%p7993_p10)
}
  0x66   :  { %s7997_s23 = scalar_lea.vmem %s151_s15, 16  ;;  %s8001_s26 = scalar_lea.vmem %s151_s15, 32 }
  0x67   :  { %p7998_p11 = scmp.ne.s32.totalorder %s151_s15, %s7997_s23  ;;  %p8002_p12 = scmp.lt.s32.totalorder %s151_s15, %s151_s15 }
  0x68   :  { %p8003_p13 = scmp.lt.s32.totalorder %s8001_s26, %s7997_s23 }
  0x6a   :  { %p8004_p0 = por %p8003_p13, %p8002_p12 }
  0x6c   :  { %p8005_p1 = pnand %p8004_p0, %p7998_p11 }
  0x6e   :  { %8008 = shalt.err (!%p8005_p1)
}
  0x6f   :  { %153 = dma.hbm_to_vmem [thread:$0]  %s8484_s24, 16, %s151_s15, [#allocation9]  }
  0x70   :  { %s8009_s8 = scalar_lea.hbm %s8494_s6, 16 }
  0x71   :  { %p8010_p2 = scmp.ne.s32.totalorder %s8494_s6, %s8009_s8  ;;  %p8013_p3 = scmp.lt.u32.totalorder %s8009_s8, %s8494_s6 }
  0x73   :  { %p8015_p4 = pnand %p8013_p3, %p8010_p2 }
  0x75   :  { %8018 = shalt.err (!%p8015_p4)
}
  0x76   :  { %s8019_s28 = scalar_lea.vmem %s173_s18, 16  ;;  %s8023_s1 = scalar_lea.vmem %s173_s18, 32 }
  0x77   :  { %p8020_p5 = scmp.ne.s32.totalorder %s173_s18, %s8019_s28  ;;  %p8024_p6 = scmp.lt.s32.totalorder %s173_s18, %s173_s18 }
  0x78   :  { %p8025_p7 = scmp.lt.s32.totalorder %s8023_s1, %s8019_s28 }
  0x7a   :  { %p8026_p8 = por %p8025_p7, %p8024_p6 }
  0x7c   :  { %p8027_p9 = pnand %p8026_p8, %p8020_p5 }
  0x7e   :  { %8030 = shalt.err (!%p8027_p9)
}
  0x7f   :  { %175 = dma.hbm_to_vmem [thread:$0]  %s8494_s6, 16, %s173_s18, [#allocation12]  }
  0x80   :  { %s8404_s24 = smov [#allocation14]   ;;  %s8405_s0 = smov [#allocation17]  }
  0x81   :  { %s196_s2 = sshll.u32 %s8404_s24, 4  ;;  %s220_s11 = sshll.u32 %s8405_s0, 4  ;;  %s197_s2 = int_to_ptr.vmem [resolvable:$true] %s196_s2  ;;  %s221_s11 = int_to_ptr.vmem [resolvable:$true] %s220_s11 }
  0x82   :  { %s8031_s15 = scalar_lea.hbm %s8514_s4, 32 }
  0x83   :  { %p8032_p10 = scmp.ne.s32.totalorder %s8514_s4, %s8031_s15  ;;  %p8035_p11 = scmp.lt.u32.totalorder %s8031_s15, %s8514_s4 }
  0x85   :  { %p8037_p12 = pnand %p8035_p11, %p8032_p10 }
  0x87   :  { %8040 = shalt.err (!%p8037_p12)
}
  0x88   :  { %s8041_s16 = scalar_lea.vmem %s197_s2, 32  ;;  %p8046_p0 = scmp.lt.s32.totalorder %s197_s2, %s197_s2 }
  0x89   :  { %p8042_p13 = scmp.ne.s32.totalorder %s197_s2, %s8041_s16  ;;  %p8047_p1 = scmp.lt.s32.totalorder %s8041_s16, %s8041_s16 }
  0x8b   :  { %p8048_p2 = por %p8047_p1, %p8046_p0 }
  0x8d   :  { %p8049_p3 = pnand %p8048_p2, %p8042_p13 }
  0x8f   :  { %8052 = shalt.err (!%p8049_p3)
}
  0x90   :  { %199 = dma.hbm_to_vmem [thread:$0]  %s8514_s4, 32, %s197_s2, [#allocation15]  }
  0x91   :  { %s8053_s6 = scalar_lea.hbm %s8534_s12, 32 }
  0x92   :  { %p8054_p4 = scmp.ne.s32.totalorder %s8534_s12, %s8053_s6  ;;  %p8057_p5 = scmp.lt.u32.totalorder %s8053_s6, %s8534_s12 }
  0x94   :  { %p8059_p6 = pnand %p8057_p5, %p8054_p4 }
  0x96   :  { %8062 = shalt.err (!%p8059_p6)
}
  0x97   :  { %s8063_s18 = scalar_lea.vmem %s221_s11, 32  ;;  %p8068_p8 = scmp.lt.s32.totalorder %s221_s11, %s221_s11 }
  0x98   :  { %p8064_p7 = scmp.ne.s32.totalorder %s221_s11, %s8063_s18  ;;  %p8069_p9 = scmp.lt.s32.totalorder %s8063_s18, %s8063_s18 }
  0x9a   :  { %p8070_p10 = por %p8069_p9, %p8068_p8 }
  0x9c   :  { %p8071_p11 = pnand %p8070_p10, %p8064_p7 }
  0x9e   :  { %8074 = shalt.err (!%p8071_p11)
}
  0x9f   :  { %223 = dma.hbm_to_vmem [thread:$0]  %s8534_s12, 32, %s221_s11, [#allocation18]  }
  0xa0   :  { %s8406_s22 = smov [#allocation20]   ;;  %s8407_s23 = smov [#allocation23]  }
  0xa1   :  { %s244_s4 = sshll.u32 %s8406_s22, 4  ;;  %s268_s26 = sshll.u32 %s8407_s23, 4  ;;  %s245_s4 = int_to_ptr.vmem [resolvable:$true] %s244_s4  ;;  %s269_s26 = int_to_ptr.vmem [resolvable:$true] %s268_s26 }
  0xa2   :  { %s8075_s8 = scalar_lea.hbm %s8554_s13, 48 }
  0xa3   :  { %p8076_p12 = scmp.ne.s32.totalorder %s8554_s13, %s8075_s8  ;;  %p8079_p13 = scmp.lt.u32.totalorder %s8075_s8, %s8554_s13 }
  0xa5   :  { %p8081_p0 = pnand %p8079_p13, %p8076_p12 }
  0xa7   :  { %8084 = shalt.err (!%p8081_p0)
}
  0xa8   :  { %s8085_s28 = scalar_lea.vmem %s245_s4, 48  ;;  %s8089_s1 = scalar_lea.vmem %s245_s4, 64 }
  0xa9   :  { %p8086_p1 = scmp.ne.s32.totalorder %s245_s4, %s8085_s28  ;;  %p8090_p2 = scmp.lt.s32.totalorder %s245_s4, %s245_s4 }
  0xaa   :  { %p8091_p3 = scmp.lt.s32.totalorder %s8089_s1, %s8085_s28 }
  0xac   :  { %p8092_p4 = por %p8091_p3, %p8090_p2 }
  0xae   :  { %p8093_p5 = pnand %p8092_p4, %p8086_p1 }
  0xb0   :  { %8096 = shalt.err (!%p8093_p5)
}
  0xb1   :  { %247 = dma.hbm_to_vmem [thread:$0]  %s8554_s13, 48, %s245_s4, [#allocation21]  }
  0xb2   :  { %s8097_s12 = scalar_lea.hbm %s8574_s17, 48 }
  0xb3   :  { %p8098_p6 = scmp.ne.s32.totalorder %s8574_s17, %s8097_s12  ;;  %p8101_p7 = scmp.lt.u32.totalorder %s8097_s12, %s8574_s17 }
  0xb5   :  { %p8103_p8 = pnand %p8101_p7, %p8098_p6 }
  0xb7   :  { %8106 = shalt.err (!%p8103_p8)
}
  0xb8   :  { %s8107_s24 = scalar_lea.vmem %s269_s26, 48  ;;  %s8111_s2 = scalar_lea.vmem %s269_s26, 64 }
  0xb9   :  { %p8108_p9 = scmp.ne.s32.totalorder %s269_s26, %s8107_s24  ;;  %p8112_p10 = scmp.lt.s32.totalorder %s269_s26, %s269_s26 }
  0xba   :  { %p8113_p11 = scmp.lt.s32.totalorder %s8111_s2, %s8107_s24 }
  0xbc   :  { %p8114_p12 = por %p8113_p11, %p8112_p10 }
  0xbe   :  { %p8115_p13 = pnand %p8114_p12, %p8108_p9 }
  0xc0   :  { %8118 = shalt.err (!%p8115_p13)
}
  0xc1   :  { %271 = dma.hbm_to_vmem [thread:$0]  %s8574_s17, 48, %s269_s26, [#allocation24]  }
  0xc2   :  { %s8408_s13 = smov [#allocation2]   ;;  %s8409_s11 = smov [#allocation7]  }
  0xc3   :  { %s116_s0 = sshll.u32 %s8408_s13, 4  ;;  %s138_s15 = sshll.u32 %s8409_s11, 4  ;;  %s117_s0 = int_to_ptr.vmem [resolvable:$true] %s116_s0  ;;  %s139_s15 = int_to_ptr.vmem [resolvable:$true] %s138_s15 }
  0xc4   :  { %s8119_s16 = scalar_lea.hbm %s8464_s3, 16 }
  0xc5   :  { %p8120_p0 = scmp.ne.s32.totalorder %s8464_s3, %s8119_s16  ;;  %p8123_p1 = scmp.lt.u32.totalorder %s8119_s16, %s8464_s3 }
  0xc7   :  { %p8125_p2 = pnand %p8123_p1, %p8120_p0 }
  0xc9   :  { %8128 = shalt.err (!%p8125_p2)
}
  0xca   :  { %s8129_s6 = scalar_lea.vmem %s117_s0, 16  ;;  %s8133_s18 = scalar_lea.vmem %s117_s0, 32 }
  0xcb   :  { %p8130_p3 = scmp.ne.s32.totalorder %s117_s0, %s8129_s6  ;;  %p8134_p4 = scmp.lt.s32.totalorder %s117_s0, %s117_s0 }
  0xcc   :  { %p8135_p5 = scmp.lt.s32.totalorder %s8133_s18, %s8129_s6 }
  0xce   :  { %p8136_p6 = por %p8135_p5, %p8134_p4 }
  0xd0   :  { %p8137_p7 = pnand %p8136_p6, %p8130_p3 }
  0xd2   :  { %8140 = shalt.err (!%p8137_p7)
}
  0xd3   :  { %119 = dma.hbm_to_vmem [thread:$0]  %s8464_s3, 16, %s117_s0, [#allocation3]  }
  0xd4   :  { %s8141_s17 = scalar_lea.hbm %s8474_s14, 16 }
  0xd5   :  { %p8142_p8 = scmp.ne.s32.totalorder %s8474_s14, %s8141_s17  ;;  %p8145_p9 = scmp.lt.u32.totalorder %s8141_s17, %s8474_s14 }
  0xd7   :  { %p8147_p10 = pnand %p8145_p9, %p8142_p8 }
  0xd9   :  { %8150 = shalt.err (!%p8147_p10)
}
  0xda   :  { %s8151_s22 = scalar_lea.vmem %s139_s15, 16  ;;  %s8155_s4 = scalar_lea.vmem %s139_s15, 32 }
  0xdb   :  { %p8152_p11 = scmp.ne.s32.totalorder %s139_s15, %s8151_s22  ;;  %p8156_p12 = scmp.lt.s32.totalorder %s139_s15, %s139_s15 }
  0xdc   :  { %p8157_p13 = scmp.lt.s32.totalorder %s8155_s4, %s8151_s22 }
  0xde   :  { %p8158_p0 = por %p8157_p13, %p8156_p12 }
  0xe0   :  { %p8159_p1 = pnand %p8158_p0, %p8152_p11 }
  0xe2   :  { %8162 = shalt.err (!%p8159_p1)
}
  0xe3   :  { %141 = dma.hbm_to_vmem [thread:$0]  %s8474_s14, 16, %s139_s15, [#allocation6]  }
  0xe4   :  { %s8410_s3 = smov [#allocation10]   ;;  %s8411_s26 = smov [#allocation13]  }
  0xe5   :  { %s159_s23 = sshll.u32 %s8410_s3, 4  ;;  %s184_s8 = sshll.u32 %s8411_s26, 4  ;;  %s160_s23 = int_to_ptr.vmem [resolvable:$true] %s159_s23  ;;  %s185_s8 = int_to_ptr.vmem [resolvable:$true] %s184_s8 }
  0xe6   :  { %s8163_s28 = scalar_lea.hbm %s8489_s30, 384 }
  0xe7   :  { %p8164_p2 = scmp.ne.s32.totalorder %s8489_s30, %s8163_s28  ;;  %p8167_p3 = scmp.lt.u32.totalorder %s8163_s28, %s8489_s30 }
  0xe9   :  { %p8169_p4 = pnand %p8167_p3, %p8164_p2 }
  0xeb   :  { %8172 = shalt.err (!%p8169_p4)
}
  0xec   :  { %s8173_s1 = scalar_lea.vmem %s160_s23, 384  ;;  %p8178_p6 = scmp.lt.s32.totalorder %s160_s23, %s160_s23 }
  0xed   :  { %p8174_p5 = scmp.ne.s32.totalorder %s160_s23, %s8173_s1  ;;  %p8179_p7 = scmp.lt.s32.totalorder %s8173_s1, %s8173_s1 }
  0xef   :  { %p8180_p8 = por %p8179_p7, %p8178_p6 }
  0xf1   :  { %p8181_p9 = pnand %p8180_p8, %p8174_p5 }
  0xf3   :  { %8184 = shalt.err (!%p8181_p9)
}
  0xf4   :  { %165 = dma.hbm_to_vmem [thread:$0]  %s8489_s30, 384, %s160_s23, [#allocation9], %s8400_s7, %s8400_s7, %s8401_s10  }
  0xf5   :  { %s8185_s14 = scalar_lea.hbm %s8504_s20, 16 }
  0xf6   :  { %p8186_p10 = scmp.ne.s32.totalorder %s8504_s20, %s8185_s14  ;;  %p8189_p11 = scmp.lt.u32.totalorder %s8185_s14, %s8504_s20 }
  0xf8   :  { %p8191_p12 = pnand %p8189_p11, %p8186_p10 }
  0xfa   :  { %8194 = shalt.err (!%p8191_p12)
}
  0xfb   :  { %s8195_s12 = scalar_lea.vmem %s185_s8, 16  ;;  %s8199_s24 = scalar_lea.vmem %s185_s8, 32 }
  0xfc   :  { %p8196_p13 = scmp.ne.s32.totalorder %s185_s8, %s8195_s12  ;;  %p8200_p0 = scmp.lt.s32.totalorder %s185_s8, %s185_s8 }
  0xfd   :  { %p8201_p1 = scmp.lt.s32.totalorder %s8199_s24, %s8195_s12 }
  0xff   :  { %p8202_p2 = por %p8201_p1, %p8200_p0 }
 0x101   :  { %p8203_p3 = pnand %p8202_p2, %p8196_p13 }
 0x103   :  { %8206 = shalt.err (!%p8203_p3)
}
 0x104   :  { %187 = dma.hbm_to_vmem [thread:$0]  %s8504_s20, 16, %s185_s8, [#allocation12]  }
 0x105   :  { %s8412_s30 = smov [#allocation16]   ;;  %s8413_s10 = smov [#allocation19]  }
 0x106   :  { %s208_s7 = sshll.u32 %s8412_s30, 4  ;;  %s232_s2 = sshll.u32 %s8413_s10, 4  ;;  %s209_s7 = int_to_ptr.vmem [resolvable:$true] %s208_s7  ;;  %s233_s2 = int_to_ptr.vmem [resolvable:$true] %s232_s2 }
 0x107   :  { %s8207_s13 = scalar_lea.hbm %s8524_s21, 16 }
 0x108   :  { %p8208_p4 = scmp.ne.s32.totalorder %s8524_s21, %s8207_s13  ;;  %p8211_p5 = scmp.lt.u32.totalorder %s8207_s13, %s8524_s21 }
 0x10a   :  { %p8213_p6 = pnand %p8211_p5, %p8208_p4 }
 0x10c   :  { %8216 = shalt.err (!%p8213_p6)
}
 0x10d   :  { %s8217_s0 = scalar_lea.vmem %s209_s7, 16  ;;  %s8221_s11 = scalar_lea.vmem %s209_s7, 32 }
 0x10e   :  { %p8218_p7 = scmp.ne.s32.totalorder %s209_s7, %s8217_s0  ;;  %p8222_p8 = scmp.lt.s32.totalorder %s209_s7, %s209_s7 }
 0x10f   :  { %p8223_p9 = scmp.lt.s32.totalorder %s8221_s11, %s8217_s0 }
 0x111   :  { %p8224_p10 = por %p8223_p9, %p8222_p8 }
 0x113   :  { %p8225_p11 = pnand %p8224_p10, %p8218_p7 }
 0x115   :  { %8228 = shalt.err (!%p8225_p11)
}
 0x116   :  { %211 = dma.hbm_to_vmem [thread:$0]  %s8524_s21, 16, %s209_s7, [#allocation15]  }
 0x117   :  { %s8229_s20 = scalar_lea.hbm %s8544_s19, 16 }
 0x118   :  { %p8230_p12 = scmp.ne.s32.totalorder %s8544_s19, %s8229_s20  ;;  %p8233_p13 = scmp.lt.u32.totalorder %s8229_s20, %s8544_s19 }
 0x11a   :  { %p8235_p0 = pnand %p8233_p13, %p8230_p12 }
 0x11c   :  { %8238 = shalt.err (!%p8235_p0)
}
 0x11d   :  { %s8239_s15 = scalar_lea.vmem %s233_s2, 16  ;;  %s8243_s16 = scalar_lea.vmem %s233_s2, 32 }
 0x11e   :  { %p8240_p1 = scmp.ne.s32.totalorder %s233_s2, %s8239_s15  ;;  %p8244_p2 = scmp.lt.s32.totalorder %s233_s2, %s233_s2 }
 0x11f   :  { %p8245_p3 = scmp.lt.s32.totalorder %s8243_s16, %s8239_s15 }
 0x121   :  { %p8246_p4 = por %p8245_p3, %p8244_p2 }
 0x123   :  { %p8247_p5 = pnand %p8246_p4, %p8240_p1 }
 0x125   :  { %8250 = shalt.err (!%p8247_p5)
}
 0x126   :  { %235 = dma.hbm_to_vmem [thread:$0]  %s8544_s19, 16, %s233_s2, [#allocation18]  }
 0x127   :  { %s8414_s21 = smov [#allocation22]   ;;  %s8415_s18 = smov [#allocation25]  }
 0x128   :  { %s256_s6 = sshll.u32 %s8414_s21, 4  ;;  %s284_s17 = sshll.u32 %s8415_s18, 4  ;;  %s257_s6 = int_to_ptr.vmem [resolvable:$true] %s256_s6  ;;  %s285_s17 = int_to_ptr.vmem [resolvable:$true] %s284_s17 }
 0x129   :  { %s8251_s22 = scalar_lea.hbm %s8564_s29, 16 }
 0x12a   :  { %p8252_p6 = scmp.ne.s32.totalorder %s8564_s29, %s8251_s22  ;;  %p8255_p7 = scmp.lt.u32.totalorder %s8251_s22, %s8564_s29 }
 0x12c   :  { %p8257_p8 = pnand %p8255_p7, %p8252_p6 }
 0x12e   :  { %8260 = shalt.err (!%p8257_p8)
}
 0x12f   :  { %s8261_s4 = scalar_lea.vmem %s257_s6, 16  ;;  %s8265_s3 = scalar_lea.vmem %s257_s6, 32 }
 0x130   :  { %p8262_p9 = scmp.ne.s32.totalorder %s257_s6, %s8261_s4  ;;  %p8266_p10 = scmp.lt.s32.totalorder %s257_s6, %s257_s6 }
 0x131   :  { %p8267_p11 = scmp.lt.s32.totalorder %s8265_s3, %s8261_s4 }
 0x133   :  { %p8268_p12 = por %p8267_p11, %p8266_p10 }
 0x135   :  { %p8269_p13 = pnand %p8268_p12, %p8262_p9 }
 0x137   :  { %8272 = shalt.err (!%p8269_p13)
}
 0x138   :  { %s9482_s19 = sld [smem:[#allocation58_spill]] }
 0x139   :  { %259 = dma.hbm_to_vmem [thread:$0]  %s8564_s29, 16, %s257_s6, [#allocation21]  }
 0x13e   :  { %s8273_s23 = scalar_lea.hbm %s9482_s19, 64 }
 0x13f   :  { %p8274_p0 = scmp.ne.s32.totalorder %s9482_s19, %s8273_s23  ;;  %p8277_p1 = scmp.lt.u32.totalorder %s8273_s23, %s9482_s19 }
 0x141   :  { %p8279_p2 = pnand %p8277_p1, %p8274_p0 }
 0x143   :  { %8282 = shalt.err (!%p8279_p2)
}
 0x144   :  { %s8283_s26 = scalar_lea.vmem %s285_s17, 64  ;;  %p8288_p4 = scmp.lt.s32.totalorder %s285_s17, %s285_s17 }
 0x145   :  { %p8284_p3 = scmp.ne.s32.totalorder %s285_s17, %s8283_s26  ;;  %p8289_p5 = scmp.lt.s32.totalorder %s8283_s26, %s8283_s26 }
 0x147   :  { %p8290_p6 = por %p8289_p5, %p8288_p4 }
 0x149   :  { %p8291_p7 = pnand %p8290_p6, %p8284_p3 }
 0x14b   :  { %8294 = shalt.err (!%p8291_p7)
}
 0x14c   :  { %287 = dma.hbm_to_vmem [thread:$0]  %s9482_s19, 64, %s285_s17, [#allocation24]  }
 0x14d   :  { %s8416_s8 = smov [#allocation26]   ;;  %s8295_s28 = scalar_lea.hbm %s8624_s5, 16 }
 0x14e   :  { %s304_s29 = sshll.u32 %s8416_s8, 4  ;;  %p8296_p8 = scmp.ne.s32.totalorder %s8624_s5, %s8295_s28  ;;  %s305_s29 = int_to_ptr.vmem [resolvable:$true] %s304_s29 }
 0x14f   :  { %p8299_p9 = scmp.lt.u32.totalorder %s8295_s28, %s8624_s5 }
 0x151   :  { %p8301_p10 = pnand %p8299_p9, %p8296_p8 }
 0x153   :  { %8304 = shalt.err (!%p8301_p10)
}
 0x154   :  { %s8305_s1 = scalar_lea.vmem %s305_s29, 16  ;;  %s8309_s14 = scalar_lea.vmem %s305_s29, 32 }
 0x155   :  { %p8306_p11 = scmp.ne.s32.totalorder %s305_s29, %s8305_s1  ;;  %p8310_p12 = scmp.lt.s32.totalorder %s305_s29, %s305_s29 }
 0x156   :  { %p8311_p13 = scmp.lt.s32.totalorder %s8309_s14, %s8305_s1 }
 0x158   :  { %p8312_p0 = por %p8311_p13, %p8310_p12 }
 0x15a   :  { %p8313_p1 = pnand %p8312_p0, %p8306_p11 }
 0x15c   :  { %8316 = shalt.err (!%p8313_p1)
}
 0x15d   :  { %307 = dma.hbm_to_vmem [thread:$0]  %s8624_s5, 16, %s305_s29, [#allocation27]  }
 0x15e   :  { %8339 = dma.done.wait [#allocation3], 16  }
 0x15f   :  { %8340 = vsyncadd [#allocation3], 4294967280 }
 0x160   :  { %8341 = dma.done.wait [#allocation6], 400  }
 0x161   :  { %8342 = vsyncadd [#allocation6], 4294966896 }
 0x162   :  { %8343 = dma.done.wait [#allocation9], 400  }
 0x163   :  { %8344 = vsyncadd [#allocation9], 4294966896 }
 0x164   :  { %8345 = dma.done.wait [#allocation12], 32  }
 0x165   :  { %8346 = vsyncadd [#allocation12], 4294967264 }
 0x166   :  { %8347 = dma.done.wait [#allocation15], 48  }
 0x167   :  { %8348 = vsyncadd [#allocation15], 4294967248 }
 0x168   :  { %8349 = dma.done.wait [#allocation18], 48  }
 0x169   :  { %8350 = vsyncadd [#allocation18], 4294967248 }
 0x16a   :  { %8351 = dma.done.wait [#allocation21], 64  }
 0x16b   :  { %8352 = vsyncadd [#allocation21], 4294967232 }
 0x16c   :  { %8353 = dma.done.wait [#allocation24], 112  }
 0x16d   :  { %8354 = vsyncadd [#allocation24], 4294967184 }
 0x16e   :  { %8355 = dma.done.wait [#allocation27], 16  }
 0x16f   :  { %8356 = vsyncadd [#allocation27], 4294967280  ;;  %s9483_s12 = sld [smem:[#allocation40_spill]]  ;;  %s9484_s5 = sld [smem:[#allocation39_spill]]  ;;  %vm408_vm0 = vcmask 261120   ;;  %vm617_vm1 = vcmask 474112  }
 0x170   :  { %s9485_s24 = sld [smem:[#allocation42_spill]]  ;;  %s9486_s30 = sld [smem:[#allocation45_spill]]  ;;  %vm510_vm2 = vcmask 1043456   ;;  %vm563_vm3 = vcmask 1042432   ;;  %vm516_vm4 = vcmask 1041408   ;;  %vm498_vm5 = vcmask 1046528  }
 0x171   :  { %s9487_s7 = sld [smem:[#allocation41_spill]]  ;;  %vm551_vm6 = vcmask 1045504   ;;  %vm565_vm7 = vcmask 1040384   ;;  %vm529_vm8 = vcmask 1044480   ;;  %s9488_s10 = sld [smem:[#allocation46_spill]]  ;;  %vm861_vm9 = vcmask 130048  }
 0x172   :  { %s9489_s2 = sld [smem:[#allocation47_spill]]  ;;  %s9490_s13 = sld [smem:[#allocation48_spill]]  ;;  %vm2016_vm10 = vcmask 228352   ;;  %vm8419_vm11 = vmmov 0   ;;  %vm2784_vm12 = vcmask 392192   ;;  %vm4399_vm13 = vcmask 523264  }
 0x173   :  { %s9491_s0 = sld [smem:[#allocation49_spill]]  ;;  %s9492_s11 = sld [smem:[#allocation43_spill]]  ;;  %vm4991_vm14 = vcmask 113664  }
 0x174   :  { %s9493_s20 = sld [smem:[#allocation50_spill]]  ;;  %s9494_s15 = sld [smem:[#allocation51_spill]] }
 0x175   :  { %v7530_v0 = vld [vmem:[%s9483_s12] sm:$0xff]   ;;  %v7531_v1 = vld [vmem:[%s9483_s12 + $0x8] sm:$0xff]   ;;  %v7534_v4 = vld [vmem:[%s9484_s5 + $0x10] sm:$0xff]   ;;  %s9495_s16 = sld [smem:[#allocation52_spill]]  ;;  %s9496_s21 = sld [smem:[#allocation53_spill]] }
 0x176   :  { %7175 = vmatprep.subr.bf16.mxu0 %v7530_v0  ;;  %v7532_v2 = vld [vmem:[%s9484_s5] sm:$0xff]   ;;  %v7533_v3 = vld [vmem:[%s9484_s5 + $0x8] sm:$0xff]   ;;  %v7535_v5 = vld [vmem:[%s9484_s5 + $0x18] sm:$0x1f]   ;;  %s9497_s6 = sld [smem:[#allocation54_spill]]  ;;  %s9498_s18 = sld [smem:[#allocation55_spill]] }
 0x177   :  { %7176 = vmatpush3.bf16.msra.mxu0 %v7530_v0  ;;  %7179 = vmatprep.mubr.msk.bf16.mxu0 %vm408_vm0, %v7532_v2  ;;  %v7536_v6 = vld [vmem:[%s9485_s24] sm:$0xff]   ;;  %v7539_v8 = vld [vmem:[%s9486_s30 + $0x8] sm:$0xff]   ;;  %v7540_v9 = vld [vmem:[%s9486_s30 + $0x10] sm:$0xff]   ;;  %s9499_s17 = sld [smem:[#allocation57_spill]]  ;;  %s9500_s22 = sld [smem:[#allocation56_spill]] }
 0x178   :  { %7177 = vmatprep.subr.bf16.mxu0 %v7531_v1  ;;  %7195 = vmatprep.mubr.msk.bf16.mxu1 %vm617_vm1, %v7536_v6  ;;  %v7538_v7 = vld [vmem:[%s9486_s30] sm:$0xff]   ;;  %v7541_v10 = vld [vmem:[%s9486_s30 + $0x18] sm:$0xff]   ;;  %v7543_v12 = vld [vmem:[%s9486_s30 + $0x28] sm:$0xff]   ;;  %s9501_s4 = sld [smem:[#allocation59_spill]]  ;;  %s9502_s3 = sld [smem:[#allocation44_spill]] }
 0x179   :  { %v7542_v11 = vld [vmem:[%s9486_s30 + $0x20] sm:$0xff]   ;;  %v7544_v13 = vld [vmem:[%s9486_s30 + $0x30] sm:$0xff]   ;;  %s9503_s19 = sld [smem:[#allocation61_spill]]  ;;  %s9504_s23 = sld [smem:[#allocation60_spill]] }
 0x17a   :  { %v6471_v14 = vld [vmem:[%s9487_s7] ss:$0 sm:$0xff] }
 0x17b   :  { %7178 = vmatpush3.bf16.msra.mxu0 %v7531_v1 }
 0x17c   :  { %7199 = vmatprep.subr.bf16.mxu0 %v7538_v7 }
 0x17e   :  { %7180 = vmatmul.mubr.msk.bf16.vlgmr.msra.gmra.mrb[0].mxu0 %vm408_vm0, %v7533_v3 }
 0x17f   :  { %7183 = vmatprep.mubr.msk.bf16.mxu0 %vm408_vm0, %v7534_v4  ;;  %7200 = vmatpush3.bf16.msra.mxu0 %v7538_v7 }
 0x180   :  { %7201 = vmatprep.subr.bf16.mxu0 %v7539_v8 }
 0x183   :  { %7202 = vmatpush3.bf16.msra.mxu0 %v7539_v8 }
 0x184   :  { %7203 = vmatprep.subr.bf16.mxu0 %v7540_v9 }
 0x186   :  { %7184 = vmatmul.mubr.msk.bf16.gmra.mrb[4].mxu0 %vm408_vm0, %v7535_v5 }
 0x187   :  { %7204 = vmatpush3.bf16.msra.mxu0 %v7540_v9 }
 0x188   :  { %7205 = vmatprep.subr.bf16.mxu0 %v7541_v10 }
 0x18b   :  { %7206 = vmatpush3.bf16.msra.mxu0 %v7541_v10 }
 0x18c   :  { %7207 = vmatprep.subr.bf16.mxu0 %v7542_v11 }
 0x18f   :  { %7208 = vmatpush3.bf16.msra.mxu0 %v7542_v11 }
 0x190   :  { %7209 = vmatprep.subr.bf16.mxu0 %v7543_v12 }
 0x193   :  { %7210 = vmatpush3.bf16.msra.mxu0 %v7543_v12 }
 0x194   :  { %7211 = vmatprep.subr.bf16.mxu0 %v7544_v13 }
 0x197   :  { %7212 = vmatpush3.bf16.msra.mxu0 %v7544_v13 }
 0x251   :  { %v7181_v15 = vpop.f32.mrb[0].mxu0 }
 0x252   :  { %v464_v16 = vadd.f32 %v7181_v15, %v6471_v14  ;;  %v455_v17 = vpop.f32.mrb[1].mxu0 }
 0x253   :  { %v456_v18 = vadd.f32 %v6471_v14, %v455_v17  ;;  %v7182_v19 = vpop.f32.mrb[2].mxu0 }
 0x254   :  { %v488_v20 = vmax.f32 %v464_v16, 0.0  ;;  %v467_v21 = vadd.f32 %v7182_v19, %v6471_v14  ;;  %v458_v22 = vpop.f32.mrb[3].mxu0 }
 0x255   :  { %v486_v23 = vmax.f32 %v456_v18, 0.0  ;;  %v459_v24 = vadd.f32 %v6471_v14, %v458_v22 }
 0x256   :  { %v8721_v25 = vmax.f32 %v467_v21, 0.0  ;;  %v502_v26 = vrot.slane %v488_v20, 1  ;;  %v555_v27 = vrot.slane %v488_v20, 2 }
 0x257   :  { %v487_v28 = vmax.f32 %v459_v24, 0.0  ;;  %v499_v29 = vrot.slane %v486_v23, 1  ;;  %v552_v30 = vrot.slane %v486_v23, 2 }
 0x258   :  { %v504_v31 = vrot.slane %v8721_v25, 1  ;;  %v557_v32 = vrot.slane %v8721_v25, 2  ;;  %v517_v33 = vrot.slane %v8721_v25, 6  ;;  %v566_v34 = vrot.slane %v8721_v25, 7 }
 0x259   :  { %v500_v35 = vrot.slane %v487_v28, 1  ;;  %v553_v36 = vrot.slane %v487_v28, 2  ;;  %v7185_v37 = vpop.f32.mrb[4].mxu0 }
 0x25a   :  { %v480_v38 = vadd.f32 %v7185_v37, %v6471_v14  ;;  %v471_v39 = vpop.f32.mrb[5].mxu0  ;;  %v505_v40 = vsel %vm498_vm5, %v502_v26, %v504_v31  ;;  %v511_v41 = vsel %vm510_vm2, %v504_v31, 0.0  ;;  %v558_v42 = vsel %vm551_vm6, %v555_v27, %v557_v32 }
 0x25b   :  { %v472_v43 = vadd.f32 %v6471_v14, %v471_v39  ;;  %v7186_v44 = vpop.f32.mrb[6].mxu0  ;;  %v501_v45 = vsel %vm498_vm5, %v499_v29, %v500_v35  ;;  %v503_v46 = vsel %vm498_vm5, %v500_v35, %v502_v26  ;;  %v554_v47 = vsel %vm551_vm6, %v552_v30, %v553_v36 }
 0x25c   :  { %v8733_v48 = vmax.f32 %v480_v38, 0.0  ;;  %v483_v49 = vadd.f32 %v7186_v44, %v6471_v14  ;;  %v474_v50 = vpop.f32.mrb[7].mxu0  ;;  %v543_v51 = vmax.f32 %v486_v23, %v501_v45  ;;  %v544_v52 = vmax.f32 %v487_v28, %v503_v46 }
 0x25d   :  { %v490_v53 = vmax.f32 %v472_v43, 0.0  ;;  %v475_v54 = vadd.f32 %v6471_v14, %v474_v50  ;;  %v556_v55 = vsel %vm551_vm6, %v553_v36, %v555_v27  ;;  %v545_v56 = vmax.f32 %v488_v20, %v505_v40  ;;  %v7545_v50 = vld [vmem:[%s9486_s30 + $0x38] sm:$0xff]  }
 0x25e   :  { %v522_v57 = vrot.slane %v8733_v48, 6  ;;  %v571_v58 = vrot.slane %v8733_v48, 7  ;;  %v493_v59 = vmax.f32 %v483_v49, 0.0  ;;  %v591_v60 = vmax.f32 %v543_v51, %v554_v47  ;;  %v7537_v49 = vld [vmem:[%s9485_s24 + $0x8] sm:$0x3f]   ;;  %7213 = vmatprep.subr.bf16.mxu0 %v7545_v50 }
 0x25f   :  { %v518_v61 = vrot.slane %v490_v53, 6  ;;  %v567_v62 = vrot.slane %v490_v53, 7  ;;  %v491_v63 = vmax.f32 %v475_v54, 0.0  ;;  %v592_v0 = vmax.f32 %v544_v52, %v556_v55  ;;  %7214 = vmatpush3.bf16.msra.mxu0 %v7545_v50  ;;  %v6504_v50 = vld [vmem:[#allocation7] ss:$0 sm:$0xff] }
 0x260   :  { %v524_v1 = vrot.slane %v493_v59, 6  ;;  %v573_v2 = vrot.slane %v493_v59, 7  ;;  %v564_v3 = vsel %vm563_vm3, %v557_v32, 0.0  ;;  %v593_v4 = vmax.f32 %v545_v56, %v558_v42  ;;  %v7546_v56 = vld [vmem:[#allocation5 + $0x8] sm:$0xff]  }
 0x261   :  { %v519_v5 = vsel %vm516_vm4, %v517_v33, %v518_v61  ;;  %v568_v6 = vsel %vm565_vm7, %v566_v34, %v567_v62  ;;  %v520_v7 = vrot.slane %v491_v63, 6  ;;  %v569_v8 = vrot.slane %v491_v63, 7 }
 0x262   :  { %v530_v9 = vrot.slane %v519_v5, 3  ;;  %v578_v10 = vrot.slane %v568_v6, 3  ;;  %v525_v11 = vsel %vm516_vm4, %v522_v57, %v524_v1  ;;  %v574_v12 = vsel %vm565_vm7, %v571_v58, %v573_v2 }
 0x263   :  { %v527_v13 = vsel %vm510_vm2, %v525_v11, 0.0  ;;  %v576_v14 = vsel %vm563_vm3, %v574_v12, 0.0  ;;  %v521_v15 = vsel %vm516_vm4, %v518_v61, %v520_v7  ;;  %v523_v16 = vsel %vm516_vm4, %v520_v7, %v522_v57  ;;  %v8764_v57 = vld [vmem:[#allocation5] sm:$0xff]   ;;  %v7552_v61 = vld [vmem:[%s9488_s10 + $0x18] sm:$0xff]  }
 0x264   :  { %v535_v17 = vrot.slane %v527_v13, 3  ;;  %v583_v18 = vrot.slane %v576_v14, 3  ;;  %v531_v19 = vrot.slane %v521_v15, 3  ;;  %v533_v20 = vrot.slane %v523_v16, 3 }
 0x265   :  { %v570_v21 = vsel %vm565_vm7, %v567_v62, %v569_v8  ;;  %v572_v22 = vsel %vm565_vm7, %v569_v8, %v571_v58  ;;  %v603_v23 = vpack.c.bf16 %v592_v0, %v591_v60  ;;  %v542_v24 = vsel %vm529_vm8, %v511_v41, %v530_v9  ;;  %v7549_v58 = vld [vmem:[%s9488_s10] sm:$0xff]   ;;  %v7551_v60 = vld [vmem:[%s9488_s10 + $0x10] sm:$0xff]  }
 0x266   :  { %v550_v26 = vmax.f32 %v493_v59, %v535_v17  ;;  %v534_v27 = vsel %vm529_vm8, %v531_v19, %v533_v20  ;;  %v579_v28 = vrot.slane %v570_v21, 3  ;;  %v581_v29 = vrot.slane %v572_v22, 3  ;;  %v7550_v59 = vld [vmem:[%s9488_s10 + $0x8] sm:$0xff]   ;;  %7237 = vmatprep.subr.bf16.mxu0 %v7549_v58  ;;  %v7553_v62 = vld [vmem:[%s9488_s10 + $0x20] sm:$0xff]  }
 0x267   :  { %v548_v30 = vmax.f32 %v491_v63, %v534_v27  ;;  %7187 = vmatprep.subr.bf16.mxu1 %v603_v23  ;;  %v546_v31 = vmax.f32 %v8721_v25, %v542_v24  ;;  %v590_v32 = vsel %vm529_vm8, %v564_v3, %v578_v10  ;;  %v532_v33 = vsel %vm529_vm8, %v530_v9, %v531_v19  ;;  %v7554_v63 = vld [vmem:[%s9488_s10 + $0x28] sm:$0xff]   ;;  %v6486_v0 = vld [vmem:[#allocation2] ss:$0 sm:$0xff] }
 0x268   :  { %v598_v34 = vmax.f32 %v550_v26, %v583_v18  ;;  %7188 = vmatpush3.bf16.msra.mxu1 %v603_v23  ;;  %v547_v35 = vmax.f32 %v490_v53, %v532_v33  ;;  %v580_v36 = vsel %vm529_vm8, %v578_v10, %v579_v28  ;;  %v582_v37 = vsel %vm529_vm8, %v579_v28, %v581_v29 }
 0x269   :  { %v594_v38 = vmax.f32 %v546_v31, %v590_v32  ;;  %v596_v39 = vmax.f32 %v548_v30, %v582_v37  ;;  %v536_v40 = vsel %vm529_vm8, %v533_v20, %v535_v17  ;;  %v584_v41 = vsel %vm529_vm8, %v581_v29, %v583_v18 }
 0x26a   :  { %v595_v25 = vmax.f32 %v547_v35, %v580_v36  ;;  %v549_v42 = vmax.f32 %v8733_v48, %v536_v40 }
 0x26b   :  { %v604_v43 = vpack.c.bf16 %v594_v38, %v593_v4 }
 0x26c   :  { %v605_v44 = vpack.c.bf16 %v596_v39, %v595_v25  ;;  %v597_v45 = vmax.f32 %v549_v42, %v584_v41 }
 0x26d   :  { %7189 = vmatprep.subr.bf16.mxu1 %v604_v43 }
 0x26e   :  { %7190 = vmatpush3.bf16.msra.mxu1 %v604_v43  ;;  %v606_v46 = vpack.c.bf16 %v598_v34, %v597_v45  ;;  %v7548_v45 = vld [vmem:[#allocation5 + $0x10] sm:$0xff]  }
 0x26f   :  { %7191 = vmatprep.subr.bf16.mxu1 %v605_v44 }
 0x270   :  { %v625_v47 = vsel %vm529_vm8, %v606_v46, 0 }
 0x272   :  { %7192 = vmatpush3.bf16.msra.mxu1 %v605_v44 }
 0x273   :  { %7467 = vmatprep.subr.msk.bf16.mxu1 %vm529_vm8, %v606_v46 }
 0x276   :  { %7194 = vmatpush3.bf16.msra.mxu1 %v625_v47  ;;  %v7555_v47 = vld [vmem:[%s9488_s10 + $0x30] sm:$0xff]  }
 0x277   :  { %7219 = vmatprep.subr.bf16.mxu1 %v7546_v56 }
 0x279   :  { %7196 = vmatmul.mubr.msk.bf16.vlgmr.msra.gmra.mrb[0].mxu1 %vm617_vm1, %v7537_v49  ;;  %v7556_v49 = vld [vmem:[%s9488_s10 + $0x38] sm:$0xff]  }
 0x27a   :  { %7220 = vmatpush3.bf16.msra.mxu1 %v7546_v56 }
 0x27b   :  { %7225 = vmatprep.subr.bf16.mxu1 %v8764_v57 }
 0x34c   :  { %v7197_v48 = vpop.f32.mrb[0].mxu1 }
 0x34d   :  { %v661_v51 = vpop.f32.mrb[1].mxu1 }
 0x34e   :  { %v7198_v52 = vpop.f32.mrb[2].mxu1 }
 0x34f   :  { %v677_v53 = vpack.c.bf16 %v7198_v52, %v7197_v48  ;;  %v664_v54 = vpop.f32.mrb[3].mxu1 }
 0x350   :  { %v676_v55 = vpack.c.bf16 %v664_v54, %v661_v51 }
 0x352   :  { %7215 = vmatprep.mubr.bf16.mxu0 %v676_v55 }
 0x353   :  { %7216 = vmatmul.mubr.bf16.vlgmr.msra.gmra.mrb[8].mxu0 %v677_v53 }
 0x354   :  { %7238 = vmatpush3.bf16.msra.mxu0 %v7549_v58 }
 0x355   :  { %7239 = vmatprep.subr.bf16.mxu0 %v7550_v59 }
 0x358   :  { %7240 = vmatpush3.bf16.msra.mxu0 %v7550_v59 }
 0x359   :  { %7241 = vmatprep.subr.bf16.mxu0 %v7551_v60 }
 0x35c   :  { %7242 = vmatpush3.bf16.msra.mxu0 %v7551_v60 }
 0x35d   :  { %7243 = vmatprep.subr.bf16.mxu0 %v7552_v61 }
 0x360   :  { %7244 = vmatpush3.bf16.msra.mxu0 %v7552_v61 }
 0x361   :  { %7245 = vmatprep.subr.bf16.mxu0 %v7553_v62 }
 0x364   :  { %7246 = vmatpush3.bf16.msra.mxu0 %v7553_v62 }
 0x365   :  { %7247 = vmatprep.subr.bf16.mxu0 %v7554_v63 }
 0x368   :  { %7248 = vmatpush3.bf16.msra.mxu0 %v7554_v63 }
 0x369   :  { %7249 = vmatprep.subr.bf16.mxu0 %v7555_v47 }
 0x36c   :  { %7250 = vmatpush3.bf16.msra.mxu0 %v7555_v47  ;;  %v7559_v47 = vld [vmem:[#allocation10 + $0x10] sm:$0xff]  }
 0x36d   :  { %7251 = vmatprep.subr.bf16.mxu0 %v7556_v49 }
 0x370   :  { %7252 = vmatpush3.bf16.msra.mxu0 %v7556_v49 }
 0x426   :  { %v7217_v1 = vpop.f32.mrb[8].mxu0 }
 0x427   :  { %v792_v2 = vadd.f32 %v7217_v1, %v6486_v0  ;;  %v783_v3 = vpop.f32.mrb[9].mxu0  ;;  %v7558_v1 = vld [vmem:[#allocation10] sm:$0xff]  }
 0x428   :  { %v784_v4 = vadd.f32 %v6486_v0, %v783_v3  ;;  %v7218_v5 = vpop.f32.mrb[10].mxu0 }
 0x429   :  { %v800_v6 = vmax.f32 %v792_v2, 0.0  ;;  %v795_v7 = vadd.f32 %v7218_v5, %v6486_v0  ;;  %v786_v8 = vpop.f32.mrb[11].mxu0  ;;  %v6505_v2 = vld [vmem:[#allocation8] ss:$0 sm:$0xff] }
 0x42a   :  { %v798_v9 = vmax.f32 %v784_v4, 0.0  ;;  %v787_v10 = vadd.f32 %v6486_v0, %v786_v8  ;;  %v7557_v0 = vld [vmem:[#allocation10 + $0x8] sm:$0xff]  }
 0x42b   :  { %v801_v11 = vmax.f32 %v795_v7, 0.0  ;;  %v813_v12 = vrot.slane %v800_v6, 5  ;;  %v833_v14 = vrot.slane %v800_v6, 7 }
 0x42c   :  { %v799_v13 = vmax.f32 %v787_v10, 0.0  ;;  %v804_v18 = vrot.slane %v798_v9, 7  ;;  %v827_v22 = vrot.slane %v798_v9, 1 }
 0x42d   :  { %v815_v15 = vrot.slane %v801_v11, 5  ;;  %v835_v16 = vrot.slane %v801_v11, 7  ;;  %v848_v17 = vpack.c.bf16 %v801_v11, %v800_v6 }
 0x42e   :  { %v805_v19 = vrot.slane %v799_v13, 7  ;;  %v812_v20 = vrot.slane %v799_v13, 5  ;;  %v828_v21 = vrot.slane %v799_v13, 1  ;;  %v847_v26 = vpack.c.bf16 %v799_v13, %v798_v9 }
 0x42f   :  { %v816_v23 = vsel %vm563_vm3, %v813_v12, %v815_v15  ;;  %v836_v24 = vsel %vm565_vm7, %v833_v14, %v835_v16  ;;  %v809_v37 = vsel %vm565_vm7, 0.0, %v804_v18 }
 0x430   :  { %v838_v27 = vsel %vm529_vm8, %v836_v24, 0.0  ;;  %v814_v28 = vsel %vm563_vm3, %v812_v20, %v813_v12  ;;  %v806_v29 = vsel %vm565_vm7, %v804_v18, %v805_v19  ;;  %v829_v32 = vsel %vm498_vm5, %v827_v22, %v828_v21 }
 0x431   :  { %v841_v30 = vrot.slane %v838_v27, 2  ;;  %v818_v31 = vsel %vm565_vm7, 0.0, %v814_v28  ;;  %v821_v33 = vrot.slane %v816_v23, 2  ;;  %v834_v35 = vsel %vm565_vm7, %v805_v19, %v833_v14 }
 0x432   :  { %v820_v34 = vrot.slane %v818_v31, 2  ;;  %v840_v36 = vrot.slane %v834_v35, 2  ;;  %v832_v40 = vsel %vm529_vm8, %v828_v21, 0.0 }
 0x434   :  { %v826_v38 = vsel %vm551_vm6, %v806_v29, %v820_v34  ;;  %v822_v39 = vsel %vm551_vm6, %v820_v34, %v821_v33  ;;  %v846_v42 = vsel %vm551_vm6, %v832_v40, %v840_v36  ;;  %v842_v43 = vsel %vm551_vm6, %v840_v36, %v841_v30 }
 0x435   :  { %v851_v41 = vpack.c.bf16 %v826_v38, %v809_v37  ;;  %v852_v25 = vpack.c.bf16 %v821_v33, %v822_v39  ;;  %v978_v44 = vpack.c.bf16 %v846_v42, %v829_v32  ;;  %v979_v46 = vpack.c.bf16 %v841_v30, %v842_v43 }
 0x437   :  { %7221 = vmatprep.mubr.msk.bf16.mxu1 %vm861_vm9, %v851_v41 }
 0x438   :  { %7222 = vmatmul.mubr.msk.bf16.vlgmr.msra.gmra.mrb[4].mxu1 %vm861_vm9, %v852_v25 }
 0x439   :  { %7227 = vmatprep.mubr.msk.bf16.mxu1 %vm861_vm9, %v847_v26  ;;  %7226 = vmatpush3.bf16.msra.mxu1 %v8764_v57 }
 0x43a   :  { %7231 = vmatprep.subr.bf16.mxu1 %v7548_v45 }
 0x444   :  { %7228 = vmatmul.mubr.msk.bf16.vlgmr.msra.gmra.mrb[4].mxu1 %vm861_vm9, %v848_v17 }
 0x445   :  { %7233 = vmatprep.mubr.msk.bf16.mxu1 %vm861_vm9, %v978_v44  ;;  %7232 = vmatpush3.bf16.msra.mxu1 %v7548_v45 }
 0x446   :  { %7257 = vmatprep.subr.bf16.mxu1 %v7557_v0 }
 0x450   :  { %7234 = vmatmul.mubr.msk.bf16.vlgmr.msra.gmra.mrb[4].mxu1 %vm861_vm9, %v979_v46 }
 0x451   :  { %7258 = vmatpush3.bf16.msra.mxu1 %v7557_v0 }
 0x452   :  { %7263 = vmatprep.subr.bf16.mxu1 %v7558_v1 }
 0x523   :  { %v7235_v48 = vpop.f32.mrb[4].mxu1 }
 0x524   :  { %v1056_v51 = vadd.f32 %v7235_v48, %v6504_v50  ;;  %v1028_v52 = vpop.f32.mrb[5].mxu1  ;;  %v7561_v48 = vld [vmem:[%s9489_s2 + $0x8] sm:$0xff]  }
 0x525   :  { %v1054_v53 = vadd.f32 %v6504_v50, %v1028_v52  ;;  %v7236_v54 = vpop.f32.mrb[6].mxu1  ;;  %v7563_v52 = vld [vmem:[%s9489_s2 + $0x18] sm:$0xff]  }
 0x526   :  { %v1057_v55 = vadd.f32 %v7236_v54, %v6504_v50  ;;  %v1031_v56 = vpop.f32.mrb[7].mxu1  ;;  %v1060_v58 = vmax.f32 %v1056_v51, 0.0  ;;  %v7562_v51 = vld [vmem:[%s9489_s2 + $0x10] sm:$0xff]   ;;  %v7565_v54 = vld [vmem:[%s9489_s2 + $0x28] sm:$0xff]  }
 0x527   :  { %v1055_v57 = vadd.f32 %v6504_v50, %v1031_v56  ;;  %v1058_v60 = vmax.f32 %v1054_v53, 0.0  ;;  %v7560_v50 = vld [vmem:[%s9489_s2] sm:$0xff]   ;;  %v7567_v56 = vld [vmem:[%s9489_s2 + $0x38] sm:$0xff]  }
 0x528   :  { %v1061_v59 = vmax.f32 %v1057_v55, 0.0  ;;  %v7564_v53 = vld [vmem:[%s9489_s2 + $0x20] sm:$0xff]   ;;  %v7566_v55 = vld [vmem:[%s9489_s2 + $0x30] sm:$0xff]  }
 0x529   :  { %v1059_v61 = vmax.f32 %v1055_v57, 0.0  ;;  %v6523_v57 = vld [vmem:[#allocation11] ss:$0 sm:$0xff] }
 0x52a   :  { %v1063_v62 = vpack.c.bf16 %v1061_v59, %v1060_v58 }
 0x52b   :  { %v1062_v63 = vpack.c.bf16 %v1059_v61, %v1058_v60 }
 0x52d   :  { %7253 = vmatprep.mubr.bf16.mxu0 %v1062_v63 }
 0x52e   :  { %7254 = vmatmul.mubr.bf16.vlgmr.msra.gmra.mrb[12].mxu0 %v1063_v62 }
 0x601   :  { %v7255_v3 = vpop.f32.mrb[12].mxu0 }
 0x602   :  { %v1178_v4 = vadd.f32 %v7255_v3, %v6505_v2  ;;  %v1169_v5 = vpop.f32.mrb[13].mxu0 }
 0x603   :  { %v1170_v6 = vadd.f32 %v6505_v2, %v1169_v5  ;;  %v7256_v7 = vpop.f32.mrb[14].mxu0 }
 0x604   :  { %v1186_v8 = vmax.f32 %v1178_v4, 0.0  ;;  %v1181_v9 = vadd.f32 %v7256_v7, %v6505_v2  ;;  %v1172_v10 = vpop.f32.mrb[15].mxu0 }
 0x605   :  { %v1184_v11 = vmax.f32 %v1170_v6, 0.0  ;;  %v1173_v12 = vadd.f32 %v6505_v2, %v1172_v10  ;;  %v7571_v10 = vld [vmem:[%s9490_s13 + $0x30] ss:$8 sps:$4 sm:$0xff]  }
 0x606   :  { %v1187_v13 = vmax.f32 %v1181_v9, 0.0  ;;  %v1199_v14 = vrot.slane %v1186_v8, 5  ;;  %v1219_v16 = vrot.slane %v1186_v8, 7  ;;  %v7568_v9 = vld [vmem:[%s9490_s13 + $0x20] ss:$8 sps:$4 sm:$0xff]  }
 0x607   :  { %v1185_v15 = vmax.f32 %v1173_v12, 0.0  ;;  %v1190_v20 = vrot.slane %v1184_v11, 7  ;;  %v1213_v24 = vrot.slane %v1184_v11, 1  ;;  %v8417_v12 = vmov 0  }
 0x608   :  { %v1201_v17 = vrot.slane %v1187_v13, 5  ;;  %v1221_v18 = vrot.slane %v1187_v13, 7  ;;  %v1234_v19 = vpack.c.bf16 %v1187_v13, %v1186_v8  ;;  %v7570_v8 = vld [vmem:[%s9490_s13 + $0x24] ss:$8 sps:$4 sm:$0xff]   ;;  %1688 = vmatprep.mubr.bf16.mxu0 %v8417_v12 }
 0x609   :  { %v1191_v21 = vrot.slane %v1185_v15, 7  ;;  %v1198_v22 = vrot.slane %v1185_v15, 5  ;;  %v1214_v23 = vrot.slane %v1185_v15, 1  ;;  %v1233_v28 = vpack.c.bf16 %v1185_v15, %v1184_v11  ;;  %1656 = vmatprep.subr.bf16.mxu0 %v7570_v8  ;;  %v7573_v11 = vld [vmem:[%s9490_s13 + $0x34] ss:$8 sps:$4 sm:$0xff]  }
 0x60a   :  { %v1202_v26 = vsel %vm563_vm3, %v1199_v14, %v1201_v17  ;;  %v1222_v27 = vsel %vm565_vm7, %v1219_v16, %v1221_v18  ;;  %v1195_v39 = vsel %vm565_vm7, 0.0, %v1190_v20  ;;  %1657 = vmatpush1.bf16.msra.mxu0 %v7568_v9  ;;  %v7576_v13 = vld [vmem:[%s9490_s13 + $0x4] ss:$8 sps:$4 sm:$0xff]  }
 0x60b   :  { %v1224_v29 = vsel %vm529_vm8, %v1222_v27, 0.0  ;;  %v1200_v30 = vsel %vm563_vm3, %v1198_v22, %v1199_v14  ;;  %v1192_v31 = vsel %vm565_vm7, %v1190_v20, %v1191_v21  ;;  %v1215_v34 = vsel %vm498_vm5, %v1213_v24, %v1214_v23  ;;  %1658 = vmatprep.subr.bf16.mxu0 %v7573_v11  ;;  %v6524_v14 = vld [vmem:[#allocation13] ss:$0 sm:$0xff] }
 0x60c   :  { %v1227_v32 = vrot.slane %v1224_v29, 2  ;;  %v1204_v33 = vsel %vm565_vm7, 0.0, %v1200_v30  ;;  %v1207_v35 = vrot.slane %v1202_v26, 2  ;;  %v1220_v37 = vsel %vm565_vm7, %v1191_v21, %v1219_v16 }
 0x60d   :  { %v1206_v36 = vrot.slane %v1204_v33, 2  ;;  %v1226_v38 = vrot.slane %v1220_v37, 2  ;;  %v1218_v25 = vsel %vm529_vm8, %v1214_v23, 0.0 }
 0x60e   :  { %1659 = vmatpush1.bf16.msra.mxu0 %v7571_v10 }
 0x60f   :  { %v1212_v40 = vsel %vm551_vm6, %v1192_v31, %v1206_v36  ;;  %v1208_v41 = vsel %vm551_vm6, %v1206_v36, %v1207_v35  ;;  %v1232_v44 = vsel %vm551_vm6, %v1218_v25, %v1226_v38  ;;  %v1228_v45 = vsel %vm551_vm6, %v1226_v38, %v1227_v32  ;;  %1735 = vmatprep.subr.bf16.mxu0 %v7576_v13 }
 0x610   :  { %v1237_v42 = vpack.c.bf16 %v1212_v40, %v1195_v39  ;;  %v1238_v43 = vpack.c.bf16 %v1207_v35, %v1208_v41  ;;  %v1363_v46 = vpack.c.bf16 %v1232_v44, %v1215_v34  ;;  %v1364_v49 = vpack.c.bf16 %v1227_v32, %v1228_v45 }
 0x612   :  { %7259 = vmatprep.mubr.msk.bf16.mxu1 %vm861_vm9, %v1237_v42 }
 0x613   :  { %7260 = vmatmul.mubr.msk.bf16.vlgmr.msra.gmra.mrb[8].mxu1 %vm861_vm9, %v1238_v43 }
 0x614   :  { %7265 = vmatprep.mubr.msk.bf16.mxu1 %vm861_vm9, %v1233_v28  ;;  %7264 = vmatpush3.bf16.msra.mxu1 %v7558_v1 }
 0x615   :  { %7269 = vmatprep.subr.bf16.mxu1 %v7559_v47 }
 0x61f   :  { %7266 = vmatmul.mubr.msk.bf16.vlgmr.msra.gmra.mrb[8].mxu1 %vm861_vm9, %v1234_v19 }
 0x620   :  { %7271 = vmatprep.mubr.msk.bf16.mxu1 %vm861_vm9, %v1363_v46  ;;  %7270 = vmatpush3.bf16.msra.mxu1 %v7559_v47 }
 0x621   :  { %7275 = vmatprep.subr.bf16.mxu1 %v7560_v50 }
 0x62b   :  { %7272 = vmatmul.mubr.msk.bf16.vlgmr.msra.gmra.mrb[8].mxu1 %vm861_vm9, %v1364_v49 }
 0x62c   :  { %7276 = vmatpush3.bf16.msra.mxu1 %v7560_v50 }
 0x62d   :  { %7277 = vmatprep.subr.bf16.mxu1 %v7561_v48 }
 0x630   :  { %7278 = vmatpush3.bf16.msra.mxu1 %v7561_v48 }
 0x631   :  { %7279 = vmatprep.subr.bf16.mxu1 %v7562_v51 }
 0x634   :  { %7280 = vmatpush3.bf16.msra.mxu1 %v7562_v51 }
 0x635   :  { %7281 = vmatprep.subr.bf16.mxu1 %v7563_v52 }
 0x638   :  { %7282 = vmatpush3.bf16.msra.mxu1 %v7563_v52 }
 0x639   :  { %7283 = vmatprep.subr.bf16.mxu1 %v7564_v53 }
 0x63c   :  { %7284 = vmatpush3.bf16.msra.mxu1 %v7564_v53 }
 0x63d   :  { %7285 = vmatprep.subr.bf16.mxu1 %v7565_v54 }
 0x640   :  { %7286 = vmatpush3.bf16.msra.mxu1 %v7565_v54  ;;  %v7574_v54 = vld [vmem:[%s9490_s13] ss:$8 sps:$4 sm:$0xff]  }
 0x641   :  { %7287 = vmatprep.subr.bf16.mxu1 %v7566_v55 }
 0x644   :  { %7288 = vmatpush3.bf16.msra.mxu1 %v7566_v55 }
 0x645   :  { %7289 = vmatprep.subr.bf16.mxu1 %v7567_v56 }
 0x648   :  { %7290 = vmatpush3.bf16.msra.mxu1 %v7567_v56 }
 0x6fe   :  { %v7273_v58 = vpop.f32.mrb[8].mxu1 }
 0x6ff   :  { %v1441_v59 = vadd.f32 %v7273_v58, %v6523_v57  ;;  %v1413_v60 = vpop.f32.mrb[9].mxu1 }
 0x700   :  { %v1439_v61 = vadd.f32 %v6523_v57, %v1413_v60  ;;  %v7274_v62 = vpop.f32.mrb[10].mxu1  ;;  %v7579_v60 = vld [vmem:[%s9490_s13 + $0x14] ss:$8 sps:$4 sm:$0xff]  }
 0x701   :  { %v1442_v63 = vadd.f32 %v7274_v62, %v6523_v57  ;;  %v1416_v0 = vpop.f32.mrb[11].mxu1  ;;  %v1445_v2 = vmax.f32 %v1441_v59, 0.0  ;;  %v7577_v62 = vld [vmem:[%s9490_s13 + $0x10] ss:$8 sps:$4 sm:$0xff]  }
 0x702   :  { %v1440_v1 = vadd.f32 %v6523_v57, %v1416_v0  ;;  %v1443_v4 = vmax.f32 %v1439_v61, 0.0  ;;  %v7580_v0 = vld [vmem:[%s9490_s13 + $0x40] ss:$8 sps:$4 sm:$0xff]  }
 0x703   :  { %v1446_v3 = vmax.f32 %v1442_v63, 0.0  ;;  %v7582_v63 = vld [vmem:[%s9490_s13 + $0x44] ss:$8 sps:$4 sm:$0xff]  }
 0x704   :  { %v1444_v5 = vmax.f32 %v1440_v1, 0.0  ;;  %v7585_v1 = vld [vmem:[%s9490_s13 + $0x54] ss:$8 sps:$4 sm:$0xff]  }
 0x705   :  { %v1448_v6 = vpack.c.bf16 %v1446_v3, %v1445_v2  ;;  %v7583_v2 = vld [vmem:[%s9490_s13 + $0x50] ss:$8 sps:$4 sm:$0xff]   ;;  %v1883_v3 = vlaneseq }
 0x706   :  { %v1447_v7 = vpack.c.bf16 %v1444_v5, %v1443_v4 }
 0x707   :  { %v8864_v4 = vshrl.u32 %v1883_v3, 7 }
 0x708   :  { %7291 = vmatprep.mubr.bf16.mxu1 %v1447_v7 }
 0x709   :  { %7292 = vmatmul.mubr.bf16.vlgmr.msra.gmra.mrb[12].mxu1 %v1448_v6  ;;  %v8867_v5 = vsub.s32 0, %v8864_v4  ;;  %v1881_v6 = vld [vmem:[#allocation14] sm:$0x3]  ;;  %v8870_v7 = vsub.s32 1, %v8864_v4 }
 0x70a   :  { %2058 = vmatprep.mubr.bf16.mxu1 %v8417_v12 }
 0x70b   :  { %v1886_v8 = vrot.slane %v1881_v6, %v8867_v5  ;;  %v1890_v9 = vrot.slane %v1881_v6, %v8870_v7 }
 0x7dc   :  { %v7293_v15 = vpop.f32.mrb[12].mxu1 }
 0x7dd   :  { %v1563_v16 = vadd.f32 %v7293_v15, %v6524_v14  ;;  %v1554_v17 = vpop.f32.mrb[13].mxu1 }
 0x7de   :  { %v1555_v18 = vadd.f32 %v6524_v14, %v1554_v17  ;;  %v7294_v19 = vpop.f32.mrb[14].mxu1 }
 0x7df   :  { %v1571_v20 = vmax.f32 %v1563_v16, 0.0  ;;  %v1566_v21 = vadd.f32 %v7294_v19, %v6524_v14  ;;  %v1557_v22 = vpop.f32.mrb[15].mxu1 }
 0x7e0   :  { %v1569_v23 = vmax.f32 %v1555_v18, 0.0  ;;  %v1558_v24 = vadd.f32 %v6524_v14, %v1557_v22 }
 0x7e1   :  { %v1572_v26 = vmax.f32 %v1566_v21, 0.0  ;;  %v1584_v27 = vrot.slane %v1571_v20, 5  ;;  %v1604_v28 = vrot.slane %v1571_v20, 7 }
 0x7e2   :  { %v1570_v29 = vmax.f32 %v1558_v24, 0.0  ;;  %v1575_v30 = vrot.slane %v1569_v23, 7  ;;  %v1598_v34 = vrot.slane %v1569_v23, 1 }
 0x7e3   :  { %v1586_v31 = vrot.slane %v1572_v26, 5  ;;  %v1606_v32 = vrot.slane %v1572_v26, 7  ;;  %v1619_v33 = vpack.c.bf16 %v1572_v26, %v1571_v20 }
 0x7e4   :  { %v1576_v35 = vrot.slane %v1570_v29, 7  ;;  %v1583_v36 = vrot.slane %v1570_v29, 5  ;;  %v1599_v37 = vrot.slane %v1570_v29, 1  ;;  %v1618_v39 = vpack.c.bf16 %v1570_v29, %v1569_v23 }
 0x7e5   :  { %v1607_v38 = vsel %vm565_vm7, %v1604_v28, %v1606_v32  ;;  %v1587_v40 = vsel %vm563_vm3, %v1584_v27, %v1586_v31  ;;  %v1580_v48 = vsel %vm565_vm7, 0.0, %v1575_v30 }
 0x7e6   :  { %v1577_v41 = vsel %vm565_vm7, %v1575_v30, %v1576_v35  ;;  %v1585_v25 = vsel %vm563_vm3, %v1583_v36, %v1584_v27  ;;  %v1600_v42 = vsel %vm498_vm5, %v1598_v34, %v1599_v37  ;;  %v1605_v44 = vsel %vm565_vm7, %v1576_v35, %v1604_v28 }
 0x7e7   :  { %v1589_v43 = vsel %vm565_vm7, 0.0, %v1585_v25  ;;  %v1609_v45 = vsel %vm529_vm8, %v1607_v38, 0.0  ;;  %v1611_v47 = vrot.slane %v1605_v44, 2  ;;  %v1592_v49 = vrot.slane %v1587_v40, 2 }
 0x7e8   :  { %v1591_v46 = vrot.slane %v1589_v43, 2  ;;  %v1612_v50 = vrot.slane %v1609_v45, 2  ;;  %v1603_v51 = vsel %vm529_vm8, %v1599_v37, 0.0 }
 0x7e9   :  { %v1617_v52 = vsel %vm551_vm6, %v1603_v51, %v1611_v47 }
 0x7ea   :  { %v1597_v53 = vsel %vm551_vm6, %v1577_v41, %v1591_v46  ;;  %v1593_v55 = vsel %vm551_vm6, %v1591_v46, %v1592_v49  ;;  %v1613_v56 = vsel %vm551_vm6, %v1611_v47, %v1612_v50  ;;  %v1788_v57 = vpack.c.bf16 %v1617_v52, %v1600_v42 }
 0x7eb   :  { %v1624_v58 = vpack.c.bf16 %v1597_v53, %v1580_v48  ;;  %v1625_v59 = vpack.c.bf16 %v1592_v49, %v1593_v55  ;;  %v1789_v61 = vpack.c.bf16 %v1612_v50, %v1613_v56 }
 0x7ed   :  { %6537 = vmatmul.mubr.msk.bf16.vlgmr.msra.gmra.mrb[16].mxu0 %vm408_vm0, %v1624_v58 }
 0x7ee   :  { %1736 = vmatpush1.bf16.msra.mxu0 %v7574_v54  ;;  %1698 = vmatprep.mubr.bf16.mxu0 %v8417_v12 }
 0x7ef   :  { %1737 = vmatprep.subr.bf16.mxu0 %v7579_v60 }
 0x7f2   :  { %1738 = vmatpush1.bf16.msra.mxu0 %v7577_v62 }
 0x7f3   :  { %1820 = vmatprep.subr.bf16.mxu0 %v7582_v63 }
 0x7f5   :  { %6538 = vmatmul.mubr.msk.bf16.gmra.mrb[20].mxu0 %vm408_vm0, %v1625_v59 }
 0x7f6   :  { %1767 = vmatprep.mubr.bf16.mxu0 %v8417_v12 }
 0x7fd   :  { %6543 = vmatmul.mubr.msk.bf16.vlgmr.msra.gmra.mrb[16].mxu0 %vm408_vm0, %v1618_v39 }
 0x7fe   :  { %1821 = vmatpush1.bf16.msra.mxu0 %v7580_v0  ;;  %1777 = vmatprep.mubr.bf16.mxu0 %v8417_v12 }
 0x7ff   :  { %1822 = vmatprep.subr.bf16.mxu0 %v7585_v1 }
 0x802   :  { %1823 = vmatpush1.bf16.msra.mxu0 %v7583_v2 }
 0x805   :  { %6544 = vmatmul.mubr.msk.bf16.gmra.mrb[20].mxu0 %vm408_vm0, %v1619_v33 }
 0x806   :  { %1852 = vmatprep.mubr.bf16.mxu0 %v8417_v12 }
 0x80d   :  { %6549 = vmatmul.mubr.msk.bf16.vlgmr.msra.gmra.mrb[16].mxu0 %vm408_vm0, %v1788_v57 }
 0x80e   :  { %1862 = vmatprep.mubr.bf16.mxu0 %v8417_v12 }
 0x815   :  { %6550 = vmatmul.mubr.msk.bf16.gmra.mrb[20].mxu0 %vm408_vm0, %v1789_v61 }
 0x816   :  { %2336 = vmatprep.mubr.bf16.mxu0 %v8417_v12 }
 0x8e0   :  { %v1854_v10 = vpop.f32.mrb[16].mxu0 }
 0x8e1   :  { %v1893_v11 = vadd.f32 %v1886_v8, %v1854_v10  ;;  %v1856_v13 = vpop.f32.mrb[17].mxu0 }
 0x8e2   :  { %v1894_v14 = vadd.f32 %v1890_v9, %v1856_v13  ;;  %v1858_v15 = vpop.f32.mrb[18].mxu0 }
 0x8e3   :  { %v1901_v16 = vmax.f32 %v1893_v11, 0.0  ;;  %v1895_v17 = vadd.f32 %v1886_v8, %v1858_v15  ;;  %v1860_v18 = vpop.f32.mrb[19].mxu0 }
 0x8e4   :  { %v1902_v19 = vmax.f32 %v1894_v14, 0.0  ;;  %v1896_v20 = vadd.f32 %v1890_v9, %v1860_v18 }
 0x8e5   :  { %v8874_v21 = vmax.f32 %v1895_v17, 0.0  ;;  %v1913_v22 = vrot.slane %v1901_v16, 1  ;;  %v1967_v23 = vrot.slane %v1901_v16, 2 }
 0x8e6   :  { %v8876_v24 = vmax.f32 %v1896_v20, 0.0  ;;  %v1916_v26 = vrot.slane %v1902_v19, 1  ;;  %v1970_v27 = vrot.slane %v1902_v19, 2 }
 0x8e7   :  { %v1914_v28 = vrot.slane %v8874_v21, 1  ;;  %v1968_v29 = vrot.slane %v8874_v21, 2  ;;  %v1929_v30 = vrot.slane %v8874_v21, 7 }
 0x8e8   :  { %v1917_v31 = vrot.slane %v8876_v24, 1  ;;  %v1932_v32 = vrot.slane %v8876_v24, 7  ;;  %v1971_v33 = vrot.slane %v8876_v24, 2  ;;  %v1864_v34 = vpop.f32.mrb[20].mxu0 }
 0x8e9   :  { %v1923_v35 = vsel %vm529_vm8, %v1914_v28, 0.0  ;;  %v1977_v36 = vsel %vm510_vm2, %v1968_v29, 0.0  ;;  %v1897_v37 = vadd.f32 %v1886_v8, %v1864_v34  ;;  %v1866_v38 = vpop.f32.mrb[21].mxu0  ;;  %v1915_v39 = vsel %vm498_vm5, %v1913_v22, %v1914_v28 }
 0x8ea   :  { %v1924_v40 = vsel %vm529_vm8, %v1917_v31, 0.0  ;;  %v1898_v41 = vadd.f32 %v1890_v9, %v1866_v38  ;;  %v1868_v25 = vpop.f32.mrb[22].mxu0  ;;  %v1918_v42 = vsel %vm498_vm5, %v1916_v26, %v1917_v31  ;;  %v1972_v43 = vsel %vm551_vm6, %v1970_v27, %v1971_v33 }
 0x8eb   :  { %v1905_v44 = vmax.f32 %v1897_v37, 0.0  ;;  %v1899_v45 = vadd.f32 %v1886_v8, %v1868_v25  ;;  %v1870_v46 = vpop.f32.mrb[23].mxu0  ;;  %v1960_v47 = vmax.f32 %v1902_v19, %v1918_v42  ;;  %v1978_v49 = vsel %vm510_vm2, %v1971_v33, 0.0  ;;  %v7587_v25 = vld [vmem:[%s9491_s0 + $0x40] sm:$0xff]  }
 0x8ec   :  { %v1906_v50 = vmax.f32 %v1898_v41, 0.0  ;;  %v1900_v48 = vadd.f32 %v1890_v9, %v1870_v46  ;;  %v1959_v51 = vmax.f32 %v1901_v16, %v1915_v39  ;;  %v1969_v52 = vsel %vm551_vm6, %v1967_v23, %v1968_v29  ;;  %v7590_v46 = vld [vmem:[%s9491_s0 + $0x8] sm:$0xff]  }
 0x8ed   :  { %v1930_v53 = vrot.slane %v1905_v44, 7  ;;  %v1983_v54 = vrot.slane %v1905_v44, 2  ;;  %v1907_v55 = vmax.f32 %v1899_v45, 0.0  ;;  %v1998_v56 = vmax.f32 %v1960_v47, %v1972_v43  ;;  %v7586_v43 = vld [vmem:[%s9492_s11] sm:$0x7f]   ;;  %v7589_v45 = vld [vmem:[%s9491_s0 + $0x48] sm:$0xff]  }
 0x8ee   :  { %v1933_v57 = vrot.slane %v1906_v50, 7  ;;  %v1984_v58 = vrot.slane %v1906_v50, 2  ;;  %v1908_v59 = vmax.f32 %v1900_v48, 0.0  ;;  %v1997_v60 = vmax.f32 %v1959_v51, %v1969_v52  ;;  %v7591_v47 = vld [vmem:[%s9491_s0 + $0x50] sm:$0xff]   ;;  %v7594_v48 = vld [vmem:[%s9491_s0 + $0x18] sm:$0xff]   ;;  %v7595_v51 = vld [vmem:[%s9491_s0 + $0x60] sm:$0xff]  }
 0x8ef   :  { %v1931_v61 = vsel %vm565_vm7, %v1929_v30, %v1930_v53  ;;  %v1995_v62 = vsel %vm551_vm6, %v1977_v36, %v1983_v54  ;;  %v1935_v63 = vrot.slane %v1907_v55, 7  ;;  %v1979_v0 = vsel %vm510_vm2, %v1907_v55, 0.0  ;;  %v7596_v52 = vld [vmem:[%s9491_s0 + $0x20] sm:$0xff]  }
 0x8f0   :  { %v1945_v1 = vrot.slane %v1931_v61, 2  ;;  %v1934_v2 = vsel %vm565_vm7, %v1932_v32, %v1933_v57  ;;  %v1985_v3 = vrot.slane %v1979_v0, 2  ;;  %v1937_v6 = vrot.slane %v1908_v59, 7 }
 0x8f1   :  { %v1946_v8 = vrot.slane %v1934_v2, 2  ;;  %v1936_v9 = vsel %vm565_vm7, %v1930_v53, %v1935_v63  ;;  %v1980_v10 = vsel %vm510_vm2, %v1908_v59, 0.0  ;;  %v1996_v11 = vsel %vm551_vm6, %v1978_v49, %v1984_v58  ;;  %v7592_v49 = vld [vmem:[%s9491_s0 + $0x10] sm:$0xff]   ;;  %v7597_v53 = vld [vmem:[%s9491_s0 + $0x68] sm:$0xff]  }
 0x8f2   :  { %v1941_v13 = vsel %vm529_vm8, %v1936_v9, 0.0  ;;  %v1938_v14 = vsel %vm565_vm7, %v1933_v57, %v1937_v6  ;;  %v1987_v15 = vrot.slane %v1980_v10, 2  ;;  %v1957_v16 = vsel %vm551_vm6, %v1923_v35, %v1945_v1  ;;  %v7601_v57 = vld [vmem:[%s9491_s0 + $0x78] sm:$0xff]   ;;  %v7603_v2 = vld [vmem:[%s9493_s20 + $0x20] ss:$8 sps:$4 sm:$0xff]  }
 0x8f3   :  { %v1947_v17 = vrot.slane %v1941_v13, 2  ;;  %v1942_v18 = vsel %vm529_vm8, %v1938_v14, 0.0  ;;  %v1958_v19 = vsel %vm551_vm6, %v1924_v40, %v1946_v8  ;;  %v1961_v20 = vmax.f32 %v8874_v21, %v1957_v16  ;;  %v7608_v6 = vld [vmem:[%s9493_s20 + $0x34] ss:$8 sps:$4 sm:$0xff]   ;;  %v7621_v9 = vld [vmem:[%s9494_s15 + $0x40] sm:$0xff]   ;;  %v7624_v13 = vld [vmem:[%s9494_s15 + $0x8] sm:$0xff]  }
 0x8f4   :  { %v1949_v22 = vrot.slane %v1942_v18, 2  ;;  %v1988_v23 = vsel %vm551_vm6, %v1984_v58, %v1987_v15  ;;  %v1962_v26 = vmax.f32 %v8876_v24, %v1958_v19  ;;  %v1986_v27 = vsel %vm551_vm6, %v1983_v54, %v1985_v3  ;;  %v7598_v54 = vld [vmem:[%s9491_s0 + $0x28] sm:$0xff]   ;;  %v7602_v58 = vld [vmem:[%s9491_s0 + $0x38] sm:$0xff]   ;;  %v7622_v10 = vld [vmem:[%s9494_s15] sm:$0xff]  }
 0x8f5   :  { %v1965_v28 = vmax.f32 %v1907_v55, %v1947_v17  ;;  %v1999_v29 = vmax.f32 %v1961_v20, %v1995_v62  ;;  %v1948_v30 = vsel %vm551_vm6, %v1945_v1, %v1947_v17  ;;  %v7599_v55 = vld [vmem:[%s9491_s0 + $0x70] sm:$0xff]   ;;  %v7605_v1 = vld [vmem:[%s9493_s20 + $0x24] ss:$8 sps:$4 sm:$0xff]   ;;  %v7627_v16 = vld [vmem:[%s9494_s15 + $0x58] sm:$0xff]  }
 0x8f6   :  { %v1950_v31 = vsel %vm551_vm6, %v1946_v8, %v1949_v22  ;;  %v1966_v32 = vmax.f32 %v1908_v59, %v1949_v22  ;;  %v2000_v33 = vmax.f32 %v1962_v26, %v1996_v11  ;;  %v1963_v34 = vmax.f32 %v1905_v44, %v1948_v30  ;;  %v7588_v44 = vld [vmem:[%s9491_s0] sm:$0xff]   ;;  %2304 = vmatprep.subr.bf16.mxu0 %v7605_v1  ;;  %v7623_v11 = vld [vmem:[%s9494_s15 + $0x48] sm:$0xff]   ;;  %v7625_v14 = vld [vmem:[%s9494_s15 + $0x50] sm:$0xff]  }
 0x8f7   :  { %v2007_v35 = vpack.c.bf16 %v1999_v29, %v1997_v60  ;;  %v1964_v21 = vmax.f32 %v1906_v50, %v1950_v31  ;;  %v2003_v36 = vmax.f32 %v1965_v28, %v1985_v3  ;;  %v7593_v50 = vld [vmem:[%s9491_s0 + $0x58] sm:$0xff]   ;;  %2305 = vmatpush1.bf16.msra.mxu0 %v7603_v2  ;;  %v7611_v8 = vld [vmem:[%s9493_s20 + $0x4] ss:$8 sps:$4 sm:$0xff]  }
 0x8f8   :  { %v2004_v37 = vmax.f32 %v1966_v32, %v1987_v15  ;;  %v2008_v24 = vpack.c.bf16 %v2000_v33, %v1998_v56  ;;  %v2001_v38 = vmax.f32 %v1963_v34, %v1986_v27  ;;  %v7600_v56 = vld [vmem:[%s9491_s0 + $0x30] sm:$0xff]   ;;  %2306 = vmatprep.subr.bf16.mxu0 %v7608_v6  ;;  %v7628_v17 = vld [vmem:[%s9494_s15 + $0x18] sm:$0xff]   ;;  %v7629_v18 = vld [vmem:[%s9494_s15 + $0x60] sm:$0xff]  }
 0x8f9   :  { %v2002_v39 = vmax.f32 %v1964_v21, %v1988_v23  ;;  %v7606_v3 = vld [vmem:[%s9493_s20 + $0x30] ss:$8 sps:$4 sm:$0xff]   ;;  %v7630_v19 = vld [vmem:[%s9494_s15 + $0x20] sm:$0xff]   ;;  %v7631_v20 = vld [vmem:[%s9494_s15 + $0x68] sm:$0xff]  }
 0x8fa   :  { %2026 = vmatprep.subr.bf16.mxu1 %v2008_v24  ;;  %v2009_v40 = vpack.c.bf16 %v2003_v36, %v2001_v38  ;;  %v7626_v15 = vld [vmem:[%s9494_s15 + $0x10] sm:$0xff]   ;;  %v6554_v23 = vld [vmem:[#allocation16] ss:$0 sm:$0xff] }
 0x8fb   :  { %2027 = vmatpush1.bf16.msra.mxu1 %v2007_v35  ;;  %v2010_v41 = vpack.c.bf16 %v2004_v37, %v2002_v39  ;;  %2307 = vmatpush1.bf16.msra.mxu0 %v7606_v3 }
 0x8fc   :  { %v2021_v42 = vsel %vm551_vm6, %v2009_v40, 0  ;;  %2370 = vmatprep.subr.bf16.mxu0 %v7611_v8 }
 0x8fd   :  { %6552 = vmatprep.subr.msk.bf16.mxu1 %vm551_vm6, %v2010_v41 }
 0x8ff   :  { %2029 = vmatpush1.bf16.msra.mxu1 %v2021_v42 }
 0x900   :  { %6957 = vmatprep.subr.bf16.mxu1 %v7587_v25 }
 0x902   :  { %6553 = vmatmul.mubr.msk.bf16.vlgmr.msra.gmra.mrb[16].mxu1 %vm2016_vm10, %v7586_v43 }
 0x903   :  { %6958 = vmatpush3.bf16.msra.mxu1 %v7588_v44 }
 0x904   :  { %6959 = vmatprep.subr.bf16.mxu1 %v7589_v45 }
 0x907   :  { %6960 = vmatpush3.bf16.msra.mxu1 %v7590_v46 }
 0x908   :  { %6961 = vmatprep.subr.bf16.mxu1 %v7591_v47  ;;  %v7609_v47 = vld [vmem:[%s9493_s20] ss:$8 sps:$4 sm:$0xff]  }
 0x90b   :  { %6962 = vmatpush3.bf16.msra.mxu1 %v7592_v49 }
 0x90c   :  { %6963 = vmatprep.subr.bf16.mxu1 %v7593_v50  ;;  %v7614_v50 = vld [vmem:[%s9493_s20 + $0x14] ss:$8 sps:$4 sm:$0xff]  }
 0x90f   :  { %6964 = vmatpush3.bf16.msra.mxu1 %v7594_v48  ;;  %v7612_v48 = vld [vmem:[%s9493_s20 + $0x10] ss:$8 sps:$4 sm:$0xff]  }
 0x910   :  { %6965 = vmatprep.subr.bf16.mxu1 %v7595_v51  ;;  %v7617_v51 = vld [vmem:[%s9493_s20 + $0x44] ss:$8 sps:$4 sm:$0xff]  }
 0x913   :  { %6966 = vmatpush3.bf16.msra.mxu1 %v7596_v52  ;;  %v7615_v52 = vld [vmem:[%s9493_s20 + $0x40] ss:$8 sps:$4 sm:$0xff]  }
 0x914   :  { %6967 = vmatprep.subr.bf16.mxu1 %v7597_v53  ;;  %v7620_v53 = vld [vmem:[%s9493_s20 + $0x54] ss:$8 sps:$4 sm:$0xff]  }
 0x917   :  { %6968 = vmatpush3.bf16.msra.mxu1 %v7598_v54  ;;  %v7618_v54 = vld [vmem:[%s9493_s20 + $0x50] ss:$8 sps:$4 sm:$0xff]  }
 0x918   :  { %6969 = vmatprep.subr.bf16.mxu1 %v7599_v55  ;;  %v7632_v55 = vld [vmem:[%s9494_s15 + $0x28] sm:$0xff]  }
 0x91b   :  { %6970 = vmatpush3.bf16.msra.mxu1 %v7600_v56  ;;  %v7633_v56 = vld [vmem:[%s9494_s15 + $0x70] sm:$0xff]  }
 0x91c   :  { %6971 = vmatprep.subr.bf16.mxu1 %v7601_v57  ;;  %v7634_v57 = vld [vmem:[%s9494_s15 + $0x30] sm:$0xff]  }
 0x91f   :  { %6972 = vmatpush3.bf16.msra.mxu1 %v7602_v58  ;;  %v7635_v58 = vld [vmem:[%s9494_s15 + $0x78] sm:$0xff]  }
 0x920   :  { %6979 = vmatprep.subr.bf16.mxu1 %v7621_v9 }
 0x9d5   :  { %v2060_v59 = vpop.f32.mrb[16].mxu1 }
 0x9d6   :  { %v2062_v60 = vpop.f32.mrb[17].mxu1 }
 0x9d7   :  { %v2064_v61 = vpop.f32.mrb[18].mxu1 }
 0x9d8   :  { %v2069_v62 = vpack.c.bf16 %v2064_v61, %v2060_v59  ;;  %v2066_v63 = vpop.f32.mrb[19].mxu1  ;;  %v7636_v59 = vld [vmem:[%s9494_s15 + $0x38] sm:$0xff]  }
 0x9d9   :  { %v2070_v0 = vpack.c.bf16 %v2066_v63, %v2062_v60  ;;  %v8418_v60 = vmov 0.0   ;;  %v2488_v61 = vld [vmem:[#allocation17] sm:$0x3] }
 0x9da   :  { %v2497_v63 = vrot.slane %v2488_v61, %v8870_v7 }
 0x9db   :  { %2238 = vmatprep.mubr.bf16.mxu1 %v2070_v0 }
 0x9dc   :  { %2239 = vmatmul.mubr.bf16.vlgmr.msra.gmra.mrb[20].mxu1 %v2069_v62  ;;  %v2493_v62 = vrot.slane %v2488_v61, %v8867_v5  ;;  %v7657_v61 = vld [vmem:[%s9495_s16 + $0x4] ss:$12 sps:$4 sm:$0xff]  }
 0x9dd   :  { %6980 = vmatpush3.bf16.msra.mxu1 %v7622_v10 }
 0x9de   :  { %6981 = vmatprep.subr.bf16.mxu1 %v7623_v11 }
 0x9e1   :  { %6982 = vmatpush3.bf16.msra.mxu1 %v7624_v13 }
 0x9e2   :  { %6983 = vmatprep.subr.bf16.mxu1 %v7625_v14 }
 0x9e5   :  { %6984 = vmatpush3.bf16.msra.mxu1 %v7626_v15 }
 0x9e6   :  { %6985 = vmatprep.subr.bf16.mxu1 %v7627_v16 }
 0x9e9   :  { %6986 = vmatpush3.bf16.msra.mxu1 %v7628_v17 }
 0x9ea   :  { %6987 = vmatprep.subr.bf16.mxu1 %v7629_v18  ;;  %v7637_v18 = vld [vmem:[%s9495_s16 + $0x8] ss:$12 sps:$4 sm:$0xff]  }
 0x9ed   :  { %6988 = vmatpush3.bf16.msra.mxu1 %v7630_v19  ;;  %v7638_v19 = vld [vmem:[%s9495_s16 + $0x20] ss:$12 sps:$4 sm:$0xff]  }
 0x9ee   :  { %6989 = vmatprep.subr.bf16.mxu1 %v7631_v20  ;;  %v7641_v20 = vld [vmem:[%s9495_s16 + $0x4c] ss:$12 sps:$4 sm:$0xff]  }
 0x9f1   :  { %6990 = vmatpush3.bf16.msra.mxu1 %v7632_v55  ;;  %v7651_v55 = vld [vmem:[%s9495_s16 + $0x50] ss:$12 sps:$4 sm:$0xff]  }
 0x9f2   :  { %6991 = vmatprep.subr.bf16.mxu1 %v7633_v56 }
 0x9f5   :  { %6992 = vmatpush3.bf16.msra.mxu1 %v7634_v57  ;;  %v7652_v57 = vld [vmem:[%s9495_s16 + $0xc8] ss:$12 sps:$4 sm:$0xff]  }
 0x9f6   :  { %6993 = vmatprep.subr.bf16.mxu1 %v7635_v58  ;;  %v7653_v58 = vld [vmem:[%s9495_s16 + $0x68] ss:$12 sps:$4 sm:$0xff]  }
 0x9f9   :  { %6994 = vmatpush3.bf16.msra.mxu1 %v7636_v59  ;;  %v7654_v59 = vld [vmem:[%s9495_s16 + $0x80] ss:$12 sps:$4 sm:$0xff]  }
 0x9fa   :  { %7305 = vmatprep.subr.bf16.mxu1 %v8418_v60 }
 0xaaf   :  { %v6973_v22 = vpop.f32.mrb[20].mxu1 }
 0xab0   :  { %v6974_v26 = vpop.f32.mrb[21].mxu1 }
 0xab1   :  { %v6975_v27 = vadd.f32 %v6974_v26, %v6973_v22  ;;  %v6976_v28 = vpop.f32.mrb[22].mxu1  ;;  %v7639_v22 = vld [vmem:[%s9495_s16 + $0x48] ss:$12 sps:$4 sm:$0xff]   ;;  %v7645_v26 = vld [vmem:[%s9495_s16 + $0x64] ss:$12 sps:$4 sm:$0xff]  }
 0xab2   :  { %v6977_v29 = vpop.f32.mrb[23].mxu1 }
 0xab3   :  { %v2241_v30 = vadd.f32 %v6975_v27, %v6554_v23  ;;  %v6978_v31 = vadd.f32 %v6977_v29, %v6976_v28  ;;  %v7643_v27 = vld [vmem:[%s9495_s16 + $0x60] ss:$12 sps:$4 sm:$0xff]   ;;  %v7647_v28 = vld [vmem:[%s9495_s16 + $0x78] ss:$12 sps:$4 sm:$0xff]   ;;  %v7649_v29 = vld [vmem:[%s9495_s16 + $0x7c] ss:$12 sps:$4 sm:$0xff]  }
 0xab5   :  { %v2247_v32 = vmax.f32 %v2241_v30, 0.0  ;;  %v2244_v33 = vadd.f32 %v6978_v31, %v6554_v23  ;;  %v7642_v23 = vld [vmem:[%s9495_s16 + $0x38] ss:$12 sps:$4 sm:$0xff]   ;;  %v6586_v31 = vld [vmem:[#allocation19] ss:$0 sm:$0xff] }
 0xab7   :  { %v2263_v34 = vrot.slane %v2247_v32, 1  ;;  %v2248_v35 = vmax.f32 %v2244_v33, 0.0  ;;  %v2254_v21 = vrot.slane %v2247_v32, 6  ;;  %v2250_v24 = vrot.slane %v2247_v32, 7 }
 0xab9   :  { %v2255_v36 = vrot.slane %v2248_v35, 6  ;;  %v2266_v37 = vsel %vm551_vm6, %v2248_v35, 0.0  ;;  %v2271_v39 = vpack.c.bf16 %v2248_v35, %v2247_v32  ;;  %v2265_v41 = vsel %vm551_vm6, %v2263_v34, 0.0 }
 0xaba   :  { %v2268_v38 = vrot.slane %v2266_v37, 1  ;;  %v2252_v45 = vsel %vm565_vm7, 0.0, %v2250_v24 }
 0xabb   :  { %v2256_v40 = vsel %vm516_vm4, %v2254_v21, %v2255_v36 }
 0xabc   :  { %v2258_v25 = vsel %vm565_vm7, 0.0, %v2256_v40  ;;  %v2270_v42 = vsel %vm498_vm5, %v2265_v41, %v2268_v38 }
 0xabd   :  { %v2260_v43 = vrot.slane %v2258_v25, 1  ;;  %v2413_v44 = vpack.c.bf16 %v2268_v38, %v2270_v42  ;;  %v7646_v42 = vld [vmem:[%s9495_s16 + $0x98] ss:$12 sps:$4 sm:$0xff]  }
 0xabf   :  { %v2262_v46 = vsel %vm498_vm5, %v2252_v45, %v2260_v43 }
 0xac0   :  { %v2276_v49 = vpack.c.bf16 %v2260_v43, %v2262_v46 }
 0xac2   :  { %6575 = vmatmul.mubr.msk.bf16.vlgmr.msra.gmra.mrb[24].mxu0 %vm408_vm0, %v2276_v49 }
 0xac3   :  { %2371 = vmatpush1.bf16.msra.mxu0 %v7609_v47  ;;  %2402 = vmatprep.mubr.bf16.mxu0 %v8417_v12 }
 0xac4   :  { %2372 = vmatprep.subr.bf16.mxu0 %v7614_v50 }
 0xac7   :  { %2373 = vmatpush1.bf16.msra.mxu0 %v7612_v48 }
 0xac8   :  { %2441 = vmatprep.subr.bf16.mxu0 %v7617_v51 }
 0xace   :  { %6580 = vmatmul.mubr.msk.bf16.vlgmr.msra.gmra.mrb[24].mxu0 %vm408_vm0, %v2271_v39 }
 0xacf   :  { %2442 = vmatpush1.bf16.msra.mxu0 %v7615_v52  ;;  %2473 = vmatprep.mubr.bf16.mxu0 %v8417_v12  ;;  %v7650_v52 = vld [vmem:[%s9495_s16 + $0xb0] ss:$12 sps:$4 sm:$0xff]  }
 0xad0   :  { %2443 = vmatprep.subr.bf16.mxu0 %v7620_v53 }
 0xad3   :  { %2444 = vmatpush1.bf16.msra.mxu0 %v7618_v54 }
 0xad4   :  { %2788 = vmatprep.subr.bf16.mxu0 %v7641_v20  ;;  %v7680_v20 = vld [vmem:[%s9496_s21] sm:$0xff]  }
 0xada   :  { %6585 = vmatmul.mubr.msk.bf16.vlgmr.msra.gmra.mrb[24].mxu0 %vm408_vm0, %v2413_v44 }
 0xadb   :  { %2820 = vmatprep.mubr.bf16.mxu0 %v8417_v12  ;;  %2789 = vmatpush1.bf16.msra.mxu0 %v7639_v22  ;;  %v7681_v22 = vld [vmem:[%s9496_s21 + $0xb0] sm:$0xff]  }
 0xadc   :  { %2790 = vmatprep.subr.bf16.mxu0 %v7645_v26  ;;  %v7683_v26 = vld [vmem:[%s9496_s21 + $0x8] sm:$0xff]  }
 0xadf   :  { %2791 = vmatpush1.bf16.msra.mxu0 %v7643_v27  ;;  %v7684_v27 = vld [vmem:[%s9496_s21 + $0xb8] sm:$0xff]  }
 0xae0   :  { %2792 = vmatprep.subr.bf16.mxu0 %v7649_v29  ;;  %v7686_v29 = vld [vmem:[%s9496_s21 + $0x10] sm:$0xff]  }
 0xae3   :  { %2793 = vmatpush1.bf16.msra.mxu0 %v7647_v28  ;;  %v7685_v28 = vld [vmem:[%s9496_s21 + $0x50] sm:$0xff]  }
 0xae4   :  { %7295 = vmatprep.subr.bf16.mxu0 %v8418_v60 }
 0xbad   :  { %v2475_v0 = vpop.f32.mrb[24].mxu0 }
 0xbae   :  { %v2500_v1 = vadd.f32 %v2493_v62, %v2475_v0  ;;  %v2477_v2 = vpop.f32.mrb[25].mxu0  ;;  %v7658_v0 = vld [vmem:[%s9495_s16 + $0x18] ss:$12 sps:$4 sm:$0xff]  }
 0xbaf   :  { %v2501_v3 = vadd.f32 %v2497_v63, %v2477_v2  ;;  %v2479_v6 = vpop.f32.mrb[26].mxu0  ;;  %v7661_v2 = vld [vmem:[%s9495_s16 + $0x30] ss:$12 sps:$4 sm:$0xff]  }
 0xbb0   :  { %v2502_v8 = vadd.f32 %v2493_v62, %v2479_v6  ;;  %v2481_v9 = vpop.f32.mrb[27].mxu0  ;;  %v2504_v11 = vmax.f32 %v2500_v1, 0.0  ;;  %v7655_v62 = vld [vmem:[%s9495_s16] ss:$12 sps:$4 sm:$0xff]   ;;  %v7664_v6 = vld [vmem:[%s9495_s16 + $0x90] ss:$12 sps:$4 sm:$0xff]  }
 0xbb1   :  { %v2503_v10 = vadd.f32 %v2497_v63, %v2481_v9  ;;  %v2505_v14 = vmax.f32 %v2501_v3, 0.0  ;;  %v7660_v63 = vld [vmem:[%s9495_s16 + $0x1c] ss:$12 sps:$4 sm:$0xff]   ;;  %v7663_v1 = vld [vmem:[%s9495_s16 + $0x34] ss:$12 sps:$4 sm:$0xff]  }
 0xbb2   :  { %v2506_v13 = vmax.f32 %v2502_v8, 0.0  ;;  %v7666_v3 = vld [vmem:[%s9495_s16 + $0x94] ss:$12 sps:$4 sm:$0xff]   ;;  %v7669_v8 = vld [vmem:[%s9495_s16 + $0xac] ss:$12 sps:$4 sm:$0xff]  }
 0xbb3   :  { %v2507_v15 = vmax.f32 %v2503_v10, 0.0  ;;  %v7667_v9 = vld [vmem:[%s9495_s16 + $0xa8] ss:$12 sps:$4 sm:$0xff]   ;;  %v7672_v10 = vld [vmem:[%s9495_s16 + $0xc4] ss:$12 sps:$4 sm:$0xff]  }
 0xbb4   :  { %v2508_v16 = vpack.c.bf16 %v2506_v13, %v2504_v11  ;;  %v7670_v11 = vld [vmem:[%s9495_s16 + $0xc0] ss:$12 sps:$4 sm:$0xff]  }
 0xbb5   :  { %v2509_v17 = vpack.c.bf16 %v2507_v15, %v2505_v14  ;;  %v7673_v13 = vld [vmem:[%s9496_s21 + $0x80] sm:$0xff]   ;;  %v7674_v14 = vld [vmem:[%s9496_s21 + $0x88] sm:$0xff]   ;;  %v7675_v15 = vld [vmem:[%s9496_s21 + $0x90] sm:$0xff]  }
 0xbb7   :  { %2677 = vmatprep.mubr.bf16.mxu1 %v2509_v17  ;;  %v7677_v17 = vld [vmem:[%s9496_s21 + $0xa0] sm:$0xff]  }
 0xbb8   :  { %2678 = vmatmul.mubr.bf16.vlgmr.msra.gmra.mrb[24].mxu1 %v2508_v16  ;;  %v7676_v16 = vld [vmem:[%s9496_s21 + $0x98] sm:$0xff]  }
 0xbb9   :  { %7306 = vmatpush3.bf16.msra.mxu1 %v7637_v18  ;;  %7311 = vmatprep.mubr.msk.bf16.mxu1 %vm8419_vm11, %v8418_v60  ;;  %v7678_v18 = vld [vmem:[%s9496_s21 + $0xa8] sm:$0xff]  }
 0xbba   :  { %7307 = vmatprep.subr.bf16.mxu1 %v8418_v60 }
 0xbbd   :  { %7308 = vmatpush3.bf16.msra.mxu1 %v7638_v19  ;;  %v7679_v19 = vld [vmem:[%s9496_s21 + $0x40] sm:$0xff]  }
 0xbbe   :  { %7309 = vmatprep.subr.bf16.mxu1 %v8418_v60 }
 0xbc1   :  { %7310 = vmatpush3.bf16.msra.mxu1 %v7642_v23  ;;  %v7682_v23 = vld [vmem:[%s9496_s21 + $0x48] sm:$0xff]  }
 0xbc2   :  { %7315 = vmatprep.subr.bf16.mxu1 %v8418_v60 }
 0xc8b   :  { %v6995_v30 = vpop.f32.mrb[24].mxu1 }
 0xc8c   :  { %v6996_v32 = vpop.f32.mrb[25].mxu1 }
 0xc8d   :  { %v6997_v33 = vadd.f32 %v6996_v32, %v6995_v30  ;;  %v6998_v34 = vpop.f32.mrb[26].mxu1  ;;  %v7687_v30 = vld [vmem:[%s9496_s21 + $0x58] sm:$0xff]   ;;  %v7689_v32 = vld [vmem:[%s9496_s21 + $0x60] sm:$0xff]  }
 0xc8e   :  { %v6999_v35 = vpop.f32.mrb[27].mxu1 }
 0xc8f   :  { %v2680_v21 = vadd.f32 %v6997_v33, %v6586_v31  ;;  %v7000_v36 = vadd.f32 %v6999_v35, %v6998_v34  ;;  %v7690_v33 = vld [vmem:[%s9496_s21 + $0x20] sm:$0xff]   ;;  %v7691_v34 = vld [vmem:[%s9496_s21 + $0x68] sm:$0xff]  }
 0xc90   :  { %v7692_v35 = vld [vmem:[%s9496_s21 + $0x28] sm:$0xff]  }
 0xc91   :  { %v2686_v37 = vmax.f32 %v2680_v21, 0.0  ;;  %v2683_v24 = vadd.f32 %v7000_v36, %v6586_v31  ;;  %v7688_v31 = vld [vmem:[%s9496_s21 + $0x18] sm:$0xff]   ;;  %v7693_v21 = vld [vmem:[%s9496_s21 + $0x70] sm:$0xff]  }
 0xc92   :  { %v7694_v36 = vld [vmem:[%s9496_s21 + $0x30] sm:$0xff]  }
 0xc93   :  { %v2702_v38 = vrot.slane %v2686_v37, 1  ;;  %v2687_v39 = vmax.f32 %v2683_v24, 0.0  ;;  %v2693_v40 = vrot.slane %v2686_v37, 6  ;;  %v2689_v43 = vrot.slane %v2686_v37, 7  ;;  %v7696_v24 = vld [vmem:[%s9496_s21 + $0x38] sm:$0xff]  }
 0xc95   :  { %v2694_v41 = vrot.slane %v2687_v39, 6  ;;  %v2705_v25 = vsel %vm551_vm6, %v2687_v39, 0.0  ;;  %v2710_v45 = vpack.c.bf16 %v2687_v39, %v2686_v37  ;;  %v2704_v47 = vsel %vm551_vm6, %v2702_v38, 0.0  ;;  %v7695_v37 = vld [vmem:[%s9496_s21 + $0x78] sm:$0xff]  }
 0xc96   :  { %v2707_v44 = vrot.slane %v2705_v25, 1  ;;  %v2691_v53 = vsel %vm565_vm7, 0.0, %v2689_v43 }
 0xc97   :  { %v2695_v46 = vsel %vm516_vm4, %v2693_v40, %v2694_v41  ;;  %7312 = vmatmul.mubr.msk.bf16.vlgmr.msra.gmra.mrb[28].mxu1 %vm2784_vm12, %v2710_v45 }
 0xc98   :  { %v2697_v49 = vsel %vm565_vm7, 0.0, %v2695_v46  ;;  %v2709_v50 = vsel %vm498_vm5, %v2704_v47, %v2707_v44  ;;  %7316 = vmatpush3.bf16.msra.mxu1 %v7646_v42  ;;  %7321 = vmatprep.mubr.msk.bf16.mxu1 %vm8419_vm11, %v8418_v60  ;;  %v3161_v46 = vld [vmem:[#allocation20] sm:$0x7] }
 0xc99   :  { %v2699_v48 = vrot.slane %v2697_v49, 1  ;;  %v3007_v51 = vpack.c.bf16 %v2707_v44, %v2709_v50  ;;  %7317 = vmatprep.subr.bf16.mxu1 %v8418_v60 }
 0xc9b   :  { %v2701_v54 = vsel %vm498_vm5, %v2691_v53, %v2699_v48 }
 0xc9c   :  { %v2723_v56 = vpack.c.bf16 %v2699_v48, %v2701_v54  ;;  %7318 = vmatpush3.bf16.msra.mxu1 %v7650_v52 }
 0xc9d   :  { %7319 = vmatprep.subr.bf16.mxu1 %v8418_v60 }
 0xc9e   :  { %6612 = vmatmul.mubr.msk.bf16.vlgmr.msra.gmra.mrb[28].mxu0 %vm2784_vm12, %v2723_v56 }
 0xc9f   :  { %7296 = vmatpush3.bf16.msra.mxu0 %v7651_v55  ;;  %7301 = vmatprep.mubr.msk.bf16.mxu0 %vm8419_vm11, %v8418_v60 }
 0xca0   :  { %7297 = vmatprep.subr.bf16.mxu0 %v8418_v60  ;;  %7320 = vmatpush3.bf16.msra.mxu1 %v7652_v57 }
 0xca1   :  { %7325 = vmatprep.subr.bf16.mxu1 %v8418_v60 }
 0xca3   :  { %7298 = vmatpush3.bf16.msra.mxu0 %v7653_v58  ;;  %7322 = vmatmul.mubr.msk.bf16.vlgmr.msra.gmra.mrb[32].mxu1 %vm2784_vm12, %v3007_v51 }
 0xca4   :  { %7299 = vmatprep.subr.bf16.mxu0 %v8418_v60  ;;  %7341 = vmatprep.mubr.msk.bf16.mxu1 %vm8419_vm11, %v8418_v60 }
 0xca5   :  { %7326 = vmatpush3.bf16.msra.mxu1 %v7673_v13 }
 0xca6   :  { %7327 = vmatprep.subr.bf16.mxu1 %v8418_v60 }
 0xca7   :  { %7300 = vmatpush3.bf16.msra.mxu0 %v7654_v59 }
 0xca8   :  { %2923 = vmatprep.subr.bf16.mxu0 %v7657_v61 }
 0xca9   :  { %7328 = vmatpush3.bf16.msra.mxu1 %v7674_v14 }
 0xcaa   :  { %7302 = vmatmul.mubr.msk.bf16.vlgmr.msra.gmra.mrb[32].mxu0 %vm2784_vm12, %v2723_v56  ;;  %7329 = vmatprep.subr.bf16.mxu1 %v8418_v60 }
 0xcab   :  { %2924 = vmatpush1.bf16.msra.mxu0 %v7655_v62  ;;  %2955 = vmatprep.mubr.bf16.mxu0 %v8417_v12  ;;  %v3166_v62 = vrot.slane %v3161_v46, %v8867_v5 }
 0xcac   :  { %2925 = vmatprep.subr.bf16.mxu0 %v7660_v63  ;;  %v3170_v63 = vrot.slane %v3161_v46, %v8870_v7 }
 0xcad   :  { %7330 = vmatpush3.bf16.msra.mxu1 %v7675_v15 }
 0xcae   :  { %7331 = vmatprep.subr.bf16.mxu1 %v8418_v60 }
 0xcaf   :  { %2926 = vmatpush1.bf16.msra.mxu0 %v7658_v0 }
 0xcb0   :  { %2927 = vmatprep.subr.bf16.mxu0 %v7663_v1 }
 0xcb1   :  { %7332 = vmatpush3.bf16.msra.mxu1 %v7676_v16 }
 0xcb2   :  { %7333 = vmatprep.subr.bf16.mxu1 %v8418_v60 }
 0xcb3   :  { %2928 = vmatpush1.bf16.msra.mxu0 %v7661_v2 }
 0xcb4   :  { %3071 = vmatprep.subr.bf16.mxu0 %v7666_v3 }
 0xcb5   :  { %7334 = vmatpush3.bf16.msra.mxu1 %v7677_v17 }
 0xcb6   :  { %6623 = vmatmul.mubr.msk.bf16.vlgmr.msra.gmra.mrb[28].mxu0 %vm2784_vm12, %v2710_v45  ;;  %7335 = vmatprep.subr.bf16.mxu1 %v8418_v60  ;;  %v9065_v45 = vsub.s32 2, %v8864_v4 }
 0xcb7   :  { %3072 = vmatpush1.bf16.msra.mxu0 %v7664_v6  ;;  %3103 = vmatprep.mubr.bf16.mxu0 %v8417_v12 }
 0xcb8   :  { %3073 = vmatprep.subr.bf16.mxu0 %v7669_v8  ;;  %v3174_v50 = vrot.slane %v3161_v46, %v9065_v45 }
 0xcb9   :  { %7336 = vmatpush3.bf16.msra.mxu1 %v7678_v18  ;;  %v7699_v18 = vld [vmem:[%s9497_s6 + $0x4c] ss:$12 sps:$4 sm:$0xff]  }
 0xcba   :  { %7337 = vmatprep.subr.bf16.mxu1 %v8418_v60 }
 0xcbb   :  { %3074 = vmatpush1.bf16.msra.mxu0 %v7667_v9 }
 0xcbc   :  { %3075 = vmatprep.subr.bf16.mxu0 %v7672_v10 }
 0xcbd   :  { %7338 = vmatpush3.bf16.msra.mxu1 %v7681_v22  ;;  %v7703_v22 = vld [vmem:[%s9497_s6 + $0x64] ss:$12 sps:$4 sm:$0xff]  }
 0xcbe   :  { %7339 = vmatprep.subr.bf16.mxu1 %v8418_v60 }
 0xcbf   :  { %3076 = vmatpush1.bf16.msra.mxu0 %v7670_v11 }
 0xcc0   :  { %7013 = vmatprep.subr.bf16.mxu0 %v7679_v19  ;;  %v7700_v19 = vld [vmem:[%s9497_s6 + $0x50] ss:$12 sps:$4 sm:$0xff]  }
 0xcc1   :  { %7340 = vmatpush3.bf16.msra.mxu1 %v7684_v27  ;;  %v7707_v27 = vld [vmem:[%s9497_s6 + $0x7c] ss:$12 sps:$4 sm:$0xff]  }
 0xcc2   :  { %6634 = vmatmul.mubr.msk.bf16.vlgmr.msra.gmra.mrb[28].mxu0 %vm2784_vm12, %v3007_v51  ;;  %7345 = vmatprep.subr.bf16.mxu1 %v8418_v60 }
 0xcc3   :  { %7014 = vmatpush3.bf16.msra.mxu0 %v7680_v20  ;;  %v7697_v20 = vld [vmem:[%s9497_s6 + $0x48] ss:$12 sps:$4 sm:$0xff]  }
 0xcc4   :  { %7015 = vmatprep.subr.bf16.mxu0 %v7682_v23  ;;  %v7704_v23 = vld [vmem:[%s9497_s6 + $0x68] ss:$12 sps:$4 sm:$0xff]  }
 0xcc7   :  { %7016 = vmatpush3.bf16.msra.mxu0 %v7683_v26  ;;  %v7701_v26 = vld [vmem:[%s9497_s6 + $0x60] ss:$12 sps:$4 sm:$0xff]  }
 0xcc8   :  { %7017 = vmatprep.subr.bf16.mxu0 %v7685_v28  ;;  %v7708_v28 = vld [vmem:[%s9497_s6 + $0x80] ss:$12 sps:$4 sm:$0xff]  }
 0xccb   :  { %7018 = vmatpush3.bf16.msra.mxu0 %v7686_v29  ;;  %v7705_v29 = vld [vmem:[%s9497_s6 + $0x78] ss:$12 sps:$4 sm:$0xff]  }
 0xccc   :  { %7019 = vmatprep.subr.bf16.mxu0 %v7687_v30  ;;  %v7711_v30 = vld [vmem:[%s9497_s6 + $0x4] ss:$12 sps:$4 sm:$0xff]  }
 0xccf   :  { %7020 = vmatpush3.bf16.msra.mxu0 %v7688_v31 }
 0xcd0   :  { %7021 = vmatprep.subr.bf16.mxu0 %v7689_v32 }
 0xcd3   :  { %7022 = vmatpush3.bf16.msra.mxu0 %v7690_v33 }
 0xcd4   :  { %7023 = vmatprep.subr.bf16.mxu0 %v7691_v34 }
 0xcd7   :  { %7024 = vmatpush3.bf16.msra.mxu0 %v7692_v35 }
 0xcd8   :  { %7025 = vmatprep.subr.bf16.mxu0 %v7693_v21  ;;  %v6636_v21 = vld [vmem:[#allocation22] ss:$0 sm:$0xff] }
 0xcdb   :  { %7026 = vmatpush3.bf16.msra.mxu0 %v7694_v36 }
 0xcdc   :  { %7027 = vmatprep.subr.bf16.mxu0 %v7695_v37 }
 0xcdf   :  { %7028 = vmatpush3.bf16.msra.mxu0 %v7696_v24 }
 0xce0   :  { %3575 = vmatprep.subr.bf16.mxu0 %v7699_v18  ;;  %v7729_v18 = vld [vmem:[%s9497_s6 + $0xc0] ss:$12 sps:$4 sm:$0xff]  }
 0xd6a   :  { %v3000_v38 = vpop.f32.mrb[28].mxu1 }
 0xd6b   :  { %v7313_v39 = vpop.f32.mrb[29].mxu1 }
 0xd6c   :  { %v3003_v40 = vpop.f32.mrb[30].mxu1 }
 0xd6d   :  { %v7314_v41 = vpop.f32.mrb[31].mxu1 }
 0xd76   :  { %v3148_v25 = vpop.f32.mrb[32].mxu1 }
 0xd77   :  { %v7323_v42 = vpop.f32.mrb[33].mxu1 }
 0xd78   :  { %v3151_v43 = vpop.f32.mrb[34].mxu1 }
 0xd79   :  { %v7324_v44 = vpop.f32.mrb[35].mxu1 }
 0xd7d   :  { %v2865_v47 = vpop.f32.mrb[32].mxu0 }
 0xd7e   :  { %v3001_v49 = vadd.f32 %v3000_v38, %v2865_v47  ;;  %v7303_v48 = vpop.f32.mrb[33].mxu0 }
 0xd7f   :  { %v2868_v51 = vpop.f32.mrb[34].mxu0 }
 0xd80   :  { %v3157_v52 = vadd.f32 %v3148_v25, %v3001_v49  ;;  %v3004_v53 = vadd.f32 %v3003_v40, %v2868_v51  ;;  %v7304_v54 = vpop.f32.mrb[35].mxu0 }
 0xd82   :  { %v3180_v55 = vadd.f32 %v3174_v50, %v3157_v52  ;;  %v3160_v56 = vadd.f32 %v3151_v43, %v3004_v53 }
 0xd84   :  { %v3183_v57 = vadd.f32 %v3174_v50, %v3160_v56  ;;  %v3186_v58 = vmax.f32 %v3180_v55, 0.0 }
 0xd86   :  { %v3189_v59 = vmax.f32 %v3183_v57, 0.0 }
 0xd88   :  { %v3192_v61 = vpack.c.bf16 %v3189_v59, %v3186_v58 }
 0xd8a   :  { %7342 = vmatmul.mubr.bf16.vlgmr.msra.gmra.mrb[36].mxu1 %v3192_v61 }
 0xd8b   :  { %7351 = vmatprep.mubr.msk.bf16.mxu1 %vm8419_vm11, %v8418_v60  ;;  %7346 = vmatpush3.bf16.msra.mxu1 %v7700_v19  ;;  %v7732_v19 = vld [vmem:[%s9497_s6 + $0xc8] ss:$12 sps:$4 sm:$0xff]  }
 0xd8c   :  { %7347 = vmatprep.subr.bf16.mxu1 %v8418_v60 }
 0xd8f   :  { %7348 = vmatpush3.bf16.msra.mxu1 %v7704_v23  ;;  %v7735_v23 = vld [vmem:[%s9498_s18] sm:$0xff]  }
 0xd90   :  { %7349 = vmatprep.subr.bf16.mxu1 %v8418_v60 }
 0xd93   :  { %7350 = vmatpush3.bf16.msra.mxu1 %v7708_v28  ;;  %v7738_v28 = vld [vmem:[%s9498_s18 + $0x8] sm:$0xff]  }
 0xd94   :  { %7355 = vmatprep.subr.bf16.mxu1 %v8418_v60 }
 0xd95   :  { %v3105_v0 = vpop.f32.mrb[28].mxu0 }
 0xd96   :  { %v3178_v1 = vadd.f32 %v3166_v62, %v3105_v0  ;;  %v3107_v2 = vpop.f32.mrb[29].mxu0 }
 0xd97   :  { %v3179_v3 = vadd.f32 %v3170_v63, %v3107_v2  ;;  %v3109_v6 = vpop.f32.mrb[30].mxu0  ;;  %v7713_v2 = vld [vmem:[%s9497_s6 + $0x18] ss:$12 sps:$4 sm:$0xff]  }
 0xd98   :  { %v3181_v8 = vadd.f32 %v3166_v62, %v3109_v6  ;;  %v3111_v9 = vpop.f32.mrb[31].mxu0  ;;  %v3184_v11 = vmax.f32 %v3178_v1, 0.0  ;;  %v7709_v62 = vld [vmem:[%s9497_s6] ss:$12 sps:$4 sm:$0xff]   ;;  %v7715_v1 = vld [vmem:[%s9497_s6 + $0x1c] ss:$12 sps:$4 sm:$0xff]  }
 0xd99   :  { %v3182_v10 = vadd.f32 %v3170_v63, %v3111_v9  ;;  %v3185_v14 = vmax.f32 %v3179_v3, 0.0  ;;  %v7712_v63 = vld [vmem:[%s9497_s6 + $0x8] ss:$12 sps:$4 sm:$0xff]   ;;  %v7716_v3 = vld [vmem:[%s9497_s6 + $0x20] ss:$12 sps:$4 sm:$0xff]  }
 0xd9a   :  { %v3187_v13 = vmax.f32 %v3181_v8, 0.0  ;;  %v7719_v6 = vld [vmem:[%s9497_s6 + $0x34] ss:$12 sps:$4 sm:$0xff]   ;;  %v7717_v8 = vld [vmem:[%s9497_s6 + $0x30] ss:$12 sps:$4 sm:$0xff]  }
 0xd9b   :  { %v3188_v15 = vmax.f32 %v3182_v10, 0.0  ;;  %v7720_v9 = vld [vmem:[%s9497_s6 + $0x38] ss:$12 sps:$4 sm:$0xff]   ;;  %v7723_v10 = vld [vmem:[%s9497_s6 + $0x94] ss:$12 sps:$4 sm:$0xff]  }
 0xd9c   :  { %v3190_v16 = vpack.c.bf16 %v3187_v13, %v3184_v11  ;;  %v7721_v11 = vld [vmem:[%s9497_s6 + $0x90] ss:$12 sps:$4 sm:$0xff]   ;;  %v7724_v13 = vld [vmem:[%s9497_s6 + $0x98] ss:$12 sps:$4 sm:$0xff]  }
 0xd9d   :  { %v3191_v17 = vpack.c.bf16 %v3188_v15, %v3185_v14  ;;  %v7727_v14 = vld [vmem:[%s9497_s6 + $0xac] ss:$12 sps:$4 sm:$0xff]   ;;  %v7725_v15 = vld [vmem:[%s9497_s6 + $0xa8] ss:$12 sps:$4 sm:$0xff]  }
 0xd9f   :  { %3424 = vmatprep.mubr.bf16.mxu0 %v3191_v17  ;;  %v7731_v17 = vld [vmem:[%s9497_s6 + $0xc4] ss:$12 sps:$4 sm:$0xff]  }
 0xda0   :  { %3425 = vmatmul.mubr.bf16.vlgmr.msra.gmra.mrb[36].mxu0 %v3190_v16  ;;  %v7728_v16 = vld [vmem:[%s9497_s6 + $0xb0] ss:$12 sps:$4 sm:$0xff]  }
 0xda1   :  { %3607 = vmatprep.mubr.bf16.mxu0 %v8417_v12  ;;  %3576 = vmatpush1.bf16.msra.mxu0 %v7697_v20  ;;  %v7733_v20 = vld [vmem:[%s9498_s18 + $0x40] sm:$0xff]  }
 0xda2   :  { %3577 = vmatprep.subr.bf16.mxu0 %v7703_v22  ;;  %v7734_v22 = vld [vmem:[%s9498_s18 + $0x80] sm:$0xff]  }
 0xda5   :  { %3578 = vmatpush1.bf16.msra.mxu0 %v7701_v26  ;;  %v7736_v26 = vld [vmem:[%s9498_s18 + $0x48] sm:$0xff]  }
 0xda6   :  { %3579 = vmatprep.subr.bf16.mxu0 %v7707_v27  ;;  %v7737_v27 = vld [vmem:[%s9498_s18 + $0x88] sm:$0xff]  }
 0xda9   :  { %3580 = vmatpush1.bf16.msra.mxu0 %v7705_v29  ;;  %v7739_v29 = vld [vmem:[%s9498_s18 + $0x50] sm:$0xff]  }
 0xdaa   :  { %3710 = vmatprep.subr.bf16.mxu0 %v7711_v30  ;;  %v7740_v30 = vld [vmem:[%s9498_s18 + $0x90] sm:$0xff]  }
 0xe5d   :  { %v3467_v31 = vpop.f32.mrb[36].mxu1 }
 0xe5e   :  { %v7343_v32 = vpop.f32.mrb[37].mxu1 }
 0xe5f   :  { %v3470_v33 = vpop.f32.mrb[38].mxu1  ;;  %v7742_v32 = vld [vmem:[%s9498_s18 + $0x58] sm:$0xff]  }
 0xe60   :  { %v7344_v34 = vpop.f32.mrb[39].mxu1 }
 0xe61   :  { %v7744_v34 = vld [vmem:[%s9498_s18 + $0x18] sm:$0xff]  }
 0xe73   :  { %v7029_v35 = vpop.f32.mrb[36].mxu0 }
 0xe74   :  { %v7030_v36 = vpop.f32.mrb[37].mxu0 }
 0xe75   :  { %v7031_v37 = vadd.f32 %v7030_v36, %v7029_v35  ;;  %v7032_v24 = vpop.f32.mrb[38].mxu0  ;;  %v7745_v35 = vld [vmem:[%s9498_s18 + $0x60] sm:$0xff]  }
 0xe76   :  { %v7033_v38 = vpop.f32.mrb[39].mxu0  ;;  %v7747_v36 = vld [vmem:[%s9498_s18 + $0x20] sm:$0xff]  }
 0xe77   :  { %v3427_v39 = vadd.f32 %v7031_v37, %v6636_v21  ;;  %v7034_v40 = vadd.f32 %v7033_v38, %v7032_v24  ;;  %v7748_v37 = vld [vmem:[%s9498_s18 + $0x68] sm:$0xff]  }
 0xe78   :  { %v7749_v24 = vld [vmem:[%s9498_s18 + $0xa8] sm:$0xff]  }
 0xe79   :  { %v3468_v41 = vadd.f32 %v3467_v31, %v3427_v39  ;;  %v3430_v25 = vadd.f32 %v7034_v40, %v6636_v21  ;;  %v7741_v31 = vld [vmem:[%s9498_s18 + $0x10] sm:$0xff]   ;;  %v7746_v21 = vld [vmem:[%s9498_s18 + $0xa0] sm:$0xff]   ;;  %v7750_v38 = vld [vmem:[%s9498_s18 + $0x28] sm:$0xff]  }
 0xe7a   :  { %v7751_v39 = vld [vmem:[%s9498_s18 + $0x70] sm:$0xff]  }
 0xe7b   :  { %v3474_v42 = vmax.f32 %v3468_v41, 0.0  ;;  %v3471_v43 = vadd.f32 %v3470_v33, %v3430_v25  ;;  %v7743_v33 = vld [vmem:[%s9498_s18 + $0x98] sm:$0xff]   ;;  %v7752_v40 = vld [vmem:[%s9498_s18 + $0xb0] sm:$0xff]  }
 0xe7c   :  { %v7753_v41 = vld [vmem:[%s9498_s18 + $0x30] sm:$0xff]   ;;  %v7754_v25 = vld [vmem:[%s9498_s18 + $0x78] sm:$0xff]  }
 0xe7d   :  { %v3490_v44 = vrot.slane %v3474_v42, 1  ;;  %v3475_v46 = vmax.f32 %v3471_v43, 0.0  ;;  %v3481_v47 = vrot.slane %v3474_v42, 6  ;;  %v3477_v48 = vrot.slane %v3474_v42, 7  ;;  %v7756_v43 = vld [vmem:[%s9498_s18 + $0x38] sm:$0xff]  }
 0xe7f   :  { %v3482_v49 = vrot.slane %v3475_v46, 6  ;;  %v3493_v50 = vsel %vm551_vm6, %v3475_v46, 0.0  ;;  %v3498_v52 = vpack.c.bf16 %v3475_v46, %v3474_v42  ;;  %v3492_v54 = vsel %vm551_vm6, %v3490_v44, 0.0  ;;  %v7755_v42 = vld [vmem:[%s9498_s18 + $0xb8] sm:$0xff]  }
 0xe80   :  { %v3495_v51 = vrot.slane %v3493_v50, 1  ;;  %v3479_v59 = vsel %vm565_vm7, 0.0, %v3477_v48 }
 0xe81   :  { %v3483_v53 = vsel %vm516_vm4, %v3481_v47, %v3482_v49 }
 0xe82   :  { %v3497_v55 = vsel %vm498_vm5, %v3492_v54, %v3495_v51  ;;  %v3485_v56 = vsel %vm565_vm7, 0.0, %v3483_v53 }
 0xe83   :  { %v3794_v57 = vpack.c.bf16 %v3495_v51, %v3497_v55  ;;  %v3487_v58 = vrot.slane %v3485_v56, 1  ;;  %v3948_v55 = vld [vmem:[#allocation23] sm:$0x7] }
 0xe84   :  { %v3953_v56 = vrot.slane %v3948_v55, %v8867_v5 }
 0xe85   :  { %v3489_v61 = vsel %vm498_vm5, %v3479_v59, %v3487_v58 }
 0xe86   :  { %v3511_v0 = vpack.c.bf16 %v3487_v58, %v3489_v61 }
 0xe88   :  { %6670 = vmatmul.mubr.msk.bf16.vlgmr.msra.gmra.mrb[40].mxu0 %vm2784_vm12, %v3511_v0  ;;  %7352 = vmatmul.mubr.msk.bf16.vlgmr.msra.gmra.mrb[40].mxu1 %vm2784_vm12, %v3511_v0 }
 0xe89   :  { %7356 = vmatpush3.bf16.msra.mxu1 %v7712_v63  ;;  %3711 = vmatpush1.bf16.msra.mxu0 %v7709_v62 }
 0xe8a   :  { %7357 = vmatprep.subr.bf16.mxu1 %v8418_v60  ;;  %3712 = vmatprep.subr.bf16.mxu0 %v7715_v1 }
 0xe8b   :  { %7361 = vmatprep.mubr.msk.bf16.mxu1 %vm8419_vm11, %v8418_v60  ;;  %3742 = vmatprep.mubr.bf16.mxu0 %v8417_v12 }
 0xe8d   :  { %7358 = vmatpush3.bf16.msra.mxu1 %v7716_v3  ;;  %3713 = vmatpush1.bf16.msra.mxu0 %v7713_v2 }
 0xe8e   :  { %7359 = vmatprep.subr.bf16.mxu1 %v8418_v60  ;;  %3714 = vmatprep.subr.bf16.mxu0 %v7719_v6 }
 0xe91   :  { %7360 = vmatpush3.bf16.msra.mxu1 %v7720_v9  ;;  %3715 = vmatpush1.bf16.msra.mxu0 %v7717_v8 }
 0xe92   :  { %7365 = vmatprep.subr.bf16.mxu1 %v8418_v60  ;;  %3858 = vmatprep.subr.bf16.mxu0 %v7723_v10 }
 0xe94   :  { %7362 = vmatmul.mubr.msk.bf16.vlgmr.msra.gmra.mrb[44].mxu1 %vm2784_vm12, %v3498_v52  ;;  %6681 = vmatmul.mubr.msk.bf16.vlgmr.msra.gmra.mrb[40].mxu0 %vm2784_vm12, %v3498_v52 }
 0xe95   :  { %7366 = vmatpush3.bf16.msra.mxu1 %v7724_v13  ;;  %3859 = vmatpush1.bf16.msra.mxu0 %v7721_v11 }
 0xe96   :  { %7367 = vmatprep.subr.bf16.mxu1 %v8418_v60  ;;  %3860 = vmatprep.subr.bf16.mxu0 %v7727_v14 }
 0xe97   :  { %7371 = vmatprep.mubr.msk.bf16.mxu1 %vm8419_vm11, %v8418_v60  ;;  %3890 = vmatprep.mubr.bf16.mxu0 %v8417_v12 }
 0xe99   :  { %7368 = vmatpush3.bf16.msra.mxu1 %v7728_v16  ;;  %3861 = vmatpush1.bf16.msra.mxu0 %v7725_v15 }
 0xe9a   :  { %7369 = vmatprep.subr.bf16.mxu1 %v8418_v60  ;;  %3862 = vmatprep.subr.bf16.mxu0 %v7731_v17 }
 0xe9d   :  { %7370 = vmatpush3.bf16.msra.mxu1 %v7732_v19  ;;  %3863 = vmatpush1.bf16.msra.mxu0 %v7729_v18 }
 0xe9e   :  { %7375 = vmatprep.subr.bf16.mxu1 %v8418_v60  ;;  %7056 = vmatprep.subr.bf16.mxu0 %v7733_v20 }
 0xea0   :  { %7372 = vmatmul.mubr.msk.bf16.vlgmr.msra.gmra.mrb[48].mxu1 %vm2784_vm12, %v3794_v57  ;;  %6692 = vmatmul.mubr.msk.bf16.vlgmr.msra.gmra.mrb[40].mxu0 %vm2784_vm12, %v3794_v57  ;;  %v3961_v57 = vrot.slane %v3948_v55, %v9065_v45 }
 0xea1   :  { %7391 = vmatprep.mubr.msk.bf16.mxu1 %vm8419_vm11, %v8418_v60  ;;  %7376 = vmatpush3.bf16.msra.mxu1 %v7734_v22 }
 0xea2   :  { %7057 = vmatpush3.bf16.msra.mxu0 %v7735_v23  ;;  %7377 = vmatprep.subr.bf16.mxu1 %v8418_v60 }
 0xea3   :  { %7058 = vmatprep.subr.bf16.mxu0 %v7736_v26 }
 0xea5   :  { %7378 = vmatpush3.bf16.msra.mxu1 %v7737_v27  ;;  %v7759_v27 = vld [vmem:[%s9499_s17 + $0x84] ss:$16 sps:$4 sm:$0xff]  }
 0xea6   :  { %7059 = vmatpush3.bf16.msra.mxu0 %v7738_v28  ;;  %7379 = vmatprep.subr.bf16.mxu1 %v8418_v60  ;;  %v7762_v28 = vld [vmem:[%s9499_s17 + $0x8c] ss:$16 sps:$4 sm:$0xff]  }
 0xea7   :  { %7060 = vmatprep.subr.bf16.mxu0 %v7739_v29  ;;  %v7757_v29 = vld [vmem:[%s9499_s17 + $0x80] ss:$16 sps:$4 sm:$0xff]  }
 0xea9   :  { %7380 = vmatpush3.bf16.msra.mxu1 %v7740_v30  ;;  %v7760_v30 = vld [vmem:[%s9499_s17 + $0x88] ss:$16 sps:$4 sm:$0xff]  }
 0xeaa   :  { %7061 = vmatpush3.bf16.msra.mxu0 %v7741_v31  ;;  %7381 = vmatprep.subr.bf16.mxu1 %v8418_v60  ;;  %v7765_v31 = vld [vmem:[%s9499_s17 + $0xa4] ss:$16 sps:$4 sm:$0xff]  }
 0xeab   :  { %7062 = vmatprep.subr.bf16.mxu0 %v7742_v32  ;;  %v7768_v32 = vld [vmem:[%s9499_s17 + $0xac] ss:$16 sps:$4 sm:$0xff]  }
 0xead   :  { %7382 = vmatpush3.bf16.msra.mxu1 %v7743_v33  ;;  %v7763_v33 = vld [vmem:[%s9499_s17 + $0xa0] ss:$16 sps:$4 sm:$0xff]  }
 0xeae   :  { %7063 = vmatpush3.bf16.msra.mxu0 %v7744_v34  ;;  %7383 = vmatprep.subr.bf16.mxu1 %v8418_v60  ;;  %v7766_v34 = vld [vmem:[%s9499_s17 + $0xa8] ss:$16 sps:$4 sm:$0xff]  }
 0xeaf   :  { %7064 = vmatprep.subr.bf16.mxu0 %v7745_v35  ;;  %v7771_v35 = vld [vmem:[%s9499_s17 + $0xc4] ss:$16 sps:$4 sm:$0xff]  }
 0xeb1   :  { %7384 = vmatpush3.bf16.msra.mxu1 %v7746_v21  ;;  %v7774_v21 = vld [vmem:[%s9499_s17 + $0xcc] ss:$16 sps:$4 sm:$0xff]  }
 0xeb2   :  { %7065 = vmatpush3.bf16.msra.mxu0 %v7747_v36  ;;  %7385 = vmatprep.subr.bf16.mxu1 %v8418_v60  ;;  %v7769_v36 = vld [vmem:[%s9499_s17 + $0xc0] ss:$16 sps:$4 sm:$0xff]  }
 0xeb3   :  { %7066 = vmatprep.subr.bf16.mxu0 %v7748_v37  ;;  %v7772_v37 = vld [vmem:[%s9499_s17 + $0xc8] ss:$16 sps:$4 sm:$0xff]  }
 0xeb5   :  { %7386 = vmatpush3.bf16.msra.mxu1 %v7749_v24  ;;  %v7775_v24 = vld [vmem:[%s9499_s17 + $0xe0] ss:$16 sps:$4 sm:$0xff]  }
 0xeb6   :  { %7067 = vmatpush3.bf16.msra.mxu0 %v7750_v38  ;;  %7387 = vmatprep.subr.bf16.mxu1 %v8418_v60  ;;  %v7777_v38 = vld [vmem:[%s9499_s17 + $0xe4] ss:$16 sps:$4 sm:$0xff]  }
 0xeb7   :  { %7068 = vmatprep.subr.bf16.mxu0 %v7751_v39  ;;  %v7778_v39 = vld [vmem:[%s9499_s17 + $0xe8] ss:$16 sps:$4 sm:$0xff]  }
 0xeb9   :  { %7388 = vmatpush3.bf16.msra.mxu1 %v7752_v40  ;;  %v7780_v40 = vld [vmem:[%s9499_s17 + $0xec] ss:$16 sps:$4 sm:$0xff]  }
 0xeba   :  { %7069 = vmatpush3.bf16.msra.mxu0 %v7753_v41  ;;  %7389 = vmatprep.subr.bf16.mxu1 %v8418_v60  ;;  %v3957_v60 = vrot.slane %v3948_v55, %v8870_v7  ;;  %v7783_v41 = vld [vmem:[%s9499_s17 + $0x4] ss:$16 sps:$4 sm:$0xff]  }
 0xebb   :  { %7070 = vmatprep.subr.bf16.mxu0 %v7754_v25  ;;  %v7786_v25 = vld [vmem:[%s9499_s17 + $0xc] ss:$16 sps:$4 sm:$0xff]  }
 0xebd   :  { %7390 = vmatpush3.bf16.msra.mxu1 %v7755_v42 }
 0xebe   :  { %7071 = vmatpush3.bf16.msra.mxu0 %v7756_v43  ;;  %4446 = vmatprep.subr.bf16.mxu1 %v7762_v28  ;;  %v7796_v28 = vld [vmem:[%s9499_s17 + $0x48] ss:$16 sps:$4 sm:$0xff]  }
 0xebf   :  { %4403 = vmatprep.subr.bf16.mxu0 %v7759_v27  ;;  %v7793_v27 = vld [vmem:[%s9499_s17 + $0x40] ss:$16 sps:$4 sm:$0xff]  }
 0xf5b   :  { %v3652_v44 = vpop.f32.mrb[40].mxu1 }
 0xf5c   :  { %v7353_v46 = vpop.f32.mrb[41].mxu1 }
 0xf5d   :  { %v3655_v47 = vpop.f32.mrb[42].mxu1  ;;  %v6694_v46 = vld [vmem:[%s9500_s22] ss:$0 sm:$0xff] }
 0xf5e   :  { %v7354_v49 = vpop.f32.mrb[43].mxu1 }
 0xf67   :  { %v3787_v50 = vpop.f32.mrb[44].mxu1 }
 0xf68   :  { %v3788_v48 = vadd.f32 %v3787_v50, %v3652_v44  ;;  %v7363_v51 = vpop.f32.mrb[45].mxu1 }
 0xf69   :  { %v3790_v52 = vpop.f32.mrb[46].mxu1 }
 0xf6a   :  { %v3791_v53 = vadd.f32 %v3790_v52, %v3655_v47  ;;  %v7364_v54 = vpop.f32.mrb[47].mxu1 }
 0xf73   :  { %v3935_v58 = vpop.f32.mrb[48].mxu1  ;;  %v3892_v59 = vpop.f32.mrb[40].mxu0 }
 0xf74   :  { %v3944_v61 = vadd.f32 %v3935_v58, %v3788_v48  ;;  %v3965_v62 = vadd.f32 %v3953_v56, %v3892_v59  ;;  %v7373_v63 = vpop.f32.mrb[49].mxu1  ;;  %v3894_v0 = vpop.f32.mrb[41].mxu0 }
 0xf75   :  { %v3966_v1 = vadd.f32 %v3957_v60, %v3894_v0  ;;  %v3938_v2 = vpop.f32.mrb[50].mxu1  ;;  %v3896_v3 = vpop.f32.mrb[42].mxu0 }
 0xf76   :  { %v3967_v6 = vadd.f32 %v3961_v57, %v3944_v61  ;;  %v3947_v8 = vadd.f32 %v3938_v2, %v3791_v53  ;;  %v3968_v9 = vadd.f32 %v3953_v56, %v3896_v3  ;;  %v7374_v10 = vpop.f32.mrb[51].mxu1  ;;  %v3898_v11 = vpop.f32.mrb[43].mxu0  ;;  %v3971_v14 = vmax.f32 %v3965_v62, 0.0 }
 0xf77   :  { %v3969_v13 = vadd.f32 %v3957_v60, %v3898_v11  ;;  %v3972_v17 = vmax.f32 %v3966_v1, 0.0 }
 0xf78   :  { %v3970_v15 = vadd.f32 %v3961_v57, %v3947_v8  ;;  %v3974_v16 = vmax.f32 %v3968_v9, 0.0  ;;  %v3973_v19 = vmax.f32 %v3967_v6, 0.0 }
 0xf79   :  { %v3975_v18 = vmax.f32 %v3969_v13, 0.0 }
 0xf7a   :  { %v3976_v20 = vmax.f32 %v3970_v15, 0.0  ;;  %v3977_v22 = vpack.c.bf16 %v3974_v16, %v3971_v14  ;;  %v7781_v14 = vld [vmem:[%s9499_s17] ss:$16 sps:$4 sm:$0xff]   ;;  %v7784_v15 = vld [vmem:[%s9499_s17 + $0x8] ss:$16 sps:$4 sm:$0xff]  }
 0xf7b   :  { %v3978_v23 = vpack.c.bf16 %v3975_v18, %v3972_v17  ;;  %v7789_v18 = vld [vmem:[%s9499_s17 + $0x24] ss:$16 sps:$4 sm:$0xff]  }
 0xf7c   :  { %v3979_v26 = vpack.c.bf16 %v3976_v20, %v3973_v19  ;;  %v7792_v19 = vld [vmem:[%s9499_s17 + $0x2c] ss:$16 sps:$4 sm:$0xff]   ;;  %v7787_v20 = vld [vmem:[%s9499_s17 + $0x20] ss:$16 sps:$4 sm:$0xff]  }
 0xf7d   :  { %4211 = vmatprep.mubr.bf16.mxu0 %v3978_v23  ;;  %v7795_v23 = vld [vmem:[%s9499_s17 + $0x44] ss:$16 sps:$4 sm:$0xff]  }
 0xf7e   :  { %7392 = vmatmul.mubr.bf16.vlgmr.msra.gmra.mrb[52].mxu1 %v3979_v26  ;;  %4212 = vmatmul.mubr.bf16.vlgmr.msra.gmra.mrb[44].mxu0 %v3977_v22  ;;  %v7790_v22 = vld [vmem:[%s9499_s17 + $0x28] ss:$16 sps:$4 sm:$0xff]   ;;  %v7798_v26 = vld [vmem:[%s9499_s17 + $0x4c] ss:$16 sps:$4 sm:$0xff]  }
 0xf7f   :  { %4435 = vmatprep.mubr.bf16.mxu0 %v8417_v12  ;;  %4478 = vmatprep.mubr.bf16.mxu1 %v8417_v12 }
 0xf80   :  { %4404 = vmatpush1.bf16.msra.mxu0 %v7757_v29  ;;  %4447 = vmatpush1.bf16.msra.mxu1 %v7760_v30  ;;  %v7801_v29 = vld [vmem:[%s9499_s17 + $0x64] ss:$16 sps:$4 sm:$0xff]   ;;  %v7804_v30 = vld [vmem:[%s9499_s17 + $0x6c] ss:$16 sps:$4 sm:$0xff]  }
 0xf81   :  { %4405 = vmatprep.subr.bf16.mxu0 %v7765_v31  ;;  %4448 = vmatprep.subr.bf16.mxu1 %v7768_v32  ;;  %v7799_v31 = vld [vmem:[%s9499_s17 + $0x60] ss:$16 sps:$4 sm:$0xff]   ;;  %v7802_v32 = vld [vmem:[%s9499_s17 + $0x68] ss:$16 sps:$4 sm:$0xff]  }
 0xf84   :  { %4406 = vmatpush1.bf16.msra.mxu0 %v7763_v33  ;;  %4449 = vmatpush1.bf16.msra.mxu1 %v7766_v34  ;;  %v7807_v33 = vld [vmem:[%s9499_s17 + $0x104] ss:$16 sps:$4 sm:$0xff]   ;;  %v7810_v34 = vld [vmem:[%s9499_s17 + $0x10c] ss:$16 sps:$4 sm:$0xff]  }
 0xf85   :  { %4407 = vmatprep.subr.bf16.mxu0 %v7771_v35  ;;  %4450 = vmatprep.subr.bf16.mxu1 %v7774_v21  ;;  %v7805_v35 = vld [vmem:[%s9499_s17 + $0x100] ss:$16 sps:$4 sm:$0xff]   ;;  %v7808_v21 = vld [vmem:[%s9499_s17 + $0x108] ss:$16 sps:$4 sm:$0xff]  }
 0xf88   :  { %4408 = vmatpush1.bf16.msra.mxu0 %v7769_v36  ;;  %4451 = vmatpush1.bf16.msra.mxu1 %v7772_v37  ;;  %v7813_v36 = vld [vmem:[%s9499_s17 + $0x124] ss:$16 sps:$4 sm:$0xff]   ;;  %v7816_v37 = vld [vmem:[%s9499_s17 + $0x12c] ss:$16 sps:$4 sm:$0xff]  }
 0xf89   :  { %4409 = vmatprep.subr.bf16.mxu0 %v7777_v38  ;;  %4452 = vmatprep.subr.bf16.mxu1 %v7780_v40  ;;  %v7814_v38 = vld [vmem:[%s9499_s17 + $0x128] ss:$16 sps:$4 sm:$0xff]   ;;  %v7822_v40 = vld [vmem:[%s9499_s17 + $0x14c] ss:$16 sps:$4 sm:$0xff]  }
 0xf8c   :  { %4410 = vmatpush1.bf16.msra.mxu0 %v7775_v24  ;;  %4453 = vmatpush1.bf16.msra.mxu1 %v7778_v39  ;;  %v7811_v24 = vld [vmem:[%s9499_s17 + $0x120] ss:$16 sps:$4 sm:$0xff]   ;;  %v7819_v39 = vld [vmem:[%s9499_s17 + $0x144] ss:$16 sps:$4 sm:$0xff]  }
 0xf8d   :  { %4572 = vmatprep.subr.bf16.mxu0 %v7783_v41  ;;  %4615 = vmatprep.subr.bf16.mxu1 %v7786_v25  ;;  %v7817_v41 = vld [vmem:[%s9499_s17 + $0x140] ss:$16 sps:$4 sm:$0xff]   ;;  %v7820_v25 = vld [vmem:[%s9499_s17 + $0x148] ss:$16 sps:$4 sm:$0xff]  }
0x1051   :  { %v4254_v42 = vpop.f32.mrb[52].mxu1  ;;  %v7072_v43 = vpop.f32.mrb[44].mxu0 }
0x1052   :  { %v7393_v44 = vpop.f32.mrb[53].mxu1  ;;  %v7073_v47 = vpop.f32.mrb[45].mxu0 }
0x1053   :  { %v7074_v49 = vadd.f32 %v7073_v47, %v7072_v43  ;;  %v4257_v50 = vpop.f32.mrb[54].mxu1  ;;  %v7075_v48 = vpop.f32.mrb[46].mxu0  ;;  %v7828_v43 = vld [vmem:[%s9499_s17 + $0x16c] ss:$16 sps:$4 sm:$0xff]   ;;  %v7823_v44 = vld [vmem:[%s9499_s17 + $0x160] ss:$16 sps:$4 sm:$0xff]  }
0x1054   :  { %v7394_v51 = vpop.f32.mrb[55].mxu1  ;;  %v7076_v52 = vpop.f32.mrb[47].mxu0  ;;  %v4852_v47 = vld [vmem:[#allocation25] sm:$0xf] }
0x1055   :  { %v4214_v53 = vadd.f32 %v7074_v49, %v6694_v46  ;;  %v7077_v54 = vadd.f32 %v7076_v52, %v7075_v48  ;;  %v4868_v49 = vsub.s32 3, %v8864_v4  ;;  %v4865_v48 = vrot.slane %v4852_v47, %v9065_v45 }
0x1056   :  { %v4861_v51 = vrot.slane %v4852_v47, %v8870_v7 }
0x1057   :  { %v4255_v55 = vadd.f32 %v4254_v42, %v4214_v53  ;;  %v4217_v56 = vadd.f32 %v7077_v54, %v6694_v46  ;;  %v7825_v42 = vld [vmem:[%s9499_s17 + $0x164] ss:$16 sps:$4 sm:$0xff]   ;;  %v7826_v46 = vld [vmem:[%s9499_s17 + $0x168] ss:$16 sps:$4 sm:$0xff]   ;;  %v4869_v52 = vrot.slane %v4852_v47, %v4868_v49 }
0x1059   :  { %v4261_v60 = vmax.f32 %v4255_v55, 0.0  ;;  %v4258_v57 = vadd.f32 %v4257_v50, %v4217_v56  ;;  %v4857_v50 = vrot.slane %v4852_v47, %v8867_v5 }
0x105b   :  { %v4277_v58 = vrot.slane %v4261_v60, 1  ;;  %v4262_v59 = vmax.f32 %v4258_v57, 0.0  ;;  %v4268_v61 = vrot.slane %v4261_v60, 6  ;;  %v4264_v0 = vrot.slane %v4261_v60, 7 }
0x105d   :  { %v4269_v62 = vrot.slane %v4262_v59, 6  ;;  %v4280_v63 = vsel %vm551_vm6, %v4262_v59, 0.0  ;;  %v4285_v2 = vpack.c.bf16 %v4262_v59, %v4261_v60  ;;  %v4279_v6 = vsel %vm551_vm6, %v4277_v58, 0.0 }
0x105e   :  { %v4282_v1 = vrot.slane %v4280_v63, 1  ;;  %v4266_v13 = vsel %vm565_vm7, 0.0, %v4264_v0 }
0x105f   :  { %v4270_v3 = vsel %vm516_vm4, %v4268_v61, %v4269_v62 }
0x1060   :  { %v4284_v8 = vsel %vm498_vm5, %v4279_v6, %v4282_v1  ;;  %v4272_v9 = vsel %vm565_vm7, 0.0, %v4270_v3 }
0x1061   :  { %v9190_v10 = vpack.c.bf16 %v4282_v1, %v4284_v8  ;;  %v4274_v11 = vrot.slane %v4272_v9, 1 }
0x1063   :  { %v4276_v16 = vsel %vm498_vm5, %v4266_v13, %v4274_v11 }
0x1064   :  { %v4302_v17 = vpack.c.bf16 %v4274_v11, %v4276_v16 }
0x1066   :  { %6735 = vmatmul.mubr.msk.bf16.vlgmr.msra.gmra.mrb[48].mxu0 %vm4399_vm13, %v4302_v17  ;;  %6736 = vmatmul.mubr.msk.bf16.vlgmr.msra.gmra.mrb[56].mxu1 %vm4399_vm13, %v4302_v17 }
0x1067   :  { %4573 = vmatpush1.bf16.msra.mxu0 %v7781_v14  ;;  %4616 = vmatpush1.bf16.msra.mxu1 %v7784_v15 }
0x1068   :  { %4574 = vmatprep.subr.bf16.mxu0 %v7789_v18  ;;  %4617 = vmatprep.subr.bf16.mxu1 %v7792_v19 }
0x1069   :  { %4604 = vmatprep.mubr.bf16.mxu0 %v8417_v12  ;;  %4647 = vmatprep.mubr.bf16.mxu1 %v8417_v12 }
0x106b   :  { %4575 = vmatpush1.bf16.msra.mxu0 %v7787_v20  ;;  %4618 = vmatpush1.bf16.msra.mxu1 %v7790_v22 }
0x106c   :  { %4576 = vmatprep.subr.bf16.mxu0 %v7795_v23  ;;  %4619 = vmatprep.subr.bf16.mxu1 %v7798_v26 }
0x106f   :  { %4577 = vmatpush1.bf16.msra.mxu0 %v7793_v27  ;;  %4620 = vmatpush1.bf16.msra.mxu1 %v7796_v28 }
0x1070   :  { %4578 = vmatprep.subr.bf16.mxu0 %v7801_v29  ;;  %4621 = vmatprep.subr.bf16.mxu1 %v7804_v30 }
0x1073   :  { %4579 = vmatpush1.bf16.msra.mxu0 %v7799_v31  ;;  %4622 = vmatpush1.bf16.msra.mxu1 %v7802_v32 }
0x1074   :  { %4758 = vmatprep.subr.bf16.mxu0 %v7807_v33  ;;  %4801 = vmatprep.subr.bf16.mxu1 %v7810_v34 }
0x1076   :  { %6753 = vmatmul.mubr.msk.bf16.vlgmr.msra.gmra.mrb[48].mxu0 %vm4399_vm13, %v4285_v2  ;;  %6754 = vmatmul.mubr.msk.bf16.vlgmr.msra.gmra.mrb[56].mxu1 %vm4399_vm13, %v4285_v2 }
0x1077   :  { %4759 = vmatpush1.bf16.msra.mxu0 %v7805_v35  ;;  %4802 = vmatpush1.bf16.msra.mxu1 %v7808_v21 }
0x1078   :  { %4760 = vmatprep.subr.bf16.mxu0 %v7813_v36  ;;  %4803 = vmatprep.subr.bf16.mxu1 %v7816_v37 }
0x1079   :  { %4790 = vmatprep.mubr.bf16.mxu0 %v8417_v12  ;;  %4833 = vmatprep.mubr.bf16.mxu1 %v8417_v12 }
0x107b   :  { %4761 = vmatpush1.bf16.msra.mxu0 %v7811_v24  ;;  %4804 = vmatpush1.bf16.msra.mxu1 %v7814_v38 }
0x107c   :  { %4762 = vmatprep.subr.bf16.mxu0 %v7819_v39  ;;  %4805 = vmatprep.subr.bf16.mxu1 %v7822_v40 }
0x107f   :  { %4763 = vmatpush1.bf16.msra.mxu0 %v7817_v41  ;;  %4806 = vmatpush1.bf16.msra.mxu1 %v7820_v25 }
0x1080   :  { %4764 = vmatprep.subr.bf16.mxu0 %v7825_v42  ;;  %4807 = vmatprep.subr.bf16.mxu1 %v7828_v43 }
0x1083   :  { %4765 = vmatpush1.bf16.msra.mxu0 %v7823_v44  ;;  %4808 = vmatpush1.bf16.msra.mxu1 %v7826_v46 }
0x1086   :  { %6771 = vmatmul.mubr.msk.bf16.vlgmr.msra.gmra.mrb[48].mxu0 %vm4399_vm13, %v9190_v10  ;;  %6772 = vmatmul.mubr.msk.bf16.vlgmr.msra.gmra.mrb[56].mxu1 %vm4399_vm13, %v9190_v10 }
0x1087   :  { %5039 = vmatprep.mubr.bf16.mxu0 %v8417_v12  ;;  %5080 = vmatprep.mubr.bf16.mxu1 %v8417_v12 }
0x1159   :  { %v4792_v53 = vpop.f32.mrb[48].mxu0  ;;  %v4835_v54 = vpop.f32.mrb[56].mxu1 }
0x115a   :  { %v4874_v55 = vadd.f32 %v4857_v50, %v4792_v53  ;;  %v4876_v56 = vadd.f32 %v4865_v48, %v4835_v54  ;;  %v4794_v60 = vpop.f32.mrb[49].mxu0  ;;  %v4837_v57 = vpop.f32.mrb[57].mxu1 }
0x115b   :  { %v4875_v58 = vadd.f32 %v4861_v51, %v4794_v60  ;;  %v4877_v59 = vadd.f32 %v4869_v52, %v4837_v57  ;;  %v4796_v61 = vpop.f32.mrb[50].mxu0  ;;  %v4839_v62 = vpop.f32.mrb[58].mxu1 }
0x115c   :  { %v9244_v63 = vmax.f32 %v4874_v55, 0.0  ;;  %v9246_v0 = vmax.f32 %v4876_v56, 0.0  ;;  %v4878_v1 = vadd.f32 %v4857_v50, %v4796_v61  ;;  %v4880_v2 = vadd.f32 %v4865_v48, %v4839_v62  ;;  %v4798_v3 = vpop.f32.mrb[51].mxu0  ;;  %v4841_v6 = vpop.f32.mrb[59].mxu1 }
0x115d   :  { %v4883_v8 = vmax.f32 %v4875_v58, 0.0  ;;  %v9248_v9 = vmax.f32 %v4877_v59, 0.0  ;;  %v4879_v10 = vadd.f32 %v4861_v51, %v4798_v3  ;;  %v4881_v11 = vadd.f32 %v4869_v52, %v4841_v6 }
0x115e   :  { %v4894_v13 = vrot.slane %v9244_v63, 1  ;;  %v4934_v14 = vrot.slane %v9244_v63, 2  ;;  %v4896_v15 = vrot.slane %v9246_v0, 1  ;;  %v4936_v16 = vrot.slane %v9246_v0, 2 }
0x115f   :  { %v4895_v17 = vrot.slane %v4883_v8, 1  ;;  %v4935_v18 = vrot.slane %v4883_v8, 2  ;;  %v4897_v19 = vrot.slane %v9248_v9, 1  ;;  %v4937_v20 = vrot.slane %v9248_v9, 2 }
0x1160   :  { %v4902_v22 = vsel %vm551_vm6, %v4894_v13, 0.0  ;;  %v4942_v23 = vsel %vm529_vm8, %v4934_v14, 0.0  ;;  %v4904_v26 = vsel %vm551_vm6, %v4896_v15, 0.0  ;;  %v4944_v27 = vsel %vm529_vm8, %v4936_v16, 0.0 }
0x1161   :  { %v4886_v28 = vmax.f32 %v4878_v1, 0.0  ;;  %v4888_v29 = vmax.f32 %v4880_v2, 0.0  ;;  %v4887_v30 = vmax.f32 %v4879_v10, 0.0  ;;  %v4889_v31 = vmax.f32 %v4881_v11, 0.0 }
0x1162   :  { %v4903_v32 = vsel %vm551_vm6, %v4895_v17, 0.0  ;;  %v4943_v33 = vsel %vm529_vm8, %v4935_v18, 0.0  ;;  %v4905_v34 = vsel %vm551_vm6, %v4897_v19, 0.0  ;;  %v4945_v35 = vsel %vm529_vm8, %v4937_v20, 0.0 }
0x1163   :  { %v4906_v21 = vsel %vm551_vm6, %v4886_v28, 0.0  ;;  %v4950_v36 = vrot.slane %v4886_v28, 1  ;;  %v4908_v37 = vsel %vm551_vm6, %v4888_v29, 0.0  ;;  %v4952_v24 = vrot.slane %v4888_v29, 1 }
0x1164   :  { %v4914_v38 = vrot.slane %v4906_v21, 1  ;;  %v4916_v39 = vrot.slane %v4908_v37, 1  ;;  %v4907_v40 = vsel %vm551_vm6, %v4887_v30, 0.0  ;;  %v4951_v41 = vrot.slane %v4887_v30, 1  ;;  %v7837_v21 = vld [vmem:[%s9501_s4 + $0x50] sm:$0xff]  }
0x1165   :  { %v4958_v25 = vsel %vm529_vm8, %v4950_v36, 0.0  ;;  %v4960_v42 = vsel %vm529_vm8, %v4952_v24, 0.0  ;;  %v4915_v43 = vrot.slane %v4907_v40, 1  ;;  %v4909_v44 = vsel %vm551_vm6, %v4889_v31, 0.0  ;;  %v7836_v36 = vld [vmem:[%s9501_s4 + $0x88] sm:$0xff]   ;;  %v7839_v37 = vld [vmem:[%s9501_s4 + $0xd0] sm:$0xff]  }
0x1166   :  { %v4922_v46 = vsel %vm498_vm5, %v4902_v22, %v4914_v38  ;;  %v4930_v47 = vmax.f32 %v4886_v28, %v4914_v38  ;;  %v4966_v50 = vrot.slane %v4958_v25, 1  ;;  %v4924_v48 = vsel %vm498_vm5, %v4904_v26, %v4916_v39  ;;  %v7831_v28 = vld [vmem:[%s9501_s4 + $0xc0] sm:$0xff]   ;;  %v7838_v24 = vld [vmem:[%s9501_s4 + $0x10] sm:$0xff]   ;;  %v7841_v38 = vld [vmem:[%s9501_s4 + $0x58] sm:$0xff]  }
0x1167   :  { %v4932_v51 = vmax.f32 %v4888_v29, %v4916_v39  ;;  %v4968_v52 = vrot.slane %v4960_v42, 1  ;;  %v4923_v53 = vsel %vm498_vm5, %v4903_v32, %v4915_v43  ;;  %v4931_v54 = vmax.f32 %v4887_v30, %v4915_v43  ;;  %v4986_v30 = vld [vmem:[%s9502_s3] sm:$0x7]  ;;  %v7833_v32 = vld [vmem:[%s9501_s4 + $0x48] sm:$0xff]   ;;  %v7840_v39 = vld [vmem:[%s9501_s4 + $0x90] sm:$0xff]  }
0x1168   :  { %v4927_v55 = vmax.f32 %v4883_v8, %v4923_v53  ;;  %v4959_v56 = vsel %vm529_vm8, %v4951_v41, 0.0  ;;  %v4917_v60 = vrot.slane %v4909_v44, 1  ;;  %v4953_v57 = vrot.slane %v4889_v31, 1  ;;  %v7843_v40 = vld [vmem:[%s9501_s4 + $0xd8] sm:$0xff]   ;;  %v7845_v25 = vld [vmem:[%s9501_s4 + $0x60] sm:$0xff]   ;;  %v7855_v53 = vld [vmem:[%s9501_s4 + $0xf0] sm:$0xff]  }
0x1169   :  { %v4967_v58 = vrot.slane %v4959_v56, 1  ;;  %v4926_v59 = vmax.f32 %v9244_v63, %v4922_v46  ;;  %v4974_v61 = vsel %vm498_vm5, %v4942_v23, %v4966_v50  ;;  %v4982_v62 = vmax.f32 %v4930_v47, %v4966_v50  ;;  %v7842_v41 = vld [vmem:[%s9501_s4 + $0x18] sm:$0xff]   ;;  %v7847_v43 = vld [vmem:[%s9501_s4 + $0xe0] sm:$0xff]   ;;  %v7849_v46 = vld [vmem:[%s9501_s4 + $0x68] sm:$0xff]  }
0x116a   :  { %v4925_v1 = vsel %vm498_vm5, %v4905_v34, %v4917_v60  ;;  %v4933_v2 = vmax.f32 %v4889_v31, %v4917_v60  ;;  %v4961_v3 = vsel %vm529_vm8, %v4953_v57, 0.0  ;;  %v4928_v6 = vmax.f32 %v9246_v0, %v4924_v48  ;;  %v7830_v31 = vld [vmem:[%s9501_s4] sm:$0xff]   ;;  %v7835_v34 = vld [vmem:[%s9501_s4 + $0xc8] sm:$0xff]   ;;  %v7844_v42 = vld [vmem:[%s9501_s4 + $0x98] sm:$0xff]  }
0x116b   :  { %v4983_v10 = vmax.f32 %v4931_v54, %v4967_v58  ;;  %v4929_v8 = vmax.f32 %v9248_v9, %v4925_v1  ;;  %v4969_v11 = vrot.slane %v4961_v3, 1  ;;  %v4975_v13 = vsel %vm498_vm5, %v4943_v33, %v4967_v58  ;;  %v7829_v9 = vld [vmem:[%s9501_s4 + $0x40] sm:$0xff]   ;;  %v7851_v50 = vld [vmem:[%s9501_s4 + $0xe8] sm:$0xff]   ;;  %v7854_v54 = vld [vmem:[%s9501_s4 + $0x30] sm:$0xff]  }
0x116c   :  { %v4979_v14 = vmax.f32 %v4927_v55, %v4975_v13  ;;  %v4978_v63 = vmax.f32 %v4926_v59, %v4974_v61  ;;  %v4976_v15 = vsel %vm498_vm5, %v4944_v27, %v4968_v52  ;;  %v4984_v16 = vmax.f32 %v4932_v51, %v4968_v52  ;;  %v7832_v33 = vld [vmem:[%s9501_s4 + $0x80] sm:$0xff]   ;;  %v7850_v48 = vld [vmem:[%s9501_s4 + $0x28] sm:$0xff]   ;;  %v7853_v51 = vld [vmem:[%s9501_s4 + $0x70] sm:$0xff]  }
0x116d   :  { %v4985_v17 = vmax.f32 %v4933_v2, %v4969_v11  ;;  %v4977_v18 = vsel %vm498_vm5, %v4945_v35, %v4969_v11  ;;  %v4980_v19 = vmax.f32 %v4928_v6, %v4976_v15  ;;  %v7834_v35 = vld [vmem:[%s9501_s4 + $0x8] sm:$0xff]   ;;  %v7846_v44 = vld [vmem:[%s9501_s4 + $0x20] sm:$0xff]   ;;  %v7856_v55 = vld [vmem:[%s9501_s4 + $0xb0] sm:$0xff]  }
0x116e   :  { %v4988_v20 = vpack.c.bf16 %v4983_v10, %v4979_v14  ;;  %v4981_v0 = vmax.f32 %v4929_v8, %v4977_v18  ;;  %v4987_v22 = vpack.c.bf16 %v4982_v62, %v4978_v63  ;;  %v7848_v47 = vld [vmem:[%s9501_s4 + $0xa0] sm:$0xff]   ;;  %v7852_v52 = vld [vmem:[%s9501_s4 + $0xa8] sm:$0xff]   ;;  %v7857_v56 = vld [vmem:[%s9501_s4 + $0x78] sm:$0xff]  }
0x116f   :  { %v4989_v23 = vpack.c.bf16 %v4984_v16, %v4980_v19  ;;  %v7859_v60 = vld [vmem:[%s9501_s4 + $0xf8] sm:$0xff]   ;;  %v7863_v63 = vld [vmem:[%s9503_s19 + $0x84] ss:$16 sps:$4 sm:$0xff]   ;;  %v7861_v16 = vld [vmem:[%s9503_s19 + $0x80] ss:$16 sps:$4 sm:$0xff]  }
0x1170   :  { %6773 = vmatprep.subr.msk.bf16.mxu0 %vm498_vm5, %v4988_v20  ;;  %v4990_v26 = vpack.c.bf16 %v4985_v17, %v4981_v0  ;;  %v4996_v27 = vsel %vm498_vm5, %v4987_v22, 0  ;;  %v7858_v57 = vld [vmem:[%s9501_s4 + $0x38] sm:$0xff]   ;;  %v7869_v18 = vld [vmem:[%s9503_s19 + $0xa4] ss:$16 sps:$4 sm:$0xff]   ;;  %v7867_v20 = vld [vmem:[%s9503_s19 + $0xa0] ss:$16 sps:$4 sm:$0xff]  }
0x1171   :  { %5008 = vmatpush1.bf16.msra.mxu0 %v4996_v27  ;;  %v5002_v29 = vsel %vm498_vm5, %v4989_v23, 0  ;;  %v7860_v58 = vld [vmem:[%s9501_s4 + $0xb8] sm:$0xff]   ;;  %v7875_v22 = vld [vmem:[%s9503_s19 + $0xc4] ss:$16 sps:$4 sm:$0xff]   ;;  %v7873_v23 = vld [vmem:[%s9503_s19 + $0xc0] ss:$16 sps:$4 sm:$0xff]  }
0x1172   :  { %6775 = vmatprep.subr.msk.bf16.mxu1 %vm498_vm5, %v4990_v26  ;;  %7087 = vmatprep.subr.bf16.mxu0 %v7829_v9  ;;  %v7866_v15 = vld [vmem:[%s9503_s19 + $0x8c] ss:$16 sps:$4 sm:$0xff]   ;;  %v7864_v17 = vld [vmem:[%s9503_s19 + $0x88] ss:$16 sps:$4 sm:$0xff]   ;;  %v7881_v27 = vld [vmem:[%s9503_s19 + $0xe4] ss:$16 sps:$4 sm:$0xff]  }
0x1173   :  { %5049 = vmatpush1.bf16.msra.mxu1 %v5002_v29  ;;  %v7872_v19 = vld [vmem:[%s9503_s19 + $0xac] ss:$16 sps:$4 sm:$0xff]   ;;  %v7870_v0 = vld [vmem:[%s9503_s19 + $0xa8] ss:$16 sps:$4 sm:$0xff]   ;;  %v7879_v29 = vld [vmem:[%s9503_s19 + $0xe0] ss:$16 sps:$4 sm:$0xff]  }
0x1174   :  { %6774 = vmatmul.mubr.msk.bf16.vlgmr.msra.gmra.mrb[52].mxu0 %vm4991_vm14, %v4986_v30  ;;  %7109 = vmatprep.subr.bf16.mxu1 %v7831_v28  ;;  %v7878_v9 = vld [vmem:[%s9503_s19 + $0xcc] ss:$16 sps:$4 sm:$0xff]   ;;  %v7876_v26 = vld [vmem:[%s9503_s19 + $0xc8] ss:$16 sps:$4 sm:$0xff]  }
0x1175   :  { %7088 = vmatpush3.bf16.msra.mxu0 %v7830_v31  ;;  %v7884_v28 = vld [vmem:[%s9503_s19 + $0xec] ss:$16 sps:$4 sm:$0xff]   ;;  %v7887_v31 = vld [vmem:[%s9503_s19 + $0x4] ss:$16 sps:$4 sm:$0xff]  }
0x1176   :  { %6776 = vmatmul.mubr.msk.bf16.vlgmr.msra.gmra.mrb[60].mxu1 %vm4991_vm14, %v4986_v30  ;;  %7089 = vmatprep.subr.bf16.mxu0 %v7833_v32  ;;  %v7882_v30 = vld [vmem:[%s9503_s19 + $0xe8] ss:$16 sps:$4 sm:$0xff]   ;;  %v7890_v32 = vld [vmem:[%s9503_s19 + $0xc] ss:$16 sps:$4 sm:$0xff]  }
0x1177   :  { %7110 = vmatpush3.bf16.msra.mxu1 %v7832_v33 }
0x1178   :  { %7111 = vmatprep.subr.bf16.mxu1 %v7835_v34  ;;  %v6777_v34 = vld [vmem:[%s9504_s23] ss:$0 sm:$0xff] }
0x1179   :  { %7090 = vmatpush3.bf16.msra.mxu0 %v7834_v35 }
0x117a   :  { %7091 = vmatprep.subr.bf16.mxu0 %v7837_v21 }
0x117b   :  { %7112 = vmatpush3.bf16.msra.mxu1 %v7836_v36 }
0x117c   :  { %7113 = vmatprep.subr.bf16.mxu1 %v7839_v37 }
0x117d   :  { %7092 = vmatpush3.bf16.msra.mxu0 %v7838_v24 }
0x117e   :  { %7093 = vmatprep.subr.bf16.mxu0 %v7841_v38 }
0x117f   :  { %7114 = vmatpush3.bf16.msra.mxu1 %v7840_v39 }
0x1180   :  { %7115 = vmatprep.subr.bf16.mxu1 %v7843_v40 }
0x1181   :  { %7094 = vmatpush3.bf16.msra.mxu0 %v7842_v41 }
0x1182   :  { %7095 = vmatprep.subr.bf16.mxu0 %v7845_v25 }
0x1183   :  { %7116 = vmatpush3.bf16.msra.mxu1 %v7844_v42 }
0x1184   :  { %7117 = vmatprep.subr.bf16.mxu1 %v7847_v43 }
0x1185   :  { %7096 = vmatpush3.bf16.msra.mxu0 %v7846_v44 }
0x1186   :  { %7097 = vmatprep.subr.bf16.mxu0 %v7849_v46 }
0x1187   :  { %7118 = vmatpush3.bf16.msra.mxu1 %v7848_v47 }
0x1188   :  { %7119 = vmatprep.subr.bf16.mxu1 %v7851_v50 }
0x1189   :  { %7098 = vmatpush3.bf16.msra.mxu0 %v7850_v48 }
0x118a   :  { %7099 = vmatprep.subr.bf16.mxu0 %v7853_v51  ;;  %v7885_v51 = vld [vmem:[%s9503_s19] ss:$16 sps:$4 sm:$0xff]  }
0x118b   :  { %7120 = vmatpush3.bf16.msra.mxu1 %v7852_v52  ;;  %v7888_v52 = vld [vmem:[%s9503_s19 + $0x8] ss:$16 sps:$4 sm:$0xff]  }
0x118c   :  { %7121 = vmatprep.subr.bf16.mxu1 %v7855_v53 }
0x118d   :  { %7100 = vmatpush3.bf16.msra.mxu0 %v7854_v54 }
0x118e   :  { %7101 = vmatprep.subr.bf16.mxu0 %v7857_v56  ;;  %v7896_v56 = vld [vmem:[%s9503_s19 + $0x2c] ss:$16 sps:$4 sm:$0xff]  }
0x118f   :  { %7122 = vmatpush3.bf16.msra.mxu1 %v7856_v55  ;;  %v7893_v55 = vld [vmem:[%s9503_s19 + $0x24] ss:$16 sps:$4 sm:$0xff]  }
0x1190   :  { %7123 = vmatprep.subr.bf16.mxu1 %v7859_v60  ;;  %v7891_v60 = vld [vmem:[%s9503_s19 + $0x20] ss:$16 sps:$4 sm:$0xff]  }
0x1191   :  { %7102 = vmatpush3.bf16.msra.mxu0 %v7858_v57  ;;  %v7894_v57 = vld [vmem:[%s9503_s19 + $0x28] ss:$16 sps:$4 sm:$0xff]  }
0x1192   :  { %5575 = vmatprep.subr.bf16.mxu0 %v7863_v63  ;;  %v7917_v63 = vld [vmem:[%s9503_s19 + $0x124] ss:$16 sps:$4 sm:$0xff]  }
0x1193   :  { %7124 = vmatpush3.bf16.msra.mxu1 %v7860_v58  ;;  %v7899_v58 = vld [vmem:[%s9503_s19 + $0x44] ss:$16 sps:$4 sm:$0xff]  }
0x1194   :  { %5616 = vmatprep.subr.bf16.mxu1 %v7866_v15  ;;  %v7920_v15 = vld [vmem:[%s9503_s19 + $0x12c] ss:$16 sps:$4 sm:$0xff]  }
0x1247   :  { %v5041_v59 = vpop.f32.mrb[52].mxu0 }
0x1248   :  { %v5043_v61 = vpop.f32.mrb[53].mxu0  ;;  %v5089_v3 = vpack.c.bf16 %v5041_v59, %v5041_v59  ;;  %v7902_v59 = vld [vmem:[%s9503_s19 + $0x4c] ss:$16 sps:$4 sm:$0xff]  }
0x1249   :  { %v5090_v62 = vpack.c.bf16 %v5043_v61, %v5043_v61  ;;  %v5082_v1 = vpop.f32.mrb[60].mxu1  ;;  %v5045_v2 = vpop.f32.mrb[54].mxu0  ;;  %v7897_v61 = vld [vmem:[%s9503_s19 + $0x40] ss:$16 sps:$4 sm:$0xff]  }
0x124a   :  { %v5091_v6 = vpack.c.bf16 %v5082_v1, %v5082_v1  ;;  %v5084_v10 = vpop.f32.mrb[61].mxu1  ;;  %v5046_v8 = vpop.f32.mrb[55].mxu0  ;;  %v7905_v1 = vld [vmem:[%s9503_s19 + $0x64] ss:$16 sps:$4 sm:$0xff]   ;;  %v7908_v2 = vld [vmem:[%s9503_s19 + $0x6c] ss:$16 sps:$4 sm:$0xff]  }
0x124b   :  { %v5092_v11 = vpack.c.bf16 %v5084_v10, %v5084_v10  ;;  %5388 = vmatprep.mubr.bf16.mxu0 %v5090_v62  ;;  %v5086_v13 = vpop.f32.mrb[62].mxu1  ;;  %v7900_v62 = vld [vmem:[%s9503_s19 + $0x48] ss:$16 sps:$4 sm:$0xff]   ;;  %v7911_v10 = vld [vmem:[%s9503_s19 + $0x104] ss:$16 sps:$4 sm:$0xff]  }
0x124c   :  { %5389 = vmatmul.mubr.bf16.vlgmr.msra.gmra.mrb[56].mxu0 %v5089_v3  ;;  %v5087_v14 = vpop.f32.mrb[63].mxu1  ;;  %v7903_v3 = vld [vmem:[%s9503_s19 + $0x60] ss:$16 sps:$4 sm:$0xff]   ;;  %v7914_v8 = vld [vmem:[%s9503_s19 + $0x10c] ss:$16 sps:$4 sm:$0xff]  }
0x124d   :  { %5428 = vmatprep.mubr.bf16.mxu1 %v5092_v11  ;;  %5607 = vmatprep.mubr.bf16.mxu0 %v8417_v12  ;;  %v7909_v11 = vld [vmem:[%s9503_s19 + $0x100] ss:$16 sps:$4 sm:$0xff]   ;;  %v7912_v13 = vld [vmem:[%s9503_s19 + $0x108] ss:$16 sps:$4 sm:$0xff]  }
0x124e   :  { %5429 = vmatmul.mubr.bf16.vlgmr.msra.gmra.mrb[64].mxu1 %v5091_v6  ;;  %5576 = vmatpush1.bf16.msra.mxu0 %v7861_v16  ;;  %v7906_v6 = vld [vmem:[%s9503_s19 + $0x68] ss:$16 sps:$4 sm:$0xff]  }
0x124f   :  { %5648 = vmatprep.mubr.bf16.mxu1 %v8417_v12  ;;  %5617 = vmatpush1.bf16.msra.mxu1 %v7864_v17  ;;  %v7915_v17 = vld [vmem:[%s9503_s19 + $0x120] ss:$16 sps:$4 sm:$0xff]  }
0x1250   :  { %5577 = vmatprep.subr.bf16.mxu0 %v7869_v18  ;;  %5618 = vmatprep.subr.bf16.mxu1 %v7872_v19  ;;  %v7918_v18 = vld [vmem:[%s9503_s19 + $0x128] ss:$16 sps:$4 sm:$0xff]   ;;  %v7923_v19 = vld [vmem:[%s9503_s19 + $0x144] ss:$16 sps:$4 sm:$0xff]  }
0x1252   :  { %5578 = vmatpush1.bf16.msra.mxu0 %v7867_v20  ;;  %v7926_v20 = vld [vmem:[%s9503_s19 + $0x14c] ss:$16 sps:$4 sm:$0xff]  }
0x1253   :  { %5619 = vmatpush1.bf16.msra.mxu1 %v7870_v0  ;;  %5579 = vmatprep.subr.bf16.mxu0 %v7875_v22  ;;  %v7921_v22 = vld [vmem:[%s9503_s19 + $0x140] ss:$16 sps:$4 sm:$0xff]  }
0x1254   :  { %5620 = vmatprep.subr.bf16.mxu1 %v7878_v9  ;;  %v7924_v9 = vld [vmem:[%s9503_s19 + $0x148] ss:$16 sps:$4 sm:$0xff]  }
0x1256   :  { %5580 = vmatpush1.bf16.msra.mxu0 %v7873_v23 }
0x1257   :  { %5621 = vmatpush1.bf16.msra.mxu1 %v7876_v26  ;;  %5581 = vmatprep.subr.bf16.mxu0 %v7881_v27  ;;  %v7929_v26 = vld [vmem:[%s9503_s19 + $0x164] ss:$16 sps:$4 sm:$0xff]   ;;  %v7932_v27 = vld [vmem:[%s9503_s19 + $0x16c] ss:$16 sps:$4 sm:$0xff]  }
0x1258   :  { %5622 = vmatprep.subr.bf16.mxu1 %v7884_v28 }
0x125a   :  { %5582 = vmatpush1.bf16.msra.mxu0 %v7879_v29  ;;  %v7930_v29 = vld [vmem:[%s9503_s19 + $0x168] ss:$16 sps:$4 sm:$0xff]  }
0x125b   :  { %5623 = vmatpush1.bf16.msra.mxu1 %v7882_v30  ;;  %5740 = vmatprep.subr.bf16.mxu0 %v7887_v31 }
0x125c   :  { %5781 = vmatprep.subr.bf16.mxu1 %v7890_v32 }
0x131f   :  { %v7103_v33 = vpop.f32.mrb[56].mxu0 }
0x1320   :  { %v7104_v35 = vpop.f32.mrb[57].mxu0 }
0x1321   :  { %v7105_v21 = vadd.f32 %v7104_v35, %v7103_v33  ;;  %v7106_v36 = vpop.f32.mrb[58].mxu0  ;;  %v7125_v37 = vpop.f32.mrb[64].mxu1  ;;  %v7933_v33 = vld [vmem:[%s8619_s25 + $0x40] sm:$0xff]  }
0x1322   :  { %v7107_v24 = vpop.f32.mrb[59].mxu0  ;;  %v7126_v38 = vpop.f32.mrb[65].mxu1  ;;  %v7935_v35 = vld [vmem:[%s8619_s25] sm:$0xff]   ;;  %v7937_v36 = vld [vmem:[%s8619_s25 + $0x48] sm:$0xff]  }
0x1323   :  { %v5391_v39 = vadd.f32 %v7105_v21, %v6777_v34  ;;  %v7127_v40 = vadd.f32 %v7126_v38, %v7125_v37  ;;  %v7128_v41 = vpop.f32.mrb[66].mxu1  ;;  %v7934_v34 = vld [vmem:[%s8619_s25 + $0xc0] sm:$0xff]   ;;  %v7938_v37 = vld [vmem:[%s8619_s25 + $0xc8] sm:$0xff]  }
0x1324   :  { %v7129_v25 = vpop.f32.mrb[67].mxu1  ;;  %v7936_v21 = vld [vmem:[%s8619_s25 + $0x80] sm:$0xff]   ;;  %v7939_v24 = vld [vmem:[%s8619_s25 + $0x8] sm:$0xff]   ;;  %v7943_v41 = vld [vmem:[%s8619_s25 + $0x10] sm:$0xff]  }
0x1325   :  { %v5431_v42 = vadd.f32 %v7127_v40, %v5391_v39  ;;  %v7940_v38 = vld [vmem:[%s8619_s25 + $0x88] sm:$0xff]   ;;  %v7941_v39 = vld [vmem:[%s8619_s25 + $0x50] sm:$0xff]  }
0x1326   :  { %v7942_v40 = vld [vmem:[%s8619_s25 + $0xd0] sm:$0xff]  }
0x1327   :  { %v9341_v43 = vmax.f32 %v5431_v42, 0.0  ;;  %v7944_v25 = vld [vmem:[%s8619_s25 + $0x90] sm:$0xff]   ;;  %v7945_v42 = vld [vmem:[%s8619_s25 + $0x58] sm:$0xff]  }
0x1329   :  { %v5438_v44 = vrot.slane %v9341_v43, 7  ;;  %v5441_v46 = vrot.slane %v9341_v43, 2  ;;  %v5458_v14 = vpack.c.bf16 %v9341_v43, %v9341_v43  ;;  %v5451_v16 = vrot.slane %v9341_v43, 4 }
0x132a   :  { %v5448_v23 = vrot.slane %v9341_v43, 1  ;;  %v7946_v43 = vld [vmem:[%s8619_s25 + $0xd8] sm:$0xff]  }
0x132b   :  { %v5443_v47 = vsel %vm565_vm7, 0.0, %v5441_v46  ;;  %v5440_v48 = vsel %vm565_vm7, 0.0, %v5438_v44  ;;  %v5453_v0 = vsel %vm516_vm4, %v5451_v16, 0.0  ;;  %v7947_v44 = vld [vmem:[%s8619_s25 + $0x18] sm:$0xff]  }
0x132c   :  { %v5445_v50 = vrot.slane %v5443_v47, 5  ;;  %v5455_v28 = vrot.slane %v5453_v0, 5  ;;  %v5450_v30 = vsel %vm516_vm4, %v5448_v23, 0.0  ;;  %v7948_v46 = vld [vmem:[%s8619_s25 + $0x98] sm:$0xff]   ;;  %v7949_v47 = vld [vmem:[%s8619_s25 + $0x60] sm:$0xff]  }
0x132e   :  { %v5447_v53 = vsel %vm563_vm3, %v5440_v48, %v5445_v50  ;;  %v5457_v31 = vsel %vm563_vm3, %v5450_v30, %v5455_v28  ;;  %v7950_v50 = vld [vmem:[%s8619_s25 + $0xe0] sm:$0xff]  }
0x132f   :  { %v5475_v54 = vpack.c.bf16 %v5447_v53, %v5447_v53  ;;  %v5822_v32 = vpack.c.bf16 %v5457_v31, %v5457_v31  ;;  %v7951_v48 = vld [vmem:[%s8619_s25 + $0x20] sm:$0xff]   ;;  %v7954_v53 = vld [vmem:[%s8619_s25 + $0xe8] sm:$0xff]  }
0x1331   :  { %6826 = vmatmul.mubr.msk.bf16.vlgmr.msra.gmra.mrb[60].mxu0 %vm4399_vm13, %v5475_v54  ;;  %6827 = vmatmul.mubr.msk.bf16.vlgmr.msra.gmra.mrb[68].mxu1 %vm4399_vm13, %v5475_v54  ;;  %v7955_v54 = vld [vmem:[%s8619_s25 + $0x28] sm:$0xff]  }
0x1332   :  { %5741 = vmatpush1.bf16.msra.mxu0 %v7885_v51  ;;  %5782 = vmatpush1.bf16.msra.mxu1 %v7888_v52  ;;  %v7952_v51 = vld [vmem:[%s8619_s25 + $0xa0] sm:$0xff]   ;;  %v7953_v52 = vld [vmem:[%s8619_s25 + $0x68] sm:$0xff]  }
0x1333   :  { %5742 = vmatprep.subr.bf16.mxu0 %v7893_v55  ;;  %5783 = vmatprep.subr.bf16.mxu1 %v7896_v56  ;;  %v7956_v55 = vld [vmem:[%s8619_s25 + $0xa8] sm:$0xff]   ;;  %v7957_v56 = vld [vmem:[%s8619_s25 + $0x70] sm:$0xff]  }
0x1334   :  { %5772 = vmatprep.mubr.bf16.mxu0 %v8417_v12  ;;  %5813 = vmatprep.mubr.bf16.mxu1 %v8417_v12 }
0x1336   :  { %5743 = vmatpush1.bf16.msra.mxu0 %v7891_v60  ;;  %5784 = vmatpush1.bf16.msra.mxu1 %v7894_v57  ;;  %v7958_v60 = vld [vmem:[%s8619_s25 + $0xf0] sm:$0xff]  }
0x1337   :  { %5744 = vmatprep.subr.bf16.mxu0 %v7899_v58  ;;  %5785 = vmatprep.subr.bf16.mxu1 %v7902_v59  ;;  %v7959_v57 = vld [vmem:[%s8619_s25 + $0x30] sm:$0xff]   ;;  %v7961_v59 = vld [vmem:[%s8619_s25 + $0x78] sm:$0xff]  }
0x1338   :  { %v7960_v58 = vld [vmem:[%s8619_s25 + $0xb0] sm:$0xff]  }
0x133a   :  { %5745 = vmatpush1.bf16.msra.mxu0 %v7897_v61  ;;  %5786 = vmatpush1.bf16.msra.mxu1 %v7900_v62  ;;  %v7962_v61 = vld [vmem:[%s8619_s25 + $0xf8] sm:$0xff]  }
0x133b   :  { %5746 = vmatprep.subr.bf16.mxu0 %v7905_v1  ;;  %5787 = vmatprep.subr.bf16.mxu1 %v7908_v2  ;;  %v7963_v62 = vld [vmem:[%s8619_s25 + $0x38] sm:$0xff]  }
0x133c   :  { %v7964_v1 = vld [vmem:[%s8619_s25 + $0xb8] sm:$0xff]  }
0x133e   :  { %5747 = vmatpush1.bf16.msra.mxu0 %v7903_v3  ;;  %5788 = vmatpush1.bf16.msra.mxu1 %v7906_v6 }
0x133f   :  { %5922 = vmatprep.subr.bf16.mxu0 %v7911_v10  ;;  %5963 = vmatprep.subr.bf16.mxu1 %v7914_v8 }
0x1341   :  { %6844 = vmatmul.mubr.msk.bf16.vlgmr.msra.gmra.mrb[64].mxu0 %vm4399_vm13, %v5458_v14  ;;  %6845 = vmatmul.mubr.msk.bf16.vlgmr.msra.gmra.mrb[72].mxu1 %vm4399_vm13, %v5458_v14 }
0x1342   :  { %5923 = vmatpush1.bf16.msra.mxu0 %v7909_v11  ;;  %5964 = vmatpush1.bf16.msra.mxu1 %v7912_v13 }
0x1343   :  { %5924 = vmatprep.subr.bf16.mxu0 %v7917_v63  ;;  %5965 = vmatprep.subr.bf16.mxu1 %v7920_v15 }
0x1344   :  { %5954 = vmatprep.mubr.bf16.mxu0 %v8417_v12  ;;  %5995 = vmatprep.mubr.bf16.mxu1 %v8417_v12  ;;  %v7927_v12 = vld [vmem:[%s9503_s19 + $0x160] ss:$16 sps:$4 sm:$0xff]  }
0x1346   :  { %5925 = vmatpush1.bf16.msra.mxu0 %v7915_v17  ;;  %5966 = vmatpush1.bf16.msra.mxu1 %v7918_v18 }
0x1347   :  { %5926 = vmatprep.subr.bf16.mxu0 %v7923_v19  ;;  %5967 = vmatprep.subr.bf16.mxu1 %v7926_v20 }
0x134a   :  { %5927 = vmatpush1.bf16.msra.mxu0 %v7921_v22  ;;  %5968 = vmatpush1.bf16.msra.mxu1 %v7924_v9 }
0x134b   :  { %5928 = vmatprep.subr.bf16.mxu0 %v7929_v26  ;;  %5969 = vmatprep.subr.bf16.mxu1 %v7932_v27  ;;  %v6008_v27 = vld [vmem:[%s8614_s9] sm:$0xf]  ;;  %s8420_s9 = smov [#allocation28]  }
0x134c   :  { %v6013_v28 = vrot.slane %v6008_v27, %v8867_v5  ;;  %v6017_v31 = vrot.slane %v6008_v27, %v8870_v7  ;;  %s6414_s25 = sshll.u32 %s8420_s9, 4  ;;  %s6415_s25 = int_to_ptr.vmem [resolvable:$true] %s6414_s25 }
0x134d   :  { %s8317_s26 = scalar_lea.vmem %s6415_s25, 32  ;;  %p8322_p3 = scmp.lt.s32.totalorder %s6415_s25, %s6415_s25 }
0x134e   :  { %5929 = vmatpush1.bf16.msra.mxu0 %v7927_v12  ;;  %5970 = vmatpush1.bf16.msra.mxu1 %v7930_v29  ;;  %v6021_v12 = vrot.slane %v6008_v27, %v9065_v45  ;;  %p8318_p2 = scmp.ne.s32.totalorder %s6415_s25, %s8317_s26  ;;  %p8323_p4 = scmp.lt.s32.totalorder %s8317_s26, %s8317_s26 }
0x134f   :  { %7131 = vmatprep.subr.bf16.mxu0 %v7933_v33  ;;  %7153 = vmatprep.subr.bf16.mxu1 %v7934_v34 }
0x1350   :  { %p8324_p5 = por %p8323_p4, %p8322_p3 }
0x1351   :  { %6862 = vmatmul.mubr.msk.bf16.vlgmr.msra.gmra.mrb[68].mxu0 %vm4399_vm13, %v5822_v32  ;;  %6863 = vmatmul.mubr.msk.bf16.vlgmr.msra.gmra.mrb[76].mxu1 %vm4399_vm13, %v5822_v32  ;;  %v6025_v32 = vrot.slane %v6008_v27, %v4868_v49 }
0x1352   :  { %7132 = vmatpush3.bf16.msra.mxu0 %v7935_v35  ;;  %7154 = vmatpush3.bf16.msra.mxu1 %v7936_v21  ;;  %p8325_p6 = pnand %p8324_p5, %p8318_p2 }
0x1353   :  { %7133 = vmatprep.subr.bf16.mxu0 %v7937_v36  ;;  %7155 = vmatprep.subr.bf16.mxu1 %v7938_v37 }
0x1356   :  { %7134 = vmatpush3.bf16.msra.mxu0 %v7939_v24  ;;  %7156 = vmatpush3.bf16.msra.mxu1 %v7940_v38 }
0x1357   :  { %7135 = vmatprep.subr.bf16.mxu0 %v7941_v39  ;;  %7157 = vmatprep.subr.bf16.mxu1 %v7942_v40 }
0x135a   :  { %7136 = vmatpush3.bf16.msra.mxu0 %v7943_v41  ;;  %7158 = vmatpush3.bf16.msra.mxu1 %v7944_v25 }
0x135b   :  { %7137 = vmatprep.subr.bf16.mxu0 %v7945_v42  ;;  %7159 = vmatprep.subr.bf16.mxu1 %v7946_v43 }
0x135e   :  { %7138 = vmatpush3.bf16.msra.mxu0 %v7947_v44  ;;  %7160 = vmatpush3.bf16.msra.mxu1 %v7948_v46 }
0x135f   :  { %7139 = vmatprep.subr.bf16.mxu0 %v7949_v47  ;;  %7161 = vmatprep.subr.bf16.mxu1 %v7950_v50 }
0x1362   :  { %7140 = vmatpush3.bf16.msra.mxu0 %v7951_v48  ;;  %7162 = vmatpush3.bf16.msra.mxu1 %v7952_v51  ;;  %v6864_v51 = vld [vmem:[#allocation26] ss:$0 sm:$0xff] }
0x1363   :  { %7141 = vmatprep.subr.bf16.mxu0 %v7953_v52  ;;  %7163 = vmatprep.subr.bf16.mxu1 %v7954_v53 }
0x1366   :  { %7142 = vmatpush3.bf16.msra.mxu0 %v7955_v54  ;;  %7164 = vmatpush3.bf16.msra.mxu1 %v7956_v55 }
0x1367   :  { %7143 = vmatprep.subr.bf16.mxu0 %v7957_v56  ;;  %7165 = vmatprep.subr.bf16.mxu1 %v7958_v60 }
0x136a   :  { %7144 = vmatpush3.bf16.msra.mxu0 %v7959_v57  ;;  %7166 = vmatpush3.bf16.msra.mxu1 %v7960_v58 }
0x136b   :  { %7145 = vmatprep.subr.bf16.mxu0 %v7961_v59  ;;  %7167 = vmatprep.subr.bf16.mxu1 %v7962_v61 }
0x136e   :  { %7146 = vmatpush3.bf16.msra.mxu0 %v7963_v62  ;;  %7168 = vmatpush3.bf16.msra.mxu1 %v7964_v1 }
0x1404   :  { %v5609_v2 = vpop.f32.mrb[60].mxu0  ;;  %v5650_v3 = vpop.f32.mrb[68].mxu1 }
0x1405   :  { %v5611_v6 = vpop.f32.mrb[61].mxu0  ;;  %v5652_v10 = vpop.f32.mrb[69].mxu1 }
0x1406   :  { %v5613_v8 = vpop.f32.mrb[62].mxu0  ;;  %v5654_v11 = vpop.f32.mrb[70].mxu1 }
0x1407   :  { %v5614_v13 = vpop.f32.mrb[63].mxu0  ;;  %v5655_v14 = vpop.f32.mrb[71].mxu1 }
0x1414   :  { %v5774_v63 = vpop.f32.mrb[64].mxu0  ;;  %v5815_v15 = vpop.f32.mrb[72].mxu1 }
0x1415   :  { %v5775_v16 = vadd.f32 %v5774_v63, %v5609_v2  ;;  %v5816_v17 = vadd.f32 %v5815_v15, %v5650_v3  ;;  %v5776_v18 = vpop.f32.mrb[65].mxu0  ;;  %v5817_v19 = vpop.f32.mrb[73].mxu1 }
0x1416   :  { %v5777_v20 = vadd.f32 %v5776_v18, %v5611_v6  ;;  %v5818_v0 = vadd.f32 %v5817_v19, %v5652_v10  ;;  %v5778_v22 = vpop.f32.mrb[66].mxu0  ;;  %v5819_v9 = vpop.f32.mrb[74].mxu1 }
0x1417   :  { %v5779_v23 = vpop.f32.mrb[67].mxu0  ;;  %v5820_v26 = vpop.f32.mrb[75].mxu1 }
0x1424   :  { %v5956_v29 = vpop.f32.mrb[68].mxu0  ;;  %v5997_v30 = vpop.f32.mrb[76].mxu1 }
0x1425   :  { %v6004_v33 = vadd.f32 %v5956_v29, %v5775_v16  ;;  %v6006_v34 = vadd.f32 %v5997_v30, %v5816_v17  ;;  %v5958_v35 = vpop.f32.mrb[69].mxu0  ;;  %v5999_v21 = vpop.f32.mrb[77].mxu1 }
0x1426   :  { %v6005_v36 = vadd.f32 %v5958_v35, %v5777_v20  ;;  %v6007_v37 = vadd.f32 %v5999_v21, %v5818_v0  ;;  %v5960_v24 = vpop.f32.mrb[70].mxu0  ;;  %v6001_v38 = vpop.f32.mrb[78].mxu1 }
0x1427   :  { %v6030_v39 = vadd.f32 %v6013_v28, %v6004_v33  ;;  %v6032_v40 = vadd.f32 %v6021_v12, %v6006_v34  ;;  %v5961_v5 = vpop.f32.mrb[71].mxu0  ;;  %v6002_v41 = vpop.f32.mrb[79].mxu1 }
0x1428   :  { %v6031_v45 = vadd.f32 %v6017_v31, %v6005_v36  ;;  %v6033_v25 = vadd.f32 %v6025_v32, %v6007_v37 }
0x1429   :  { %v6034_v42 = vmax.f32 %v6030_v39, 0.0  ;;  %v6036_v43 = vmax.f32 %v6032_v40, 0.0 }
0x142a   :  { %v6035_v7 = vmax.f32 %v6031_v45, 0.0  ;;  %v6037_v44 = vmax.f32 %v6033_v25, 0.0 }
0x142b   :  { %v6038_v46 = vpack.c.bf16 %v6034_v42, %v6034_v42  ;;  %v6040_v47 = vpack.c.bf16 %v6036_v43, %v6036_v43 }
0x142c   :  { %v6039_v4 = vpack.c.bf16 %v6035_v7, %v6035_v7  ;;  %v6041_v49 = vpack.c.bf16 %v6037_v44, %v6037_v44 }
0x142e   :  { %6337 = vmatprep.mubr.bf16.mxu0 %v6039_v4  ;;  %6377 = vmatprep.mubr.bf16.mxu1 %v6041_v49 }
0x142f   :  { %6338 = vmatmul.mubr.bf16.vlgmr.msra.gmra.mrb[72].mxu0 %v6038_v46  ;;  %6378 = vmatmul.mubr.bf16.vlgmr.msra.gmra.mrb[80].mxu1 %v6040_v47 }
0x1502   :  { %v7147_v50 = vpop.f32.mrb[72].mxu0  ;;  %v7169_v48 = vpop.f32.mrb[80].mxu1 }
0x1503   :  { %v7148_v52 = vpop.f32.mrb[73].mxu0  ;;  %v7170_v53 = vpop.f32.mrb[81].mxu1 }
0x1504   :  { %v7149_v54 = vadd.f32 %v7148_v52, %v7147_v50  ;;  %v7171_v55 = vadd.f32 %v7170_v53, %v7169_v48  ;;  %v7150_v56 = vpop.f32.mrb[74].mxu0  ;;  %v7172_v60 = vpop.f32.mrb[82].mxu1 }
0x1505   :  { %v7151_v57 = vpop.f32.mrb[75].mxu0  ;;  %v7173_v58 = vpop.f32.mrb[83].mxu1 }
0x1506   :  { %v6340_v59 = vadd.f32 %v7149_v54, %v6864_v51 }
0x1508   :  { %v6380_v61 = vadd.f32 %v7171_v55, %v6340_v59 }
0x150a   :  { %v6385_v62 = vmax.f32 %v6380_v61, 0.0 }
0x150c   :  { %v6386_v1 = vsel %vm563_vm3, %v6385_v62, 0.0  ;;  %v6396_v2 = vrot.slane %v6385_v62, 3 }
0x150d   :  { %v6387_v3 = vrot.slane %v6386_v1, 4 }
0x150e   :  { %v6398_v6 = vsel %vm563_vm3, %v6396_v2, 0.0 }
0x150f   :  { %v6388_v10 = vadd.f32 %v6387_v3, %v6386_v1  ;;  %v6399_v8 = vrot.slane %v6398_v6, 4 }
0x1511   :  { %v6389_v11 = vrot.slane %v6388_v10, 2  ;;  %v6400_v13 = vadd.f32 %v6399_v8, %v6398_v6 }
0x1513   :  { %v6390_v14 = vadd.f32 %v6389_v11, %v6388_v10  ;;  %v6401_v63 = vrot.slane %v6400_v13, 2 }
0x1515   :  { %v6391_v15 = vrot.slane %v6390_v14, 1  ;;  %v6402_v16 = vadd.f32 %v6401_v63, %v6400_v13 }
0x1517   :  { %v6392_v17 = vadd.f32 %v6391_v15, %v6390_v14  ;;  %v6403_v18 = vrot.slane %v6402_v16, 1 }
0x1519   :  { %v6404_v19 = vadd.f32 %v6403_v18, %v6402_v16  ;;  %v6394_v20 = vmul.f32 0.33333334, %v6392_v17 }
0x151b   :  { %v6405_v0 = vmul.f32 0.33333334, %v6404_v19 }
0x151d   :  { %v6406_v22 = vsel %vm565_vm7, %v6394_v20, %v6405_v0 }
0x151e   :  { %6407 = vst [vmem:[#allocation28] sm:$0x3] %v6406_v22 }
0x151f   :  { %8328 = shalt.err (!%p8325_p6)
}
0x1520   :  { %s8329_s8 = scalar_lea.hbm %s8629_s27, 32 }
0x1521   :  { %p8330_p7 = scmp.ne.s32.totalorder %s8629_s27, %s8329_s8  ;;  %p8333_p8 = scmp.lt.u32.totalorder %s8329_s8, %s8629_s27 }
0x1523   :  { %p8335_p9 = pnand %p8333_p8, %p8330_p7 }
0x1525   :  { %8338 = shalt.err (!%p8335_p9)
}
0x1526   :  { %6417 = dma.vmem_to_hbm [thread:$0]  %s6415_s25, 32, %s8629_s27, [#allocation4]  }
0x1527   :  { %8357 = dma.done.wait [#allocation4], 32  }
0x1528   :  { %8358 = vsyncadd [#allocation4], 4294967264 }
0x1529   :  { %6421 = vsyncpa [#allocation3], 1 }
0x152a   :  { %6422 = vsyncpa [#allocation6], 1 }
0x152b   :  { %6423 = vsyncpa [#allocation9], 1 }
0x152c   :  { %6424 = vsyncpa [#allocation12], 1 }
0x152d   :  { %6425 = vsyncpa [#allocation15], 1 }
0x152e   :  { %6426 = vsyncpa [#allocation18], 1 }
0x152f   :  { %6427 = vsyncpa [#allocation21], 1 }
0x1530   :  { %6428 = vsyncpa [#allocation24], 1 }
0x1531   :  { %6429 = vsyncpa [#allocation27], 1 }
0x1532   :  { %6430 = vsyncpa [#allocation4], 1 }

</bundles_post_ra>
